<compile_context>
chip_gen: v7x
topology: tpu7x:2x2x1
jax: 0.10.0
libtpu: 0.0.40
codegen_flags: <defaults>
</compile_context>

<pallas_src>
import functools
import math

import jax
import jax.numpy as jnp
from jax import lax
from jax.experimental import pallas as pl
from jax.experimental.pallas import tpu as pltpu


def _vmem_spec():
    return pl.BlockSpec(memory_space=pltpu.MemorySpace.VMEM)


# ----------------------------- fused kernel -------------------------------

def _bilstm_kernel(x_ref, w1_ref, b1_ref, wih0_ref, wihr_ref, whh_ref, b_ref,
                   w2_ref, b2_ref, o_ref,
                   gxs_ref, fwd_ref, bwd_ref, act_ref, *, seq_len, batch):
    """Fused fc1 -> tanh -> multi-layer bidirectional LSTM -> fc2.

    x_ref:    (T*B, I)   f32 flattened input sequence
    w1_ref:   (I, H) bf16, b1_ref: (1, H) f32
    wih0_ref: (H, 8H) bf16        layer-0 input->gate weights (no zero rows)
    wihr_ref: (max(L-1,1), 2H, 8H) bf16   layers 1.. input->gate weights
    whh_ref:  (L, 2H, 8H) bf16    block-diagonal recurrent weights
    b_ref:    (L, 1, 8H)  f32     b_ih + b_hh
    w2_ref:   (2H, O_pad) bf16, b2_ref: (1, O_pad) f32
    o_ref:    (T*B, O_pad)
    Column layout of every 8H gate axis: [i_f i_b | f_f f_b | g_f g_b | o_f o_b].

    scratch:
      gxs_ref: (T, B, 8H) f32  time-aligned gate projections for the current layer
      fwd_ref: (T, B, 2H) f32  h written at fwd time index (fwd lanes valid)
      bwd_ref: (T, B, 2H) f32  h written at bwd time index (bwd lanes valid)
      act_ref: (T*B, 2H)  f32  merged [fwd | bwd] layer output (next layer's input)
    """
    T = seq_len
    B = batch
    num_layers = b_ref.shape[0]
    H = w1_ref.shape[1]
    H2 = 2 * H
    G = 8 * H

    f32 = jnp.float32
    bf16 = jnp.bfloat16

    # ---- fc1 + tanh over the whole flattened sequence (one bf16 matmul) ----
    h0 = jnp.tanh(
        jnp.dot(x_ref[...].astype(bf16), w1_ref[...],
                preferred_element_type=f32) + b1_ref[...])            # (TB, H) f32

    # ---- static lane masks, hoisted once ----
    col_g = lax.broadcasted_iota(jnp.int32, (B, G), 1)
    is_fwd_g = (col_g % H2) < H          # fwd lanes within every gate-pair block
    col_h = lax.broadcasted_iota(jnp.int32, (B, H2), 1)
    is_fwd_h = col_h < H                 # fwd lanes of [h_fwd | h_bwd]

    for l in range(num_layers):          # static layer loop (L small)
        # -- hoisted input projection for the whole sequence, bias folded in --
        if l == 0:
            gx = jnp.dot(h0.astype(bf16), wih0_ref[...],
                         preferred_element_type=f32) + b_ref[0]       # (TB, G)
        else:
            gx = jnp.dot(act_ref[...].astype(bf16), wihr_ref[l - 1],
                         preferred_element_type=f32) + b_ref[l]       # (TB, G)

        # -- prologue (off the serial chain): time-align fwd/bwd lanes so each
        #    recurrence step reads one contiguous, tile-aligned (B, G) plane --
        for t in range(T):               # static, not on the h->h critical path
            gxs_ref[t] = jnp.where(is_fwd_g,
                                   gx[t * B:(t + 1) * B, :],
                                   gx[(T - 1 - t) * B:(T - t) * B, :])

        whh = whh_ref[l]                 # (2H, G) bf16, block-diagonal
        h = jnp.zeros((B, H2), f32)      # [h_fwd | h_bwd]
        c = jnp.zeros((B, H2), f32)      # [c_fwd | c_bwd]

        def step(s, carry):
            h, c = carry
            gates = gxs_ref[s] + jnp.dot(h.astype(bf16), whh,
                                         preferred_element_type=f32)  # (B, G)
            # gate-sliced activations: sigmoid on i|f and o, tanh only on g
            if_s = jax.nn.sigmoid(gates[:, 0:2 * H2])        # [i_f i_b f_f f_b]
            g_t = jnp.tanh(gates[:, 2 * H2:3 * H2])          # [g_f g_b]
            o_s = jax.nn.sigmoid(gates[:, 3 * H2:4 * H2])    # [o_f o_b]
            c_n = if_s[:, H2:2 * H2] * c + if_s[:, 0:H2] * g_t
            h_n = o_s * jnp.tanh(c_n)
            # full-width, tile-aligned stores (no masked per-step lane scatter)
            fwd_ref[s] = h_n                  # fwd half valid at time s
            bwd_ref[T - 1 - s] = h_n          # bwd half valid at time T-1-s
            return h_n, c_n

        h, c = lax.fori_loop(0, T, step, (h, c), unroll=min(T, 8))

        # -- merge direction buffers into the next layer's input, once per layer --
        for t in range(T):
            act_ref[t * B:(t + 1) * B, :] = jnp.where(
                is_fwd_h, fwd_ref[t], bwd_ref[t])

    # ---- fc2 epilogue: lane-padded (multiple of 128) dense output store ----
    out = jnp.dot(act_ref[...].astype(bf16), w2_ref[...],
                  preferred_element_type=f32) + b2_ref[...]
    o_ref[...] = out.astype(o_ref.dtype)


# ----------------------------- parameter packing --------------------------

def init_params(key, input_size, output_size, hidden_size, num_layers):
    """Deterministic synthetic parameters (PyTorch-like uniform init), packed
    into the fused-kernel layout. Dict contains ONLY arrays (no python ints)."""
    H = hidden_size
    keys = iter(jax.random.split(key, 4 + 8 * num_layers))

    def u(k, shape, bound):
        return jax.random.uniform(k, shape, jnp.float32, -bound, bound)

    p = {}
    # fc1 (stored transposed: (in, out)); weight in bf16, bias in f32
    bnd1 = 1.0 / math.sqrt(input_size)
    p["w1"] = u(next(keys), (input_size, H), bnd1).astype(jnp.bfloat16)
    p["b1"] = u(next(keys), (1, H), bnd1)

    bndh = 1.0 / math.sqrt(H)
    zH = jnp.zeros((H, H), jnp.float32)
    wih_layers, whh_layers, b_layers = [], [], []
    for l in range(num_layers):
        din = H if l == 0 else 2 * H
        per_dir = {}
        for d in ("f", "b"):
            w_ih = u(next(keys), (din, 4 * H), bndh)           # transposed W_ih
            w_hh = u(next(keys), (H, 4 * H), bndh)             # transposed W_hh
            bias = (u(next(keys), (1, 4 * H), bndh)
                    + u(next(keys), (1, 4 * H), bndh))         # b_ih + b_hh
            per_dir[d] = (w_ih, w_hh, bias)
        wf, hf, bf = per_dir["f"]
        wb, hb, bb = per_dir["b"]
        # Gate-major interleaved columns: [i_f i_b f_f f_b g_f g_b o_f o_b]
        wih_blocks, whh_blocks, b_blocks = [], [], []
        for g in range(4):
            cs = slice(g * H, (g + 1) * H)
            wih_blocks += [wf[:, cs], wb[:, cs]]
            whh_blocks += [jnp.concatenate([hf[:, cs], zH], 0),   # fwd rows only
                           jnp.concatenate([zH, hb[:, cs]], 0)]   # bwd rows only
            b_blocks += [bf[:, cs], bb[:, cs]]
        wih_layers.append(jnp.concatenate(wih_blocks, 1))   # (din, 8H)
        whh_layers.append(jnp.concatenate(whh_blocks, 1))   # (2H, 8H) block-diagonal
        b_layers.append(jnp.concatenate(b_blocks, 1))       # (1, 8H)

    p["wih0"] = wih_layers[0].astype(jnp.bfloat16)           # (H, 8H), no zero rows
    if num_layers > 1:
        p["wih_rest"] = jnp.stack(wih_layers[1:]).astype(jnp.bfloat16)  # (L-1, 2H, 8H)
    else:
        p["wih_rest"] = jnp.zeros((1, 2 * H, 8 * H), jnp.bfloat16)      # dummy, never read
    p["whh"] = jnp.stack(whh_layers).astype(jnp.bfloat16)    # (L, 2H, 8H)
    p["b"] = jnp.stack(b_layers)                             # (L, 1, 8H) f32

    # fc2 (stored transposed: (2H, out)); padded + cast inside the wrapper
    bnd2 = 1.0 / math.sqrt(2 * H)
    p["w2"] = u(next(keys), (2 * H, output_size), bnd2)
    p["b2"] = u(next(keys), (1, output_size), bnd2)
    return p


# ----------------------------- model wrapper ------------------------------

def bilstm_forward(x, params):
    """x: (T, B, input_size) -> (T, B, output_size). Dropout is identity (eval)."""
    T, B, I = x.shape
    H = params["w1"].shape[1]          # static from shape, no tracer leaks
    H2 = 2 * H
    O = params["w2"].shape[1]
    O_pad = ((O + 127) // 128) * 128   # lane-dense output slab
    L = params["b"].shape[0]

    w2p = jnp.zeros((H2, O_pad), jnp.bfloat16).at[:, :O].set(
        params["w2"].astype(jnp.bfloat16))
    b2p = jnp.zeros((1, O_pad), jnp.float32).at[:, :O].set(params["b2"])

    # VMEM budget from the actual footprint with headroom, capped for v7x (64 MiB phys).
    def nbytes(a):
        return int(a.size) * a.dtype.itemsize
    scratch_bytes = (T * 8 * 8 * H * 4          # gxs (B padded to 8 sublanes)
                     + 2 * T * 8 * max(H2, 128) * 4
                     + T * B * max(H2, 128) * 4)
    footprint = (nbytes(x)
                 + sum(nbytes(params[k]) for k in
                       ("w1", "b1", "wih0", "wih_rest", "whh", "b"))
                 + nbytes(w2p) + nbytes(b2p)
                 + T * B * O_pad * 4 + scratch_bytes)
    vmem_limit = int(min(48 * 1024 * 1024, max(4 * 1024 * 1024, 3 * footprint)))

    kernel = functools.partial(_bilstm_kernel, seq_len=T, batch=B)
    out = pl.pallas_call(
        kernel,
        out_shape=jax.ShapeDtypeStruct((T * B, O_pad), x.dtype),
        in_specs=[_vmem_spec()] * 9,
        out_specs=_vmem_spec(),
        scratch_shapes=[
            pltpu.VMEM((T, B, 8 * H), jnp.float32),   # time-aligned gate projections
            pltpu.VMEM((T, B, H2), jnp.float32),      # fwd-time-indexed h buffer
            pltpu.VMEM((T, B, H2), jnp.float32),      # bwd-time-indexed h buffer
            pltpu.VMEM((T * B, H2), jnp.float32),     # merged layer input/output
        ],
        compiler_params=pltpu.CompilerParams(vmem_limit_bytes=vmem_limit),
    )(x.reshape(T * B, I), params["w1"], params["b1"],
      params["wih0"], params["wih_rest"], params["whh"], params["b"],
      w2p, b2p)
    return out[:, :O].reshape(T, B, O)


# --------------------------------- main ------------------------------------

if __name__ == "__main__":
    input_size = 16
    hidden_size = 32
    output_size = 8
    num_layers = 2
    seq_len = 8
    batch = 2

    key = jax.random.PRNGKey(0)
    k_x, k_p = jax.random.split(key)

    x = jax.random.normal(k_x, (seq_len, batch, input_size), jnp.float32)
    params = init_params(k_p, input_size, output_size, hidden_size, num_layers)

    out = jax.jit(bilstm_forward)(x, params)
    out = jax.block_until_ready(out)

    assert out.shape == (seq_len, batch, output_size), out.shape
    assert out.dtype == jnp.float32
    print("KERNEL_OK")
</pallas_src>

<mosaic_0001>
module attributes {stable_mosaic.version = 11 : i64} {
  func.func @_bilstm_kernel(%arg0: memref<16x16xf32, #tpu.memory_space<vmem>>, %arg1: memref<16x32xbf16, #tpu.memory_space<vmem>>, %arg2: memref<1x32xf32, #tpu.memory_space<vmem>>, %arg3: memref<32x256xbf16, #tpu.memory_space<vmem>>, %arg4: memref<1x64x256xbf16, #tpu.memory_space<vmem>>, %arg5: memref<2x64x256xbf16, #tpu.memory_space<vmem>>, %arg6: memref<2x1x256xf32, #tpu.memory_space<vmem>>, %arg7: memref<64x128xbf16, #tpu.memory_space<vmem>>, %arg8: memref<1x128xf32, #tpu.memory_space<vmem>>, %arg9: memref<16x128xf32, #tpu.memory_space<vmem>>, %arg10: memref<8x2x256xf32, #tpu.memory_space<vmem>>, %arg11: memref<8x2x64xf32, #tpu.memory_space<vmem>>, %arg12: memref<8x2x64xf32, #tpu.memory_space<vmem>>, %arg13: memref<16x64xf32, #tpu.memory_space<vmem>>) attributes {dimension_semantics = [], scalar_prefetch = 0 : i64, scratch_operands = 4 : i64, tpu.core_type = #tpu.core_type<tc>} {
    %c0 = arith.constant 0 : index
    %c0_0 = arith.constant 0 : index
    %0 = vector.load %arg0[%c0, %c0_0] : memref<16x16xf32, #tpu.memory_space<vmem>>, vector<16x16xf32>
    %1 = arith.truncf %0 : vector<16x16xf32> to vector<16x16xbf16>
    %c0_1 = arith.constant 0 : index
    %c0_2 = arith.constant 0 : index
    %2 = vector.load %arg1[%c0_1, %c0_2] : memref<16x32xbf16, #tpu.memory_space<vmem>>, vector<16x32xbf16>
    %cst = arith.constant dense<0.000000e+00> : vector<16x32xf32>
    %3 = tpu.matmul %1, %2, %cst {dimension_numbers = #tpu.dot_dimension_numbers<[1], [0], [0], [1], [0, 0, 1, 1], [], []>} : vector<16x16xbf16>, vector<16x32xbf16>, vector<16x32xf32> -> vector<16x32xf32>
    %c0_3 = arith.constant 0 : index
    %c0_4 = arith.constant 0 : index
    %4 = vector.load %arg2[%c0_3, %c0_4] : memref<1x32xf32, #tpu.memory_space<vmem>>, vector<1x32xf32>
    %5 = vector.broadcast %4 : vector<1x32xf32> to vector<16x32xf32>
    %6 = arith.addf %3, %5 : vector<16x32xf32>
    %7 = math.tanh %6 : vector<16x32xf32>
    %8 = tpu.iota {dimensions = array<i32: 1>} : vector<2x256xi32>
    %c64_i32 = arith.constant 64 : i32
    %c0_i32 = arith.constant 0 : i32
    %9 = arith.cmpi eq, %c64_i32, %c0_i32 : i32
    %c1_i32 = arith.constant 1 : i32
    %10 = arith.select %9, %c1_i32, %c64_i32 : i32
    %11 = vector.broadcast %10 : i32 to vector<2x256xi32>
    %12 = arith.remsi %8, %11 : vector<2x256xi32>
    %c0_i32_5 = arith.constant 0 : i32
    %13 = vector.broadcast %c0_i32_5 : i32 to vector<2x256xi32>
    %14 = arith.cmpi ne, %12, %13 : vector<2x256xi32>
    %c0_i32_6 = arith.constant 0 : i32
    %15 = vector.broadcast %c0_i32_6 : i32 to vector<2x256xi32>
    %16 = arith.cmpi slt, %12, %15 : vector<2x256xi32>
    %c0_i32_7 = arith.constant 0 : i32
    %17 = arith.cmpi slt, %10, %c0_i32_7 : i32
    %18 = vector.broadcast %17 : i1 to vector<2x256xi1>
    %19 = vector.broadcast %18 : vector<2x256xi1> to vector<2x256xi1>
    %20 = arith.xori %16, %19 : vector<2x256xi1>
    %21 = arith.andi %20, %14 : vector<2x256xi1>
    %22 = vector.broadcast %10 : i32 to vector<2x256xi32>
    %23 = arith.addi %12, %22 : vector<2x256xi32>
    %24 = arith.select %21, %23, %12 : vector<2x256xi1>, vector<2x256xi32>
    %c32_i32 = arith.constant 32 : i32
    %25 = vector.broadcast %c32_i32 : i32 to vector<2x256xi32>
    %26 = arith.cmpi slt, %24, %25 : vector<2x256xi32>
    %27 = tpu.iota {dimensions = array<i32: 1>} : vector<2x64xi32>
    %c32_i32_8 = arith.constant 32 : i32
    %28 = vector.broadcast %c32_i32_8 : i32 to vector<2x64xi32>
    %29 = arith.cmpi slt, %27, %28 : vector<2x64xi32>
    %30 = arith.truncf %7 : vector<16x32xf32> to vector<16x32xbf16>
    %c0_9 = arith.constant 0 : index
    %c0_10 = arith.constant 0 : index
    %31 = vector.load %arg3[%c0_9, %c0_10] : memref<32x256xbf16, #tpu.memory_space<vmem>>, vector<32x256xbf16>
    %cst_11 = arith.constant dense<0.000000e+00> : vector<16x256xf32>
    %32 = tpu.matmul %30, %31, %cst_11 {dimension_numbers = #tpu.dot_dimension_numbers<[1], [0], [0], [1], [0, 0, 1, 1], [], []>} : vector<16x32xbf16>, vector<32x256xbf16>, vector<16x256xf32> -> vector<16x256xf32>
    %c0_12 = arith.constant 0 : index
    %c0_13 = arith.constant 0 : index
    %c0_14 = arith.constant 0 : index
    %33 = vector.load %arg6[%c0_12, %c0_13, %c0_14] : memref<2x1x256xf32, #tpu.memory_space<vmem>>, vector<1x1x256xf32>
    %34 = vector.shape_cast %33 : vector<1x1x256xf32> to vector<1x256xf32>
    %35 = vector.broadcast %34 : vector<1x256xf32> to vector<16x256xf32>
    %36 = arith.addf %32, %35 : vector<16x256xf32>
    %37 = vector.extract_strided_slice %36 {offsets = [0, 0], sizes = [2, 256], strides = [1, 1]} : vector<16x256xf32> to vector<2x256xf32>
    %38 = vector.extract_strided_slice %36 {offsets = [14, 0], sizes = [2, 256], strides = [1, 1]} : vector<16x256xf32> to vector<2x256xf32>
    %39 = arith.select %26, %37, %38 : vector<2x256xi1>, vector<2x256xf32>
    %c0_15 = arith.constant 0 : index
    %c0_16 = arith.constant 0 : index
    %c0_17 = arith.constant 0 : index
    %40 = vector.load %arg10[%c0_15, %c0_16, %c0_17] : memref<8x2x256xf32, #tpu.memory_space<vmem>>, vector<1x2x256xf32>
    %41 = vector.shape_cast %40 : vector<1x2x256xf32> to vector<2x256xf32>
    %42 = vector.shape_cast %39 : vector<2x256xf32> to vector<1x2x256xf32>
    tpu.vector_store %arg10[%c0_15, %c0_16, %c0_17], %42 {strides = array<i32>} : memref<8x2x256xf32, #tpu.memory_space<vmem>>, vector<1x2x256xf32>,
    %43 = vector.extract_strided_slice %36 {offsets = [2, 0], sizes = [2, 256], strides = [1, 1]} : vector<16x256xf32> to vector<2x256xf32>
    %44 = vector.extract_strided_slice %36 {offsets = [12, 0], sizes = [2, 256], strides = [1, 1]} : vector<16x256xf32> to vector<2x256xf32>
    %45 = arith.select %26, %43, %44 : vector<2x256xi1>, vector<2x256xf32>
    %c1 = arith.constant 1 : index
    %c0_18 = arith.constant 0 : index
    %c0_19 = arith.constant 0 : index
    %46 = vector.load %arg10[%c1, %c0_18, %c0_19] : memref<8x2x256xf32, #tpu.memory_space<vmem>>, vector<1x2x256xf32>
    %47 = vector.shape_cast %46 : vector<1x2x256xf32> to vector<2x256xf32>
    %48 = vector.shape_cast %45 : vector<2x256xf32> to vector<1x2x256xf32>
    tpu.vector_store %arg10[%c1, %c0_18, %c0_19], %48 {strides = array<i32>} : memref<8x2x256xf32, #tpu.memory_space<vmem>>, vector<1x2x256xf32>,
    %49 = vector.extract_strided_slice %36 {offsets = [4, 0], sizes = [2, 256], strides = [1, 1]} : vector<16x256xf32> to vector<2x256xf32>
    %50 = vector.extract_strided_slice %36 {offsets = [10, 0], sizes = [2, 256], strides = [1, 1]} : vector<16x256xf32> to vector<2x256xf32>
    %51 = arith.select %26, %49, %50 : vector<2x256xi1>, vector<2x256xf32>
    %c2 = arith.constant 2 : index
    %c0_20 = arith.constant 0 : index
    %c0_21 = arith.constant 0 : index
    %52 = vector.load %arg10[%c2, %c0_20, %c0_21] : memref<8x2x256xf32, #tpu.memory_space<vmem>>, vector<1x2x256xf32>
    %53 = vector.shape_cast %52 : vector<1x2x256xf32> to vector<2x256xf32>
    %54 = vector.shape_cast %51 : vector<2x256xf32> to vector<1x2x256xf32>
    tpu.vector_store %arg10[%c2, %c0_20, %c0_21], %54 {strides = array<i32>} : memref<8x2x256xf32, #tpu.memory_space<vmem>>, vector<1x2x256xf32>,
    %55 = vector.extract_strided_slice %36 {offsets = [6, 0], sizes = [2, 256], strides = [1, 1]} : vector<16x256xf32> to vector<2x256xf32>
    %56 = vector.extract_strided_slice %36 {offsets = [8, 0], sizes = [2, 256], strides = [1, 1]} : vector<16x256xf32> to vector<2x256xf32>
    %57 = arith.select %26, %55, %56 : vector<2x256xi1>, vector<2x256xf32>
    %c3 = arith.constant 3 : index
    %c0_22 = arith.constant 0 : index
    %c0_23 = arith.constant 0 : index
    %58 = vector.load %arg10[%c3, %c0_22, %c0_23] : memref<8x2x256xf32, #tpu.memory_space<vmem>>, vector<1x2x256xf32>
    %59 = vector.shape_cast %58 : vector<1x2x256xf32> to vector<2x256xf32>
    %60 = vector.shape_cast %57 : vector<2x256xf32> to vector<1x2x256xf32>
    tpu.vector_store %arg10[%c3, %c0_22, %c0_23], %60 {strides = array<i32>} : memref<8x2x256xf32, #tpu.memory_space<vmem>>, vector<1x2x256xf32>,
    %61 = vector.extract_strided_slice %36 {offsets = [8, 0], sizes = [2, 256], strides = [1, 1]} : vector<16x256xf32> to vector<2x256xf32>
    %62 = vector.extract_strided_slice %36 {offsets = [6, 0], sizes = [2, 256], strides = [1, 1]} : vector<16x256xf32> to vector<2x256xf32>
    %63 = arith.select %26, %61, %62 : vector<2x256xi1>, vector<2x256xf32>
    %c4 = arith.constant 4 : index
    %c0_24 = arith.constant 0 : index
    %c0_25 = arith.constant 0 : index
    %64 = vector.load %arg10[%c4, %c0_24, %c0_25] : memref<8x2x256xf32, #tpu.memory_space<vmem>>, vector<1x2x256xf32>
    %65 = vector.shape_cast %64 : vector<1x2x256xf32> to vector<2x256xf32>
    %66 = vector.shape_cast %63 : vector<2x256xf32> to vector<1x2x256xf32>
    tpu.vector_store %arg10[%c4, %c0_24, %c0_25], %66 {strides = array<i32>} : memref<8x2x256xf32, #tpu.memory_space<vmem>>, vector<1x2x256xf32>,
    %67 = vector.extract_strided_slice %36 {offsets = [10, 0], sizes = [2, 256], strides = [1, 1]} : vector<16x256xf32> to vector<2x256xf32>
    %68 = vector.extract_strided_slice %36 {offsets = [4, 0], sizes = [2, 256], strides = [1, 1]} : vector<16x256xf32> to vector<2x256xf32>
    %69 = arith.select %26, %67, %68 : vector<2x256xi1>, vector<2x256xf32>
    %c5 = arith.constant 5 : index
    %c0_26 = arith.constant 0 : index
    %c0_27 = arith.constant 0 : index
    %70 = vector.load %arg10[%c5, %c0_26, %c0_27] : memref<8x2x256xf32, #tpu.memory_space<vmem>>, vector<1x2x256xf32>
    %71 = vector.shape_cast %70 : vector<1x2x256xf32> to vector<2x256xf32>
    %72 = vector.shape_cast %69 : vector<2x256xf32> to vector<1x2x256xf32>
    tpu.vector_store %arg10[%c5, %c0_26, %c0_27], %72 {strides = array<i32>} : memref<8x2x256xf32, #tpu.memory_space<vmem>>, vector<1x2x256xf32>,
    %73 = vector.extract_strided_slice %36 {offsets = [12, 0], sizes = [2, 256], strides = [1, 1]} : vector<16x256xf32> to vector<2x256xf32>
    %74 = vector.extract_strided_slice %36 {offsets = [2, 0], sizes = [2, 256], strides = [1, 1]} : vector<16x256xf32> to vector<2x256xf32>
    %75 = arith.select %26, %73, %74 : vector<2x256xi1>, vector<2x256xf32>
    %c6 = arith.constant 6 : index
    %c0_28 = arith.constant 0 : index
    %c0_29 = arith.constant 0 : index
    %76 = vector.load %arg10[%c6, %c0_28, %c0_29] : memref<8x2x256xf32, #tpu.memory_space<vmem>>, vector<1x2x256xf32>
    %77 = vector.shape_cast %76 : vector<1x2x256xf32> to vector<2x256xf32>
    %78 = vector.shape_cast %75 : vector<2x256xf32> to vector<1x2x256xf32>
    tpu.vector_store %arg10[%c6, %c0_28, %c0_29], %78 {strides = array<i32>} : memref<8x2x256xf32, #tpu.memory_space<vmem>>, vector<1x2x256xf32>,
    %79 = vector.extract_strided_slice %36 {offsets = [14, 0], sizes = [2, 256], strides = [1, 1]} : vector<16x256xf32> to vector<2x256xf32>
    %80 = vector.extract_strided_slice %36 {offsets = [0, 0], sizes = [2, 256], strides = [1, 1]} : vector<16x256xf32> to vector<2x256xf32>
    %81 = arith.select %26, %79, %80 : vector<2x256xi1>, vector<2x256xf32>
    %c7 = arith.constant 7 : index
    %c0_30 = arith.constant 0 : index
    %c0_31 = arith.constant 0 : index
    %82 = vector.load %arg10[%c7, %c0_30, %c0_31] : memref<8x2x256xf32, #tpu.memory_space<vmem>>, vector<1x2x256xf32>
    %83 = vector.shape_cast %82 : vector<1x2x256xf32> to vector<2x256xf32>
    %84 = vector.shape_cast %81 : vector<2x256xf32> to vector<1x2x256xf32>
    tpu.vector_store %arg10[%c7, %c0_30, %c0_31], %84 {strides = array<i32>} : memref<8x2x256xf32, #tpu.memory_space<vmem>>, vector<1x2x256xf32>,
    %c0_32 = arith.constant 0 : index
    %c0_33 = arith.constant 0 : index
    %c0_34 = arith.constant 0 : index
    %85 = vector.load %arg5[%c0_32, %c0_33, %c0_34] : memref<2x64x256xbf16, #tpu.memory_space<vmem>>, vector<1x64x256xbf16>
    %86 = vector.shape_cast %85 : vector<1x64x256xbf16> to vector<64x256xbf16>
    %cst_35 = arith.constant 0.000000e+00 : f32
    %87 = vector.broadcast %cst_35 : f32 to vector<2x64xf32>
    %cst_36 = arith.constant 0.000000e+00 : f32
    %88 = vector.broadcast %cst_36 : f32 to vector<2x64xf32>
    %c0_i32_37 = arith.constant 0 : i32
    %89 = arith.index_cast %c0_i32_37 : i32 to index
    %c0_38 = arith.constant 0 : index
    %c0_39 = arith.constant 0 : index
    %90 = vector.load %arg10[%89, %c0_38, %c0_39] : memref<8x2x256xf32, #tpu.memory_space<vmem>>, vector<1x2x256xf32>
    %91 = vector.shape_cast %90 : vector<1x2x256xf32> to vector<2x256xf32>
    %92 = arith.truncf %87 : vector<2x64xf32> to vector<2x64xbf16>
    %cst_40 = arith.constant dense<0.000000e+00> : vector<2x256xf32>
    %93 = tpu.matmul %92, %86, %cst_40 {dimension_numbers = #tpu.dot_dimension_numbers<[1], [0], [0], [1], [0, 0, 1, 1], [], []>} : vector<2x64xbf16>, vector<64x256xbf16>, vector<2x256xf32> -> vector<2x256xf32>
    %94 = arith.addf %91, %93 : vector<2x256xf32>
    %95 = vector.extract_strided_slice %94 {offsets = [0, 0], sizes = [2, 128], strides = [1, 1]} : vector<2x256xf32> to vector<2x128xf32>
    %96 = arith.negf %95 : vector<2x128xf32>
    %97 = math.exp %96 : vector<2x128xf32>
    %cst_41 = arith.constant 1.000000e+00 : f32
    %98 = vector.broadcast %cst_41 : f32 to vector<2x128xf32>
    %99 = arith.addf %98, %97 : vector<2x128xf32>
    %100 = arith.divf %98, %99 : vector<2x128xf32>
    %101 = vector.extract_strided_slice %94 {offsets = [0, 128], sizes = [2, 64], strides = [1, 1]} : vector<2x256xf32> to vector<2x64xf32>
    %102 = math.tanh %101 : vector<2x64xf32>
    %103 = vector.extract_strided_slice %94 {offsets = [0, 192], sizes = [2, 64], strides = [1, 1]} : vector<2x256xf32> to vector<2x64xf32>
    %104 = arith.negf %103 : vector<2x64xf32>
    %105 = math.exp %104 : vector<2x64xf32>
    %cst_42 = arith.constant 1.000000e+00 : f32
    %106 = vector.broadcast %cst_42 : f32 to vector<2x64xf32>
    %107 = arith.addf %106, %105 : vector<2x64xf32>
    %108 = arith.divf %106, %107 : vector<2x64xf32>
    %109 = vector.extract_strided_slice %100 {offsets = [0, 64], sizes = [2, 64], strides = [1, 1]} : vector<2x128xf32> to vector<2x64xf32>
    %110 = arith.mulf %109, %88 : vector<2x64xf32>
    %111 = vector.extract_strided_slice %100 {offsets = [0, 0], sizes = [2, 64], strides = [1, 1]} : vector<2x128xf32> to vector<2x64xf32>
    %112 = arith.mulf %111, %102 : vector<2x64xf32>
    %113 = arith.addf %110, %112 : vector<2x64xf32>
    %114 = math.tanh %113 : vector<2x64xf32>
    %115 = arith.mulf %108, %114 : vector<2x64xf32>
    %116 = arith.index_cast %c0_i32_37 : i32 to index
    %c0_43 = arith.constant 0 : index
    %c0_44 = arith.constant 0 : index
    %117 = vector.load %arg11[%116, %c0_43, %c0_44] : memref<8x2x64xf32, #tpu.memory_space<vmem>>, vector<1x2x64xf32>
    %118 = vector.shape_cast %117 : vector<1x2x64xf32> to vector<2x64xf32>
    %119 = vector.shape_cast %115 : vector<2x64xf32> to vector<1x2x64xf32>
    tpu.vector_store %arg11[%116, %c0_43, %c0_44], %119 {strides = array<i32>} : memref<8x2x64xf32, #tpu.memory_space<vmem>>, vector<1x2x64xf32>,
    %c7_i32 = arith.constant 7 : i32
    %120 = arith.subi %c7_i32, %c0_i32_37 : i32
    %121 = arith.index_cast %120 : i32 to index
    %c0_45 = arith.constant 0 : index
    %c0_46 = arith.constant 0 : index
    %122 = vector.load %arg12[%121, %c0_45, %c0_46] : memref<8x2x64xf32, #tpu.memory_space<vmem>>, vector<1x2x64xf32>
    %123 = vector.shape_cast %122 : vector<1x2x64xf32> to vector<2x64xf32>
    %124 = vector.shape_cast %115 : vector<2x64xf32> to vector<1x2x64xf32>
    tpu.vector_store %arg12[%121, %c0_45, %c0_46], %124 {strides = array<i32>} : memref<8x2x64xf32, #tpu.memory_space<vmem>>, vector<1x2x64xf32>,
    %c1_i32_47 = arith.constant 1 : i32
    %125 = arith.index_cast %c1_i32_47 : i32 to index
    %c0_48 = arith.constant 0 : index
    %c0_49 = arith.constant 0 : index
    %126 = vector.load %arg10[%125, %c0_48, %c0_49] : memref<8x2x256xf32, #tpu.memory_space<vmem>>, vector<1x2x256xf32>
    %127 = vector.shape_cast %126 : vector<1x2x256xf32> to vector<2x256xf32>
    %128 = arith.truncf %115 : vector<2x64xf32> to vector<2x64xbf16>
    %cst_50 = arith.constant dense<0.000000e+00> : vector<2x256xf32>
    %129 = tpu.matmul %128, %86, %cst_50 {dimension_numbers = #tpu.dot_dimension_numbers<[1], [0], [0], [1], [0, 0, 1, 1], [], []>} : vector<2x64xbf16>, vector<64x256xbf16>, vector<2x256xf32> -> vector<2x256xf32>
    %130 = arith.addf %127, %129 : vector<2x256xf32>
    %131 = vector.extract_strided_slice %130 {offsets = [0, 0], sizes = [2, 128], strides = [1, 1]} : vector<2x256xf32> to vector<2x128xf32>
    %132 = arith.negf %131 : vector<2x128xf32>
    %133 = math.exp %132 : vector<2x128xf32>
    %cst_51 = arith.constant 1.000000e+00 : f32
    %134 = vector.broadcast %cst_51 : f32 to vector<2x128xf32>
    %135 = arith.addf %134, %133 : vector<2x128xf32>
    %136 = arith.divf %134, %135 : vector<2x128xf32>
    %137 = vector.extract_strided_slice %130 {offsets = [0, 128], sizes = [2, 64], strides = [1, 1]} : vector<2x256xf32> to vector<2x64xf32>
    %138 = math.tanh %137 : vector<2x64xf32>
    %139 = vector.extract_strided_slice %130 {offsets = [0, 192], sizes = [2, 64], strides = [1, 1]} : vector<2x256xf32> to vector<2x64xf32>
    %140 = arith.negf %139 : vector<2x64xf32>
    %141 = math.exp %140 : vector<2x64xf32>
    %cst_52 = arith.constant 1.000000e+00 : f32
    %142 = vector.broadcast %cst_52 : f32 to vector<2x64xf32>
    %143 = arith.addf %142, %141 : vector<2x64xf32>
    %144 = arith.divf %142, %143 : vector<2x64xf32>
    %145 = vector.extract_strided_slice %136 {offsets = [0, 64], sizes = [2, 64], strides = [1, 1]} : vector<2x128xf32> to vector<2x64xf32>
    %146 = arith.mulf %145, %113 : vector<2x64xf32>
    %147 = vector.extract_strided_slice %136 {offsets = [0, 0], sizes = [2, 64], strides = [1, 1]} : vector<2x128xf32> to vector<2x64xf32>
    %148 = arith.mulf %147, %138 : vector<2x64xf32>
    %149 = arith.addf %146, %148 : vector<2x64xf32>
    %150 = math.tanh %149 : vector<2x64xf32>
    %151 = arith.mulf %144, %150 : vector<2x64xf32>
    %152 = arith.index_cast %c1_i32_47 : i32 to index
    %c0_53 = arith.constant 0 : index
    %c0_54 = arith.constant 0 : index
    %153 = vector.load %arg11[%152, %c0_53, %c0_54] : memref<8x2x64xf32, #tpu.memory_space<vmem>>, vector<1x2x64xf32>
    %154 = vector.shape_cast %153 : vector<1x2x64xf32> to vector<2x64xf32>
    %155 = vector.shape_cast %151 : vector<2x64xf32> to vector<1x2x64xf32>
    tpu.vector_store %arg11[%152, %c0_53, %c0_54], %155 {strides = array<i32>} : memref<8x2x64xf32, #tpu.memory_space<vmem>>, vector<1x2x64xf32>,
    %c7_i32_55 = arith.constant 7 : i32
    %156 = arith.subi %c7_i32_55, %c1_i32_47 : i32
    %157 = arith.index_cast %156 : i32 to index
    %c0_56 = arith.constant 0 : index
    %c0_57 = arith.constant 0 : index
    %158 = vector.load %arg12[%157, %c0_56, %c0_57] : memref<8x2x64xf32, #tpu.memory_space<vmem>>, vector<1x2x64xf32>
    %159 = vector.shape_cast %158 : vector<1x2x64xf32> to vector<2x64xf32>
    %160 = vector.shape_cast %151 : vector<2x64xf32> to vector<1x2x64xf32>
    tpu.vector_store %arg12[%157, %c0_56, %c0_57], %160 {strides = array<i32>} : memref<8x2x64xf32, #tpu.memory_space<vmem>>, vector<1x2x64xf32>,
    %c2_i32 = arith.constant 2 : i32
    %161 = arith.index_cast %c2_i32 : i32 to index
    %c0_58 = arith.constant 0 : index
    %c0_59 = arith.constant 0 : index
    %162 = vector.load %arg10[%161, %c0_58, %c0_59] : memref<8x2x256xf32, #tpu.memory_space<vmem>>, vector<1x2x256xf32>
    %163 = vector.shape_cast %162 : vector<1x2x256xf32> to vector<2x256xf32>
    %164 = arith.truncf %151 : vector<2x64xf32> to vector<2x64xbf16>
    %cst_60 = arith.constant dense<0.000000e+00> : vector<2x256xf32>
    %165 = tpu.matmul %164, %86, %cst_60 {dimension_numbers = #tpu.dot_dimension_numbers<[1], [0], [0], [1], [0, 0, 1, 1], [], []>} : vector<2x64xbf16>, vector<64x256xbf16>, vector<2x256xf32> -> vector<2x256xf32>
    %166 = arith.addf %163, %165 : vector<2x256xf32>
    %167 = vector.extract_strided_slice %166 {offsets = [0, 0], sizes = [2, 128], strides = [1, 1]} : vector<2x256xf32> to vector<2x128xf32>
    %168 = arith.negf %167 : vector<2x128xf32>
    %169 = math.exp %168 : vector<2x128xf32>
    %cst_61 = arith.constant 1.000000e+00 : f32
    %170 = vector.broadcast %cst_61 : f32 to vector<2x128xf32>
    %171 = arith.addf %170, %169 : vector<2x128xf32>
    %172 = arith.divf %170, %171 : vector<2x128xf32>
    %173 = vector.extract_strided_slice %166 {offsets = [0, 128], sizes = [2, 64], strides = [1, 1]} : vector<2x256xf32> to vector<2x64xf32>
    %174 = math.tanh %173 : vector<2x64xf32>
    %175 = vector.extract_strided_slice %166 {offsets = [0, 192], sizes = [2, 64], strides = [1, 1]} : vector<2x256xf32> to vector<2x64xf32>
    %176 = arith.negf %175 : vector<2x64xf32>
    %177 = math.exp %176 : vector<2x64xf32>
    %cst_62 = arith.constant 1.000000e+00 : f32
    %178 = vector.broadcast %cst_62 : f32 to vector<2x64xf32>
    %179 = arith.addf %178, %177 : vector<2x64xf32>
    %180 = arith.divf %178, %179 : vector<2x64xf32>
    %181 = vector.extract_strided_slice %172 {offsets = [0, 64], sizes = [2, 64], strides = [1, 1]} : vector<2x128xf32> to vector<2x64xf32>
    %182 = arith.mulf %181, %149 : vector<2x64xf32>
    %183 = vector.extract_strided_slice %172 {offsets = [0, 0], sizes = [2, 64], strides = [1, 1]} : vector<2x128xf32> to vector<2x64xf32>
    %184 = arith.mulf %183, %174 : vector<2x64xf32>
    %185 = arith.addf %182, %184 : vector<2x64xf32>
    %186 = math.tanh %185 : vector<2x64xf32>
    %187 = arith.mulf %180, %186 : vector<2x64xf32>
    %188 = arith.index_cast %c2_i32 : i32 to index
    %c0_63 = arith.constant 0 : index
    %c0_64 = arith.constant 0 : index
    %189 = vector.load %arg11[%188, %c0_63, %c0_64] : memref<8x2x64xf32, #tpu.memory_space<vmem>>, vector<1x2x64xf32>
    %190 = vector.shape_cast %189 : vector<1x2x64xf32> to vector<2x64xf32>
    %191 = vector.shape_cast %187 : vector<2x64xf32> to vector<1x2x64xf32>
    tpu.vector_store %arg11[%188, %c0_63, %c0_64], %191 {strides = array<i32>} : memref<8x2x64xf32, #tpu.memory_space<vmem>>, vector<1x2x64xf32>,
    %c7_i32_65 = arith.constant 7 : i32
    %192 = arith.subi %c7_i32_65, %c2_i32 : i32
    %193 = arith.index_cast %192 : i32 to index
    %c0_66 = arith.constant 0 : index
    %c0_67 = arith.constant 0 : index
    %194 = vector.load %arg12[%193, %c0_66, %c0_67] : memref<8x2x64xf32, #tpu.memory_space<vmem>>, vector<1x2x64xf32>
    %195 = vector.shape_cast %194 : vector<1x2x64xf32> to vector<2x64xf32>
    %196 = vector.shape_cast %187 : vector<2x64xf32> to vector<1x2x64xf32>
    tpu.vector_store %arg12[%193, %c0_66, %c0_67], %196 {strides = array<i32>} : memref<8x2x64xf32, #tpu.memory_space<vmem>>, vector<1x2x64xf32>,
    %c3_i32 = arith.constant 3 : i32
    %197 = arith.index_cast %c3_i32 : i32 to index
    %c0_68 = arith.constant 0 : index
    %c0_69 = arith.constant 0 : index
    %198 = vector.load %arg10[%197, %c0_68, %c0_69] : memref<8x2x256xf32, #tpu.memory_space<vmem>>, vector<1x2x256xf32>
    %199 = vector.shape_cast %198 : vector<1x2x256xf32> to vector<2x256xf32>
    %200 = arith.truncf %187 : vector<2x64xf32> to vector<2x64xbf16>
    %cst_70 = arith.constant dense<0.000000e+00> : vector<2x256xf32>
    %201 = tpu.matmul %200, %86, %cst_70 {dimension_numbers = #tpu.dot_dimension_numbers<[1], [0], [0], [1], [0, 0, 1, 1], [], []>} : vector<2x64xbf16>, vector<64x256xbf16>, vector<2x256xf32> -> vector<2x256xf32>
    %202 = arith.addf %199, %201 : vector<2x256xf32>
    %203 = vector.extract_strided_slice %202 {offsets = [0, 0], sizes = [2, 128], strides = [1, 1]} : vector<2x256xf32> to vector<2x128xf32>
    %204 = arith.negf %203 : vector<2x128xf32>
    %205 = math.exp %204 : vector<2x128xf32>
    %cst_71 = arith.constant 1.000000e+00 : f32
    %206 = vector.broadcast %cst_71 : f32 to vector<2x128xf32>
    %207 = arith.addf %206, %205 : vector<2x128xf32>
    %208 = arith.divf %206, %207 : vector<2x128xf32>
    %209 = vector.extract_strided_slice %202 {offsets = [0, 128], sizes = [2, 64], strides = [1, 1]} : vector<2x256xf32> to vector<2x64xf32>
    %210 = math.tanh %209 : vector<2x64xf32>
    %211 = vector.extract_strided_slice %202 {offsets = [0, 192], sizes = [2, 64], strides = [1, 1]} : vector<2x256xf32> to vector<2x64xf32>
    %212 = arith.negf %211 : vector<2x64xf32>
    %213 = math.exp %212 : vector<2x64xf32>
    %cst_72 = arith.constant 1.000000e+00 : f32
    %214 = vector.broadcast %cst_72 : f32 to vector<2x64xf32>
    %215 = arith.addf %214, %213 : vector<2x64xf32>
    %216 = arith.divf %214, %215 : vector<2x64xf32>
    %217 = vector.extract_strided_slice %208 {offsets = [0, 64], sizes = [2, 64], strides = [1, 1]} : vector<2x128xf32> to vector<2x64xf32>
    %218 = arith.mulf %217, %185 : vector<2x64xf32>
    %219 = vector.extract_strided_slice %208 {offsets = [0, 0], sizes = [2, 64], strides = [1, 1]} : vector<2x128xf32> to vector<2x64xf32>
    %220 = arith.mulf %219, %210 : vector<2x64xf32>
    %221 = arith.addf %218, %220 : vector<2x64xf32>
    %222 = math.tanh %221 : vector<2x64xf32>
    %223 = arith.mulf %216, %222 : vector<2x64xf32>
    %224 = arith.index_cast %c3_i32 : i32 to index
    %c0_73 = arith.constant 0 : index
    %c0_74 = arith.constant 0 : index
    %225 = vector.load %arg11[%224, %c0_73, %c0_74] : memref<8x2x64xf32, #tpu.memory_space<vmem>>, vector<1x2x64xf32>
    %226 = vector.shape_cast %225 : vector<1x2x64xf32> to vector<2x64xf32>
    %227 = vector.shape_cast %223 : vector<2x64xf32> to vector<1x2x64xf32>
    tpu.vector_store %arg11[%224, %c0_73, %c0_74], %227 {strides = array<i32>} : memref<8x2x64xf32, #tpu.memory_space<vmem>>, vector<1x2x64xf32>,
    %c7_i32_75 = arith.constant 7 : i32
    %228 = arith.subi %c7_i32_75, %c3_i32 : i32
    %229 = arith.index_cast %228 : i32 to index
    %c0_76 = arith.constant 0 : index
    %c0_77 = arith.constant 0 : index
    %230 = vector.load %arg12[%229, %c0_76, %c0_77] : memref<8x2x64xf32, #tpu.memory_space<vmem>>, vector<1x2x64xf32>
    %231 = vector.shape_cast %230 : vector<1x2x64xf32> to vector<2x64xf32>
    %232 = vector.shape_cast %223 : vector<2x64xf32> to vector<1x2x64xf32>
    tpu.vector_store %arg12[%229, %c0_76, %c0_77], %232 {strides = array<i32>} : memref<8x2x64xf32, #tpu.memory_space<vmem>>, vector<1x2x64xf32>,
    %c4_i32 = arith.constant 4 : i32
    %233 = arith.index_cast %c4_i32 : i32 to index
    %c0_78 = arith.constant 0 : index
    %c0_79 = arith.constant 0 : index
    %234 = vector.load %arg10[%233, %c0_78, %c0_79] : memref<8x2x256xf32, #tpu.memory_space<vmem>>, vector<1x2x256xf32>
    %235 = vector.shape_cast %234 : vector<1x2x256xf32> to vector<2x256xf32>
    %236 = arith.truncf %223 : vector<2x64xf32> to vector<2x64xbf16>
    %cst_80 = arith.constant dense<0.000000e+00> : vector<2x256xf32>
    %237 = tpu.matmul %236, %86, %cst_80 {dimension_numbers = #tpu.dot_dimension_numbers<[1], [0], [0], [1], [0, 0, 1, 1], [], []>} : vector<2x64xbf16>, vector<64x256xbf16>, vector<2x256xf32> -> vector<2x256xf32>
    %238 = arith.addf %235, %237 : vector<2x256xf32>
    %239 = vector.extract_strided_slice %238 {offsets = [0, 0], sizes = [2, 128], strides = [1, 1]} : vector<2x256xf32> to vector<2x128xf32>
    %240 = arith.negf %239 : vector<2x128xf32>
    %241 = math.exp %240 : vector<2x128xf32>
    %cst_81 = arith.constant 1.000000e+00 : f32
    %242 = vector.broadcast %cst_81 : f32 to vector<2x128xf32>
    %243 = arith.addf %242, %241 : vector<2x128xf32>
    %244 = arith.divf %242, %243 : vector<2x128xf32>
    %245 = vector.extract_strided_slice %238 {offsets = [0, 128], sizes = [2, 64], strides = [1, 1]} : vector<2x256xf32> to vector<2x64xf32>
    %246 = math.tanh %245 : vector<2x64xf32>
    %247 = vector.extract_strided_slice %238 {offsets = [0, 192], sizes = [2, 64], strides = [1, 1]} : vector<2x256xf32> to vector<2x64xf32>
    %248 = arith.negf %247 : vector<2x64xf32>
    %249 = math.exp %248 : vector<2x64xf32>
    %cst_82 = arith.constant 1.000000e+00 : f32
    %250 = vector.broadcast %cst_82 : f32 to vector<2x64xf32>
    %251 = arith.addf %250, %249 : vector<2x64xf32>
    %252 = arith.divf %250, %251 : vector<2x64xf32>
    %253 = vector.extract_strided_slice %244 {offsets = [0, 64], sizes = [2, 64], strides = [1, 1]} : vector<2x128xf32> to vector<2x64xf32>
    %254 = arith.mulf %253, %221 : vector<2x64xf32>
    %255 = vector.extract_strided_slice %244 {offsets = [0, 0], sizes = [2, 64], strides = [1, 1]} : vector<2x128xf32> to vector<2x64xf32>
    %256 = arith.mulf %255, %246 : vector<2x64xf32>
    %257 = arith.addf %254, %256 : vector<2x64xf32>
    %258 = math.tanh %257 : vector<2x64xf32>
    %259 = arith.mulf %252, %258 : vector<2x64xf32>
    %260 = arith.index_cast %c4_i32 : i32 to index
    %c0_83 = arith.constant 0 : index
    %c0_84 = arith.constant 0 : index
    %261 = vector.load %arg11[%260, %c0_83, %c0_84] : memref<8x2x64xf32, #tpu.memory_space<vmem>>, vector<1x2x64xf32>
    %262 = vector.shape_cast %261 : vector<1x2x64xf32> to vector<2x64xf32>
    %263 = vector.shape_cast %259 : vector<2x64xf32> to vector<1x2x64xf32>
    tpu.vector_store %arg11[%260, %c0_83, %c0_84], %263 {strides = array<i32>} : memref<8x2x64xf32, #tpu.memory_space<vmem>>, vector<1x2x64xf32>,
    %c7_i32_85 = arith.constant 7 : i32
    %264 = arith.subi %c7_i32_85, %c4_i32 : i32
    %265 = arith.index_cast %264 : i32 to index
    %c0_86 = arith.constant 0 : index
    %c0_87 = arith.constant 0 : index
    %266 = vector.load %arg12[%265, %c0_86, %c0_87] : memref<8x2x64xf32, #tpu.memory_space<vmem>>, vector<1x2x64xf32>
    %267 = vector.shape_cast %266 : vector<1x2x64xf32> to vector<2x64xf32>
    %268 = vector.shape_cast %259 : vector<2x64xf32> to vector<1x2x64xf32>
    tpu.vector_store %arg12[%265, %c0_86, %c0_87], %268 {strides = array<i32>} : memref<8x2x64xf32, #tpu.memory_space<vmem>>, vector<1x2x64xf32>,
    %c5_i32 = arith.constant 5 : i32
    %269 = arith.index_cast %c5_i32 : i32 to index
    %c0_88 = arith.constant 0 : index
    %c0_89 = arith.constant 0 : index
    %270 = vector.load %arg10[%269, %c0_88, %c0_89] : memref<8x2x256xf32, #tpu.memory_space<vmem>>, vector<1x2x256xf32>
    %271 = vector.shape_cast %270 : vector<1x2x256xf32> to vector<2x256xf32>
    %272 = arith.truncf %259 : vector<2x64xf32> to vector<2x64xbf16>
    %cst_90 = arith.constant dense<0.000000e+00> : vector<2x256xf32>
    %273 = tpu.matmul %272, %86, %cst_90 {dimension_numbers = #tpu.dot_dimension_numbers<[1], [0], [0], [1], [0, 0, 1, 1], [], []>} : vector<2x64xbf16>, vector<64x256xbf16>, vector<2x256xf32> -> vector<2x256xf32>
    %274 = arith.addf %271, %273 : vector<2x256xf32>
    %275 = vector.extract_strided_slice %274 {offsets = [0, 0], sizes = [2, 128], strides = [1, 1]} : vector<2x256xf32> to vector<2x128xf32>
    %276 = arith.negf %275 : vector<2x128xf32>
    %277 = math.exp %276 : vector<2x128xf32>
    %cst_91 = arith.constant 1.000000e+00 : f32
    %278 = vector.broadcast %cst_91 : f32 to vector<2x128xf32>
    %279 = arith.addf %278, %277 : vector<2x128xf32>
    %280 = arith.divf %278, %279 : vector<2x128xf32>
    %281 = vector.extract_strided_slice %274 {offsets = [0, 128], sizes = [2, 64], strides = [1, 1]} : vector<2x256xf32> to vector<2x64xf32>
    %282 = math.tanh %281 : vector<2x64xf32>
    %283 = vector.extract_strided_slice %274 {offsets = [0, 192], sizes = [2, 64], strides = [1, 1]} : vector<2x256xf32> to vector<2x64xf32>
    %284 = arith.negf %283 : vector<2x64xf32>
    %285 = math.exp %284 : vector<2x64xf32>
    %cst_92 = arith.constant 1.000000e+00 : f32
    %286 = vector.broadcast %cst_92 : f32 to vector<2x64xf32>
    %287 = arith.addf %286, %285 : vector<2x64xf32>
    %288 = arith.divf %286, %287 : vector<2x64xf32>
    %289 = vector.extract_strided_slice %280 {offsets = [0, 64], sizes = [2, 64], strides = [1, 1]} : vector<2x128xf32> to vector<2x64xf32>
    %290 = arith.mulf %289, %257 : vector<2x64xf32>
    %291 = vector.extract_strided_slice %280 {offsets = [0, 0], sizes = [2, 64], strides = [1, 1]} : vector<2x128xf32> to vector<2x64xf32>
    %292 = arith.mulf %291, %282 : vector<2x64xf32>
    %293 = arith.addf %290, %292 : vector<2x64xf32>
    %294 = math.tanh %293 : vector<2x64xf32>
    %295 = arith.mulf %288, %294 : vector<2x64xf32>
    %296 = arith.index_cast %c5_i32 : i32 to index
    %c0_93 = arith.constant 0 : index
    %c0_94 = arith.constant 0 : index
    %297 = vector.load %arg11[%296, %c0_93, %c0_94] : memref<8x2x64xf32, #tpu.memory_space<vmem>>, vector<1x2x64xf32>
    %298 = vector.shape_cast %297 : vector<1x2x64xf32> to vector<2x64xf32>
    %299 = vector.shape_cast %295 : vector<2x64xf32> to vector<1x2x64xf32>
    tpu.vector_store %arg11[%296, %c0_93, %c0_94], %299 {strides = array<i32>} : memref<8x2x64xf32, #tpu.memory_space<vmem>>, vector<1x2x64xf32>,
    %c7_i32_95 = arith.constant 7 : i32
    %300 = arith.subi %c7_i32_95, %c5_i32 : i32
    %301 = arith.index_cast %300 : i32 to index
    %c0_96 = arith.constant 0 : index
    %c0_97 = arith.constant 0 : index
    %302 = vector.load %arg12[%301, %c0_96, %c0_97] : memref<8x2x64xf32, #tpu.memory_space<vmem>>, vector<1x2x64xf32>
    %303 = vector.shape_cast %302 : vector<1x2x64xf32> to vector<2x64xf32>
    %304 = vector.shape_cast %295 : vector<2x64xf32> to vector<1x2x64xf32>
    tpu.vector_store %arg12[%301, %c0_96, %c0_97], %304 {strides = array<i32>} : memref<8x2x64xf32, #tpu.memory_space<vmem>>, vector<1x2x64xf32>,
    %c6_i32 = arith.constant 6 : i32
    %305 = arith.index_cast %c6_i32 : i32 to index
    %c0_98 = arith.constant 0 : index
    %c0_99 = arith.constant 0 : index
    %306 = vector.load %arg10[%305, %c0_98, %c0_99] : memref<8x2x256xf32, #tpu.memory_space<vmem>>, vector<1x2x256xf32>
    %307 = vector.shape_cast %306 : vector<1x2x256xf32> to vector<2x256xf32>
    %308 = arith.truncf %295 : vector<2x64xf32> to vector<2x64xbf16>
    %cst_100 = arith.constant dense<0.000000e+00> : vector<2x256xf32>
    %309 = tpu.matmul %308, %86, %cst_100 {dimension_numbers = #tpu.dot_dimension_numbers<[1], [0], [0], [1], [0, 0, 1, 1], [], []>} : vector<2x64xbf16>, vector<64x256xbf16>, vector<2x256xf32> -> vector<2x256xf32>
    %310 = arith.addf %307, %309 : vector<2x256xf32>
    %311 = vector.extract_strided_slice %310 {offsets = [0, 0], sizes = [2, 128], strides = [1, 1]} : vector<2x256xf32> to vector<2x128xf32>
    %312 = arith.negf %311 : vector<2x128xf32>
    %313 = math.exp %312 : vector<2x128xf32>
    %cst_101 = arith.constant 1.000000e+00 : f32
    %314 = vector.broadcast %cst_101 : f32 to vector<2x128xf32>
    %315 = arith.addf %314, %313 : vector<2x128xf32>
    %316 = arith.divf %314, %315 : vector<2x128xf32>
    %317 = vector.extract_strided_slice %310 {offsets = [0, 128], sizes = [2, 64], strides = [1, 1]} : vector<2x256xf32> to vector<2x64xf32>
    %318 = math.tanh %317 : vector<2x64xf32>
    %319 = vector.extract_strided_slice %310 {offsets = [0, 192], sizes = [2, 64], strides = [1, 1]} : vector<2x256xf32> to vector<2x64xf32>
    %320 = arith.negf %319 : vector<2x64xf32>
    %321 = math.exp %320 : vector<2x64xf32>
    %cst_102 = arith.constant 1.000000e+00 : f32
    %322 = vector.broadcast %cst_102 : f32 to vector<2x64xf32>
    %323 = arith.addf %322, %321 : vector<2x64xf32>
    %324 = arith.divf %322, %323 : vector<2x64xf32>
    %325 = vector.extract_strided_slice %316 {offsets = [0, 64], sizes = [2, 64], strides = [1, 1]} : vector<2x128xf32> to vector<2x64xf32>
    %326 = arith.mulf %325, %293 : vector<2x64xf32>
    %327 = vector.extract_strided_slice %316 {offsets = [0, 0], sizes = [2, 64], strides = [1, 1]} : vector<2x128xf32> to vector<2x64xf32>
    %328 = arith.mulf %327, %318 : vector<2x64xf32>
    %329 = arith.addf %326, %328 : vector<2x64xf32>
    %330 = math.tanh %329 : vector<2x64xf32>
    %331 = arith.mulf %324, %330 : vector<2x64xf32>
    %332 = arith.index_cast %c6_i32 : i32 to index
    %c0_103 = arith.constant 0 : index
    %c0_104 = arith.constant 0 : index
    %333 = vector.load %arg11[%332, %c0_103, %c0_104] : memref<8x2x64xf32, #tpu.memory_space<vmem>>, vector<1x2x64xf32>
    %334 = vector.shape_cast %333 : vector<1x2x64xf32> to vector<2x64xf32>
    %335 = vector.shape_cast %331 : vector<2x64xf32> to vector<1x2x64xf32>
    tpu.vector_store %arg11[%332, %c0_103, %c0_104], %335 {strides = array<i32>} : memref<8x2x64xf32, #tpu.memory_space<vmem>>, vector<1x2x64xf32>,
    %c7_i32_105 = arith.constant 7 : i32
    %336 = arith.subi %c7_i32_105, %c6_i32 : i32
    %337 = arith.index_cast %336 : i32 to index
    %c0_106 = arith.constant 0 : index
    %c0_107 = arith.constant 0 : index
    %338 = vector.load %arg12[%337, %c0_106, %c0_107] : memref<8x2x64xf32, #tpu.memory_space<vmem>>, vector<1x2x64xf32>
    %339 = vector.shape_cast %338 : vector<1x2x64xf32> to vector<2x64xf32>
    %340 = vector.shape_cast %331 : vector<2x64xf32> to vector<1x2x64xf32>
    tpu.vector_store %arg12[%337, %c0_106, %c0_107], %340 {strides = array<i32>} : memref<8x2x64xf32, #tpu.memory_space<vmem>>, vector<1x2x64xf32>,
    %c7_i32_108 = arith.constant 7 : i32
    %341 = arith.index_cast %c7_i32_108 : i32 to index
    %c0_109 = arith.constant 0 : index
    %c0_110 = arith.constant 0 : index
    %342 = vector.load %arg10[%341, %c0_109, %c0_110] : memref<8x2x256xf32, #tpu.memory_space<vmem>>, vector<1x2x256xf32>
    %343 = vector.shape_cast %342 : vector<1x2x256xf32> to vector<2x256xf32>
    %344 = arith.truncf %331 : vector<2x64xf32> to vector<2x64xbf16>
    %cst_111 = arith.constant dense<0.000000e+00> : vector<2x256xf32>
    %345 = tpu.matmul %344, %86, %cst_111 {dimension_numbers = #tpu.dot_dimension_numbers<[1], [0], [0], [1], [0, 0, 1, 1], [], []>} : vector<2x64xbf16>, vector<64x256xbf16>, vector<2x256xf32> -> vector<2x256xf32>
    %346 = arith.addf %343, %345 : vector<2x256xf32>
    %347 = vector.extract_strided_slice %346 {offsets = [0, 0], sizes = [2, 128], strides = [1, 1]} : vector<2x256xf32> to vector<2x128xf32>
    %348 = arith.negf %347 : vector<2x128xf32>
    %349 = math.exp %348 : vector<2x128xf32>
    %cst_112 = arith.constant 1.000000e+00 : f32
    %350 = vector.broadcast %cst_112 : f32 to vector<2x128xf32>
    %351 = arith.addf %350, %349 : vector<2x128xf32>
    %352 = arith.divf %350, %351 : vector<2x128xf32>
    %353 = vector.extract_strided_slice %346 {offsets = [0, 128], sizes = [2, 64], strides = [1, 1]} : vector<2x256xf32> to vector<2x64xf32>
    %354 = math.tanh %353 : vector<2x64xf32>
    %355 = vector.extract_strided_slice %346 {offsets = [0, 192], sizes = [2, 64], strides = [1, 1]} : vector<2x256xf32> to vector<2x64xf32>
    %356 = arith.negf %355 : vector<2x64xf32>
    %357 = math.exp %356 : vector<2x64xf32>
    %cst_113 = arith.constant 1.000000e+00 : f32
    %358 = vector.broadcast %cst_113 : f32 to vector<2x64xf32>
    %359 = arith.addf %358, %357 : vector<2x64xf32>
    %360 = arith.divf %358, %359 : vector<2x64xf32>
    %361 = vector.extract_strided_slice %352 {offsets = [0, 64], sizes = [2, 64], strides = [1, 1]} : vector<2x128xf32> to vector<2x64xf32>
    %362 = arith.mulf %361, %329 : vector<2x64xf32>
    %363 = vector.extract_strided_slice %352 {offsets = [0, 0], sizes = [2, 64], strides = [1, 1]} : vector<2x128xf32> to vector<2x64xf32>
    %364 = arith.mulf %363, %354 : vector<2x64xf32>
    %365 = arith.addf %362, %364 : vector<2x64xf32>
    %366 = math.tanh %365 : vector<2x64xf32>
    %367 = arith.mulf %360, %366 : vector<2x64xf32>
    %368 = arith.index_cast %c7_i32_108 : i32 to index
    %c0_114 = arith.constant 0 : index
    %c0_115 = arith.constant 0 : index
    %369 = vector.load %arg11[%368, %c0_114, %c0_115] : memref<8x2x64xf32, #tpu.memory_space<vmem>>, vector<1x2x64xf32>
    %370 = vector.shape_cast %369 : vector<1x2x64xf32> to vector<2x64xf32>
    %371 = vector.shape_cast %367 : vector<2x64xf32> to vector<1x2x64xf32>
    tpu.vector_store %arg11[%368, %c0_114, %c0_115], %371 {strides = array<i32>} : memref<8x2x64xf32, #tpu.memory_space<vmem>>, vector<1x2x64xf32>,
    %c7_i32_116 = arith.constant 7 : i32
    %372 = arith.subi %c7_i32_116, %c7_i32_108 : i32
    %373 = arith.index_cast %372 : i32 to index
    %c0_117 = arith.constant 0 : index
    %c0_118 = arith.constant 0 : index
    %374 = vector.load %arg12[%373, %c0_117, %c0_118] : memref<8x2x64xf32, #tpu.memory_space<vmem>>, vector<1x2x64xf32>
    %375 = vector.shape_cast %374 : vector<1x2x64xf32> to vector<2x64xf32>
    %376 = vector.shape_cast %367 : vector<2x64xf32> to vector<1x2x64xf32>
    tpu.vector_store %arg12[%373, %c0_117, %c0_118], %376 {strides = array<i32>} : memref<8x2x64xf32, #tpu.memory_space<vmem>>, vector<1x2x64xf32>,
    %c8_i32 = arith.constant 8 : i32
    %c0_119 = arith.constant 0 : index
    %c0_120 = arith.constant 0 : index
    %c0_121 = arith.constant 0 : index
    %377 = vector.load %arg11[%c0_119, %c0_120, %c0_121] : memref<8x2x64xf32, #tpu.memory_space<vmem>>, vector<1x2x64xf32>
    %378 = vector.shape_cast %377 : vector<1x2x64xf32> to vector<2x64xf32>
    %c0_122 = arith.constant 0 : index
    %c0_123 = arith.constant 0 : index
    %c0_124 = arith.constant 0 : index
    %379 = vector.load %arg12[%c0_122, %c0_123, %c0_124] : memref<8x2x64xf32, #tpu.memory_space<vmem>>, vector<1x2x64xf32>
    %380 = vector.shape_cast %379 : vector<1x2x64xf32> to vector<2x64xf32>
    %381 = arith.select %29, %378, %380 : vector<2x64xi1>, vector<2x64xf32>
    %c0_125 = arith.constant 0 : index
    %c0_126 = arith.constant 0 : index
    %382 = vector.load %arg13[%c0_125, %c0_126] : memref<16x64xf32, #tpu.memory_space<vmem>>, vector<2x64xf32>
    tpu.vector_store %arg13[%c0_125, %c0_126], %381 {strides = array<i32>} : memref<16x64xf32, #tpu.memory_space<vmem>>, vector<2x64xf32>,
    %c1_127 = arith.constant 1 : index
    %c0_128 = arith.constant 0 : index
    %c0_129 = arith.constant 0 : index
    %383 = vector.load %arg11[%c1_127, %c0_128, %c0_129] : memref<8x2x64xf32, #tpu.memory_space<vmem>>, vector<1x2x64xf32>
    %384 = vector.shape_cast %383 : vector<1x2x64xf32> to vector<2x64xf32>
    %c1_130 = arith.constant 1 : index
    %c0_131 = arith.constant 0 : index
    %c0_132 = arith.constant 0 : index
    %385 = vector.load %arg12[%c1_130, %c0_131, %c0_132] : memref<8x2x64xf32, #tpu.memory_space<vmem>>, vector<1x2x64xf32>
    %386 = vector.shape_cast %385 : vector<1x2x64xf32> to vector<2x64xf32>
    %387 = arith.select %29, %384, %386 : vector<2x64xi1>, vector<2x64xf32>
    %c2_133 = arith.constant 2 : index
    %c0_134 = arith.constant 0 : index
    %388 = vector.load %arg13[%c2_133, %c0_134] : memref<16x64xf32, #tpu.memory_space<vmem>>, vector<2x64xf32>
    tpu.vector_store %arg13[%c2_133, %c0_134], %387 {strides = array<i32>} : memref<16x64xf32, #tpu.memory_space<vmem>>, vector<2x64xf32>,
    %c2_135 = arith.constant 2 : index
    %c0_136 = arith.constant 0 : index
    %c0_137 = arith.constant 0 : index
    %389 = vector.load %arg11[%c2_135, %c0_136, %c0_137] : memref<8x2x64xf32, #tpu.memory_space<vmem>>, vector<1x2x64xf32>
    %390 = vector.shape_cast %389 : vector<1x2x64xf32> to vector<2x64xf32>
    %c2_138 = arith.constant 2 : index
    %c0_139 = arith.constant 0 : index
    %c0_140 = arith.constant 0 : index
    %391 = vector.load %arg12[%c2_138, %c0_139, %c0_140] : memref<8x2x64xf32, #tpu.memory_space<vmem>>, vector<1x2x64xf32>
    %392 = vector.shape_cast %391 : vector<1x2x64xf32> to vector<2x64xf32>
    %393 = arith.select %29, %390, %392 : vector<2x64xi1>, vector<2x64xf32>
    %c4_141 = arith.constant 4 : index
    %c0_142 = arith.constant 0 : index
    %394 = vector.load %arg13[%c4_141, %c0_142] : memref<16x64xf32, #tpu.memory_space<vmem>>, vector<2x64xf32>
    tpu.vector_store %arg13[%c4_141, %c0_142], %393 {strides = array<i32>} : memref<16x64xf32, #tpu.memory_space<vmem>>, vector<2x64xf32>,
    %c3_143 = arith.constant 3 : index
    %c0_144 = arith.constant 0 : index
    %c0_145 = arith.constant 0 : index
    %395 = vector.load %arg11[%c3_143, %c0_144, %c0_145] : memref<8x2x64xf32, #tpu.memory_space<vmem>>, vector<1x2x64xf32>
    %396 = vector.shape_cast %395 : vector<1x2x64xf32> to vector<2x64xf32>
    %c3_146 = arith.constant 3 : index
    %c0_147 = arith.constant 0 : index
    %c0_148 = arith.constant 0 : index
    %397 = vector.load %arg12[%c3_146, %c0_147, %c0_148] : memref<8x2x64xf32, #tpu.memory_space<vmem>>, vector<1x2x64xf32>
    %398 = vector.shape_cast %397 : vector<1x2x64xf32> to vector<2x64xf32>
    %399 = arith.select %29, %396, %398 : vector<2x64xi1>, vector<2x64xf32>
    %c6_149 = arith.constant 6 : index
    %c0_150 = arith.constant 0 : index
    %400 = vector.load %arg13[%c6_149, %c0_150] : memref<16x64xf32, #tpu.memory_space<vmem>>, vector<2x64xf32>
    tpu.vector_store %arg13[%c6_149, %c0_150], %399 {strides = array<i32>} : memref<16x64xf32, #tpu.memory_space<vmem>>, vector<2x64xf32>,
    %c4_151 = arith.constant 4 : index
    %c0_152 = arith.constant 0 : index
    %c0_153 = arith.constant 0 : index
    %401 = vector.load %arg11[%c4_151, %c0_152, %c0_153] : memref<8x2x64xf32, #tpu.memory_space<vmem>>, vector<1x2x64xf32>
    %402 = vector.shape_cast %401 : vector<1x2x64xf32> to vector<2x64xf32>
    %c4_154 = arith.constant 4 : index
    %c0_155 = arith.constant 0 : index
    %c0_156 = arith.constant 0 : index
    %403 = vector.load %arg12[%c4_154, %c0_155, %c0_156] : memref<8x2x64xf32, #tpu.memory_space<vmem>>, vector<1x2x64xf32>
    %404 = vector.shape_cast %403 : vector<1x2x64xf32> to vector<2x64xf32>
    %405 = arith.select %29, %402, %404 : vector<2x64xi1>, vector<2x64xf32>
    %c8 = arith.constant 8 : index
    %c0_157 = arith.constant 0 : index
    %406 = vector.load %arg13[%c8, %c0_157] : memref<16x64xf32, #tpu.memory_space<vmem>>, vector<2x64xf32>
    tpu.vector_store %arg13[%c8, %c0_157], %405 {strides = array<i32>} : memref<16x64xf32, #tpu.memory_space<vmem>>, vector<2x64xf32>,
    %c5_158 = arith.constant 5 : index
    %c0_159 = arith.constant 0 : index
    %c0_160 = arith.constant 0 : index
    %407 = vector.load %arg11[%c5_158, %c0_159, %c0_160] : memref<8x2x64xf32, #tpu.memory_space<vmem>>, vector<1x2x64xf32>
    %408 = vector.shape_cast %407 : vector<1x2x64xf32> to vector<2x64xf32>
    %c5_161 = arith.constant 5 : index
    %c0_162 = arith.constant 0 : index
    %c0_163 = arith.constant 0 : index
    %409 = vector.load %arg12[%c5_161, %c0_162, %c0_163] : memref<8x2x64xf32, #tpu.memory_space<vmem>>, vector<1x2x64xf32>
    %410 = vector.shape_cast %409 : vector<1x2x64xf32> to vector<2x64xf32>
    %411 = arith.select %29, %408, %410 : vector<2x64xi1>, vector<2x64xf32>
    %c10 = arith.constant 10 : index
    %c0_164 = arith.constant 0 : index
    %412 = vector.load %arg13[%c10, %c0_164] : memref<16x64xf32, #tpu.memory_space<vmem>>, vector<2x64xf32>
    tpu.vector_store %arg13[%c10, %c0_164], %411 {strides = array<i32>} : memref<16x64xf32, #tpu.memory_space<vmem>>, vector<2x64xf32>,
    %c6_165 = arith.constant 6 : index
    %c0_166 = arith.constant 0 : index
    %c0_167 = arith.constant 0 : index
    %413 = vector.load %arg11[%c6_165, %c0_166, %c0_167] : memref<8x2x64xf32, #tpu.memory_space<vmem>>, vector<1x2x64xf32>
    %414 = vector.shape_cast %413 : vector<1x2x64xf32> to vector<2x64xf32>
    %c6_168 = arith.constant 6 : index
    %c0_169 = arith.constant 0 : index
    %c0_170 = arith.constant 0 : index
    %415 = vector.load %arg12[%c6_168, %c0_169, %c0_170] : memref<8x2x64xf32, #tpu.memory_space<vmem>>, vector<1x2x64xf32>
    %416 = vector.shape_cast %415 : vector<1x2x64xf32> to vector<2x64xf32>
    %417 = arith.select %29, %414, %416 : vector<2x64xi1>, vector<2x64xf32>
    %c12 = arith.constant 12 : index
    %c0_171 = arith.constant 0 : index
    %418 = vector.load %arg13[%c12, %c0_171] : memref<16x64xf32, #tpu.memory_space<vmem>>, vector<2x64xf32>
    tpu.vector_store %arg13[%c12, %c0_171], %417 {strides = array<i32>} : memref<16x64xf32, #tpu.memory_space<vmem>>, vector<2x64xf32>,
    %c7_172 = arith.constant 7 : index
    %c0_173 = arith.constant 0 : index
    %c0_174 = arith.constant 0 : index
    %419 = vector.load %arg11[%c7_172, %c0_173, %c0_174] : memref<8x2x64xf32, #tpu.memory_space<vmem>>, vector<1x2x64xf32>
    %420 = vector.shape_cast %419 : vector<1x2x64xf32> to vector<2x64xf32>
    %c7_175 = arith.constant 7 : index
    %c0_176 = arith.constant 0 : index
    %c0_177 = arith.constant 0 : index
    %421 = vector.load %arg12[%c7_175, %c0_176, %c0_177] : memref<8x2x64xf32, #tpu.memory_space<vmem>>, vector<1x2x64xf32>
    %422 = vector.shape_cast %421 : vector<1x2x64xf32> to vector<2x64xf32>
    %423 = arith.select %29, %420, %422 : vector<2x64xi1>, vector<2x64xf32>
    %c14 = arith.constant 14 : index
    %c0_178 = arith.constant 0 : index
    %424 = vector.load %arg13[%c14, %c0_178] : memref<16x64xf32, #tpu.memory_space<vmem>>, vector<2x64xf32>
    tpu.vector_store %arg13[%c14, %c0_178], %423 {strides = array<i32>} : memref<16x64xf32, #tpu.memory_space<vmem>>, vector<2x64xf32>,
    %c0_179 = arith.constant 0 : index
    %c0_180 = arith.constant 0 : index
    %425 = vector.load %arg13[%c0_179, %c0_180] : memref<16x64xf32, #tpu.memory_space<vmem>>, vector<16x64xf32>
    %426 = arith.truncf %425 : vector<16x64xf32> to vector<16x64xbf16>
    %c0_181 = arith.constant 0 : index
    %c0_182 = arith.constant 0 : index
    %c0_183 = arith.constant 0 : index
    %427 = vector.load %arg4[%c0_181, %c0_182, %c0_183] : memref<1x64x256xbf16, #tpu.memory_space<vmem>>, vector<1x64x256xbf16>
    %428 = vector.shape_cast %427 : vector<1x64x256xbf16> to vector<64x256xbf16>
    %cst_184 = arith.constant dense<0.000000e+00> : vector<16x256xf32>
    %429 = tpu.matmul %426, %428, %cst_184 {dimension_numbers = #tpu.dot_dimension_numbers<[1], [0], [0], [1], [0, 0, 1, 1], [], []>} : vector<16x64xbf16>, vector<64x256xbf16>, vector<16x256xf32> -> vector<16x256xf32>
    %c1_185 = arith.constant 1 : index
    %c0_186 = arith.constant 0 : index
    %c0_187 = arith.constant 0 : index
    %430 = vector.load %arg6[%c1_185, %c0_186, %c0_187] : memref<2x1x256xf32, #tpu.memory_space<vmem>>, vector<1x1x256xf32>
    %431 = vector.shape_cast %430 : vector<1x1x256xf32> to vector<1x256xf32>
    %432 = vector.broadcast %431 : vector<1x256xf32> to vector<16x256xf32>
    %433 = arith.addf %429, %432 : vector<16x256xf32>
    %434 = vector.extract_strided_slice %433 {offsets = [0, 0], sizes = [2, 256], strides = [1, 1]} : vector<16x256xf32> to vector<2x256xf32>
    %435 = vector.extract_strided_slice %433 {offsets = [14, 0], sizes = [2, 256], strides = [1, 1]} : vector<16x256xf32> to vector<2x256xf32>
    %436 = arith.select %26, %434, %435 : vector<2x256xi1>, vector<2x256xf32>
    %c0_188 = arith.constant 0 : index
    %c0_189 = arith.constant 0 : index
    %c0_190 = arith.constant 0 : index
    %437 = vector.load %arg10[%c0_188, %c0_189, %c0_190] : memref<8x2x256xf32, #tpu.memory_space<vmem>>, vector<1x2x256xf32>
    %438 = vector.shape_cast %437 : vector<1x2x256xf32> to vector<2x256xf32>
    %439 = vector.shape_cast %436 : vector<2x256xf32> to vector<1x2x256xf32>
    tpu.vector_store %arg10[%c0_188, %c0_189, %c0_190], %439 {strides = array<i32>} : memref<8x2x256xf32, #tpu.memory_space<vmem>>, vector<1x2x256xf32>,
    %440 = vector.extract_strided_slice %433 {offsets = [2, 0], sizes = [2, 256], strides = [1, 1]} : vector<16x256xf32> to vector<2x256xf32>
    %441 = vector.extract_strided_slice %433 {offsets = [12, 0], sizes = [2, 256], strides = [1, 1]} : vector<16x256xf32> to vector<2x256xf32>
    %442 = arith.select %26, %440, %441 : vector<2x256xi1>, vector<2x256xf32>
    %c1_191 = arith.constant 1 : index
    %c0_192 = arith.constant 0 : index
    %c0_193 = arith.constant 0 : index
    %443 = vector.load %arg10[%c1_191, %c0_192, %c0_193] : memref<8x2x256xf32, #tpu.memory_space<vmem>>, vector<1x2x256xf32>
    %444 = vector.shape_cast %443 : vector<1x2x256xf32> to vector<2x256xf32>
    %445 = vector.shape_cast %442 : vector<2x256xf32> to vector<1x2x256xf32>
    tpu.vector_store %arg10[%c1_191, %c0_192, %c0_193], %445 {strides = array<i32>} : memref<8x2x256xf32, #tpu.memory_space<vmem>>, vector<1x2x256xf32>,
    %446 = vector.extract_strided_slice %433 {offsets = [4, 0], sizes = [2, 256], strides = [1, 1]} : vector<16x256xf32> to vector<2x256xf32>
    %447 = vector.extract_strided_slice %433 {offsets = [10, 0], sizes = [2, 256], strides = [1, 1]} : vector<16x256xf32> to vector<2x256xf32>
    %448 = arith.select %26, %446, %447 : vector<2x256xi1>, vector<2x256xf32>
    %c2_194 = arith.constant 2 : index
    %c0_195 = arith.constant 0 : index
    %c0_196 = arith.constant 0 : index
    %449 = vector.load %arg10[%c2_194, %c0_195, %c0_196] : memref<8x2x256xf32, #tpu.memory_space<vmem>>, vector<1x2x256xf32>
    %450 = vector.shape_cast %449 : vector<1x2x256xf32> to vector<2x256xf32>
    %451 = vector.shape_cast %448 : vector<2x256xf32> to vector<1x2x256xf32>
    tpu.vector_store %arg10[%c2_194, %c0_195, %c0_196], %451 {strides = array<i32>} : memref<8x2x256xf32, #tpu.memory_space<vmem>>, vector<1x2x256xf32>,
    %452 = vector.extract_strided_slice %433 {offsets = [6, 0], sizes = [2, 256], strides = [1, 1]} : vector<16x256xf32> to vector<2x256xf32>
    %453 = vector.extract_strided_slice %433 {offsets = [8, 0], sizes = [2, 256], strides = [1, 1]} : vector<16x256xf32> to vector<2x256xf32>
    %454 = arith.select %26, %452, %453 : vector<2x256xi1>, vector<2x256xf32>
    %c3_197 = arith.constant 3 : index
    %c0_198 = arith.constant 0 : index
    %c0_199 = arith.constant 0 : index
    %455 = vector.load %arg10[%c3_197, %c0_198, %c0_199] : memref<8x2x256xf32, #tpu.memory_space<vmem>>, vector<1x2x256xf32>
    %456 = vector.shape_cast %455 : vector<1x2x256xf32> to vector<2x256xf32>
    %457 = vector.shape_cast %454 : vector<2x256xf32> to vector<1x2x256xf32>
    tpu.vector_store %arg10[%c3_197, %c0_198, %c0_199], %457 {strides = array<i32>} : memref<8x2x256xf32, #tpu.memory_space<vmem>>, vector<1x2x256xf32>,
    %458 = vector.extract_strided_slice %433 {offsets = [8, 0], sizes = [2, 256], strides = [1, 1]} : vector<16x256xf32> to vector<2x256xf32>
    %459 = vector.extract_strided_slice %433 {offsets = [6, 0], sizes = [2, 256], strides = [1, 1]} : vector<16x256xf32> to vector<2x256xf32>
    %460 = arith.select %26, %458, %459 : vector<2x256xi1>, vector<2x256xf32>
    %c4_200 = arith.constant 4 : index
    %c0_201 = arith.constant 0 : index
    %c0_202 = arith.constant 0 : index
    %461 = vector.load %arg10[%c4_200, %c0_201, %c0_202] : memref<8x2x256xf32, #tpu.memory_space<vmem>>, vector<1x2x256xf32>
    %462 = vector.shape_cast %461 : vector<1x2x256xf32> to vector<2x256xf32>
    %463 = vector.shape_cast %460 : vector<2x256xf32> to vector<1x2x256xf32>
    tpu.vector_store %arg10[%c4_200, %c0_201, %c0_202], %463 {strides = array<i32>} : memref<8x2x256xf32, #tpu.memory_space<vmem>>, vector<1x2x256xf32>,
    %464 = vector.extract_strided_slice %433 {offsets = [10, 0], sizes = [2, 256], strides = [1, 1]} : vector<16x256xf32> to vector<2x256xf32>
    %465 = vector.extract_strided_slice %433 {offsets = [4, 0], sizes = [2, 256], strides = [1, 1]} : vector<16x256xf32> to vector<2x256xf32>
    %466 = arith.select %26, %464, %465 : vector<2x256xi1>, vector<2x256xf32>
    %c5_203 = arith.constant 5 : index
    %c0_204 = arith.constant 0 : index
    %c0_205 = arith.constant 0 : index
    %467 = vector.load %arg10[%c5_203, %c0_204, %c0_205] : memref<8x2x256xf32, #tpu.memory_space<vmem>>, vector<1x2x256xf32>
    %468 = vector.shape_cast %467 : vector<1x2x256xf32> to vector<2x256xf32>
    %469 = vector.shape_cast %466 : vector<2x256xf32> to vector<1x2x256xf32>
    tpu.vector_store %arg10[%c5_203, %c0_204, %c0_205], %469 {strides = array<i32>} : memref<8x2x256xf32, #tpu.memory_space<vmem>>, vector<1x2x256xf32>,
    %470 = vector.extract_strided_slice %433 {offsets = [12, 0], sizes = [2, 256], strides = [1, 1]} : vector<16x256xf32> to vector<2x256xf32>
    %471 = vector.extract_strided_slice %433 {offsets = [2, 0], sizes = [2, 256], strides = [1, 1]} : vector<16x256xf32> to vector<2x256xf32>
    %472 = arith.select %26, %470, %471 : vector<2x256xi1>, vector<2x256xf32>
    %c6_206 = arith.constant 6 : index
    %c0_207 = arith.constant 0 : index
    %c0_208 = arith.constant 0 : index
    %473 = vector.load %arg10[%c6_206, %c0_207, %c0_208] : memref<8x2x256xf32, #tpu.memory_space<vmem>>, vector<1x2x256xf32>
    %474 = vector.shape_cast %473 : vector<1x2x256xf32> to vector<2x256xf32>
    %475 = vector.shape_cast %472 : vector<2x256xf32> to vector<1x2x256xf32>
    tpu.vector_store %arg10[%c6_206, %c0_207, %c0_208], %475 {strides = array<i32>} : memref<8x2x256xf32, #tpu.memory_space<vmem>>, vector<1x2x256xf32>,
    %476 = vector.extract_strided_slice %433 {offsets = [14, 0], sizes = [2, 256], strides = [1, 1]} : vector<16x256xf32> to vector<2x256xf32>
    %477 = vector.extract_strided_slice %433 {offsets = [0, 0], sizes = [2, 256], strides = [1, 1]} : vector<16x256xf32> to vector<2x256xf32>
    %478 = arith.select %26, %476, %477 : vector<2x256xi1>, vector<2x256xf32>
    %c7_209 = arith.constant 7 : index
    %c0_210 = arith.constant 0 : index
    %c0_211 = arith.constant 0 : index
    %479 = vector.load %arg10[%c7_209, %c0_210, %c0_211] : memref<8x2x256xf32, #tpu.memory_space<vmem>>, vector<1x2x256xf32>
    %480 = vector.shape_cast %479 : vector<1x2x256xf32> to vector<2x256xf32>
    %481 = vector.shape_cast %478 : vector<2x256xf32> to vector<1x2x256xf32>
    tpu.vector_store %arg10[%c7_209, %c0_210, %c0_211], %481 {strides = array<i32>} : memref<8x2x256xf32, #tpu.memory_space<vmem>>, vector<1x2x256xf32>,
    %c1_212 = arith.constant 1 : index
    %c0_213 = arith.constant 0 : index
    %c0_214 = arith.constant 0 : index
    %482 = vector.load %arg5[%c1_212, %c0_213, %c0_214] : memref<2x64x256xbf16, #tpu.memory_space<vmem>>, vector<1x64x256xbf16>
    %483 = vector.shape_cast %482 : vector<1x64x256xbf16> to vector<64x256xbf16>
    %cst_215 = arith.constant 0.000000e+00 : f32
    %484 = vector.broadcast %cst_215 : f32 to vector<2x64xf32>
    %cst_216 = arith.constant 0.000000e+00 : f32
    %485 = vector.broadcast %cst_216 : f32 to vector<2x64xf32>
    %c0_i32_217 = arith.constant 0 : i32
    %486 = arith.index_cast %c0_i32_217 : i32 to index
    %c0_218 = arith.constant 0 : index
    %c0_219 = arith.constant 0 : index
    %487 = vector.load %arg10[%486, %c0_218, %c0_219] : memref<8x2x256xf32, #tpu.memory_space<vmem>>, vector<1x2x256xf32>
    %488 = vector.shape_cast %487 : vector<1x2x256xf32> to vector<2x256xf32>
    %489 = arith.truncf %484 : vector<2x64xf32> to vector<2x64xbf16>
    %cst_220 = arith.constant dense<0.000000e+00> : vector<2x256xf32>
    %490 = tpu.matmul %489, %483, %cst_220 {dimension_numbers = #tpu.dot_dimension_numbers<[1], [0], [0], [1], [0, 0, 1, 1], [], []>} : vector<2x64xbf16>, vector<64x256xbf16>, vector<2x256xf32> -> vector<2x256xf32>
    %491 = arith.addf %488, %490 : vector<2x256xf32>
    %492 = vector.extract_strided_slice %491 {offsets = [0, 0], sizes = [2, 128], strides = [1, 1]} : vector<2x256xf32> to vector<2x128xf32>
    %493 = arith.negf %492 : vector<2x128xf32>
    %494 = math.exp %493 : vector<2x128xf32>
    %cst_221 = arith.constant 1.000000e+00 : f32
    %495 = vector.broadcast %cst_221 : f32 to vector<2x128xf32>
    %496 = arith.addf %495, %494 : vector<2x128xf32>
    %497 = arith.divf %495, %496 : vector<2x128xf32>
    %498 = vector.extract_strided_slice %491 {offsets = [0, 128], sizes = [2, 64], strides = [1, 1]} : vector<2x256xf32> to vector<2x64xf32>
    %499 = math.tanh %498 : vector<2x64xf32>
    %500 = vector.extract_strided_slice %491 {offsets = [0, 192], sizes = [2, 64], strides = [1, 1]} : vector<2x256xf32> to vector<2x64xf32>
    %501 = arith.negf %500 : vector<2x64xf32>
    %502 = math.exp %501 : vector<2x64xf32>
    %cst_222 = arith.constant 1.000000e+00 : f32
    %503 = vector.broadcast %cst_222 : f32 to vector<2x64xf32>
    %504 = arith.addf %503, %502 : vector<2x64xf32>
    %505 = arith.divf %503, %504 : vector<2x64xf32>
    %506 = vector.extract_strided_slice %497 {offsets = [0, 64], sizes = [2, 64], strides = [1, 1]} : vector<2x128xf32> to vector<2x64xf32>
    %507 = arith.mulf %506, %485 : vector<2x64xf32>
    %508 = vector.extract_strided_slice %497 {offsets = [0, 0], sizes = [2, 64], strides = [1, 1]} : vector<2x128xf32> to vector<2x64xf32>
    %509 = arith.mulf %508, %499 : vector<2x64xf32>
    %510 = arith.addf %507, %509 : vector<2x64xf32>
    %511 = math.tanh %510 : vector<2x64xf32>
    %512 = arith.mulf %505, %511 : vector<2x64xf32>
    %513 = arith.index_cast %c0_i32_217 : i32 to index
    %c0_223 = arith.constant 0 : index
    %c0_224 = arith.constant 0 : index
    %514 = vector.load %arg11[%513, %c0_223, %c0_224] : memref<8x2x64xf32, #tpu.memory_space<vmem>>, vector<1x2x64xf32>
    %515 = vector.shape_cast %514 : vector<1x2x64xf32> to vector<2x64xf32>
    %516 = vector.shape_cast %512 : vector<2x64xf32> to vector<1x2x64xf32>
    tpu.vector_store %arg11[%513, %c0_223, %c0_224], %516 {strides = array<i32>} : memref<8x2x64xf32, #tpu.memory_space<vmem>>, vector<1x2x64xf32>,
    %c7_i32_225 = arith.constant 7 : i32
    %517 = arith.subi %c7_i32_225, %c0_i32_217 : i32
    %518 = arith.index_cast %517 : i32 to index
    %c0_226 = arith.constant 0 : index
    %c0_227 = arith.constant 0 : index
    %519 = vector.load %arg12[%518, %c0_226, %c0_227] : memref<8x2x64xf32, #tpu.memory_space<vmem>>, vector<1x2x64xf32>
    %520 = vector.shape_cast %519 : vector<1x2x64xf32> to vector<2x64xf32>
    %521 = vector.shape_cast %512 : vector<2x64xf32> to vector<1x2x64xf32>
    tpu.vector_store %arg12[%518, %c0_226, %c0_227], %521 {strides = array<i32>} : memref<8x2x64xf32, #tpu.memory_space<vmem>>, vector<1x2x64xf32>,
    %c1_i32_228 = arith.constant 1 : i32
    %522 = arith.index_cast %c1_i32_228 : i32 to index
    %c0_229 = arith.constant 0 : index
    %c0_230 = arith.constant 0 : index
    %523 = vector.load %arg10[%522, %c0_229, %c0_230] : memref<8x2x256xf32, #tpu.memory_space<vmem>>, vector<1x2x256xf32>
    %524 = vector.shape_cast %523 : vector<1x2x256xf32> to vector<2x256xf32>
    %525 = arith.truncf %512 : vector<2x64xf32> to vector<2x64xbf16>
    %cst_231 = arith.constant dense<0.000000e+00> : vector<2x256xf32>
    %526 = tpu.matmul %525, %483, %cst_231 {dimension_numbers = #tpu.dot_dimension_numbers<[1], [0], [0], [1], [0, 0, 1, 1], [], []>} : vector<2x64xbf16>, vector<64x256xbf16>, vector<2x256xf32> -> vector<2x256xf32>
    %527 = arith.addf %524, %526 : vector<2x256xf32>
    %528 = vector.extract_strided_slice %527 {offsets = [0, 0], sizes = [2, 128], strides = [1, 1]} : vector<2x256xf32> to vector<2x128xf32>
    %529 = arith.negf %528 : vector<2x128xf32>
    %530 = math.exp %529 : vector<2x128xf32>
    %cst_232 = arith.constant 1.000000e+00 : f32
    %531 = vector.broadcast %cst_232 : f32 to vector<2x128xf32>
    %532 = arith.addf %531, %530 : vector<2x128xf32>
    %533 = arith.divf %531, %532 : vector<2x128xf32>
    %534 = vector.extract_strided_slice %527 {offsets = [0, 128], sizes = [2, 64], strides = [1, 1]} : vector<2x256xf32> to vector<2x64xf32>
    %535 = math.tanh %534 : vector<2x64xf32>
    %536 = vector.extract_strided_slice %527 {offsets = [0, 192], sizes = [2, 64], strides = [1, 1]} : vector<2x256xf32> to vector<2x64xf32>
    %537 = arith.negf %536 : vector<2x64xf32>
    %538 = math.exp %537 : vector<2x64xf32>
    %cst_233 = arith.constant 1.000000e+00 : f32
    %539 = vector.broadcast %cst_233 : f32 to vector<2x64xf32>
    %540 = arith.addf %539, %538 : vector<2x64xf32>
    %541 = arith.divf %539, %540 : vector<2x64xf32>
    %542 = vector.extract_strided_slice %533 {offsets = [0, 64], sizes = [2, 64], strides = [1, 1]} : vector<2x128xf32> to vector<2x64xf32>
    %543 = arith.mulf %542, %510 : vector<2x64xf32>
    %544 = vector.extract_strided_slice %533 {offsets = [0, 0], sizes = [2, 64], strides = [1, 1]} : vector<2x128xf32> to vector<2x64xf32>
    %545 = arith.mulf %544, %535 : vector<2x64xf32>
    %546 = arith.addf %543, %545 : vector<2x64xf32>
    %547 = math.tanh %546 : vector<2x64xf32>
    %548 = arith.mulf %541, %547 : vector<2x64xf32>
    %549 = arith.index_cast %c1_i32_228 : i32 to index
    %c0_234 = arith.constant 0 : index
    %c0_235 = arith.constant 0 : index
    %550 = vector.load %arg11[%549, %c0_234, %c0_235] : memref<8x2x64xf32, #tpu.memory_space<vmem>>, vector<1x2x64xf32>
    %551 = vector.shape_cast %550 : vector<1x2x64xf32> to vector<2x64xf32>
    %552 = vector.shape_cast %548 : vector<2x64xf32> to vector<1x2x64xf32>
    tpu.vector_store %arg11[%549, %c0_234, %c0_235], %552 {strides = array<i32>} : memref<8x2x64xf32, #tpu.memory_space<vmem>>, vector<1x2x64xf32>,
    %c7_i32_236 = arith.constant 7 : i32
    %553 = arith.subi %c7_i32_236, %c1_i32_228 : i32
    %554 = arith.index_cast %553 : i32 to index
    %c0_237 = arith.constant 0 : index
    %c0_238 = arith.constant 0 : index
    %555 = vector.load %arg12[%554, %c0_237, %c0_238] : memref<8x2x64xf32, #tpu.memory_space<vmem>>, vector<1x2x64xf32>
    %556 = vector.shape_cast %555 : vector<1x2x64xf32> to vector<2x64xf32>
    %557 = vector.shape_cast %548 : vector<2x64xf32> to vector<1x2x64xf32>
    tpu.vector_store %arg12[%554, %c0_237, %c0_238], %557 {strides = array<i32>} : memref<8x2x64xf32, #tpu.memory_space<vmem>>, vector<1x2x64xf32>,
    %c2_i32_239 = arith.constant 2 : i32
    %558 = arith.index_cast %c2_i32_239 : i32 to index
    %c0_240 = arith.constant 0 : index
    %c0_241 = arith.constant 0 : index
    %559 = vector.load %arg10[%558, %c0_240, %c0_241] : memref<8x2x256xf32, #tpu.memory_space<vmem>>, vector<1x2x256xf32>
    %560 = vector.shape_cast %559 : vector<1x2x256xf32> to vector<2x256xf32>
    %561 = arith.truncf %548 : vector<2x64xf32> to vector<2x64xbf16>
    %cst_242 = arith.constant dense<0.000000e+00> : vector<2x256xf32>
    %562 = tpu.matmul %561, %483, %cst_242 {dimension_numbers = #tpu.dot_dimension_numbers<[1], [0], [0], [1], [0, 0, 1, 1], [], []>} : vector<2x64xbf16>, vector<64x256xbf16>, vector<2x256xf32> -> vector<2x256xf32>
    %563 = arith.addf %560, %562 : vector<2x256xf32>
    %564 = vector.extract_strided_slice %563 {offsets = [0, 0], sizes = [2, 128], strides = [1, 1]} : vector<2x256xf32> to vector<2x128xf32>
    %565 = arith.negf %564 : vector<2x128xf32>
    %566 = math.exp %565 : vector<2x128xf32>
    %cst_243 = arith.constant 1.000000e+00 : f32
    %567 = vector.broadcast %cst_243 : f32 to vector<2x128xf32>
    %568 = arith.addf %567, %566 : vector<2x128xf32>
    %569 = arith.divf %567, %568 : vector<2x128xf32>
    %570 = vector.extract_strided_slice %563 {offsets = [0, 128], sizes = [2, 64], strides = [1, 1]} : vector<2x256xf32> to vector<2x64xf32>
    %571 = math.tanh %570 : vector<2x64xf32>
    %572 = vector.extract_strided_slice %563 {offsets = [0, 192], sizes = [2, 64], strides = [1, 1]} : vector<2x256xf32> to vector<2x64xf32>
    %573 = arith.negf %572 : vector<2x64xf32>
    %574 = math.exp %573 : vector<2x64xf32>
    %cst_244 = arith.constant 1.000000e+00 : f32
    %575 = vector.broadcast %cst_244 : f32 to vector<2x64xf32>
    %576 = arith.addf %575, %574 : vector<2x64xf32>
    %577 = arith.divf %575, %576 : vector<2x64xf32>
    %578 = vector.extract_strided_slice %569 {offsets = [0, 64], sizes = [2, 64], strides = [1, 1]} : vector<2x128xf32> to vector<2x64xf32>
    %579 = arith.mulf %578, %546 : vector<2x64xf32>
    %580 = vector.extract_strided_slice %569 {offsets = [0, 0], sizes = [2, 64], strides = [1, 1]} : vector<2x128xf32> to vector<2x64xf32>
    %581 = arith.mulf %580, %571 : vector<2x64xf32>
    %582 = arith.addf %579, %581 : vector<2x64xf32>
    %583 = math.tanh %582 : vector<2x64xf32>
    %584 = arith.mulf %577, %583 : vector<2x64xf32>
    %585 = arith.index_cast %c2_i32_239 : i32 to index
    %c0_245 = arith.constant 0 : index
    %c0_246 = arith.constant 0 : index
    %586 = vector.load %arg11[%585, %c0_245, %c0_246] : memref<8x2x64xf32, #tpu.memory_space<vmem>>, vector<1x2x64xf32>
    %587 = vector.shape_cast %586 : vector<1x2x64xf32> to vector<2x64xf32>
    %588 = vector.shape_cast %584 : vector<2x64xf32> to vector<1x2x64xf32>
    tpu.vector_store %arg11[%585, %c0_245, %c0_246], %588 {strides = array<i32>} : memref<8x2x64xf32, #tpu.memory_space<vmem>>, vector<1x2x64xf32>,
    %c7_i32_247 = arith.constant 7 : i32
    %589 = arith.subi %c7_i32_247, %c2_i32_239 : i32
    %590 = arith.index_cast %589 : i32 to index
    %c0_248 = arith.constant 0 : index
    %c0_249 = arith.constant 0 : index
    %591 = vector.load %arg12[%590, %c0_248, %c0_249] : memref<8x2x64xf32, #tpu.memory_space<vmem>>, vector<1x2x64xf32>
    %592 = vector.shape_cast %591 : vector<1x2x64xf32> to vector<2x64xf32>
    %593 = vector.shape_cast %584 : vector<2x64xf32> to vector<1x2x64xf32>
    tpu.vector_store %arg12[%590, %c0_248, %c0_249], %593 {strides = array<i32>} : memref<8x2x64xf32, #tpu.memory_space<vmem>>, vector<1x2x64xf32>,
    %c3_i32_250 = arith.constant 3 : i32
    %594 = arith.index_cast %c3_i32_250 : i32 to index
    %c0_251 = arith.constant 0 : index
    %c0_252 = arith.constant 0 : index
    %595 = vector.load %arg10[%594, %c0_251, %c0_252] : memref<8x2x256xf32, #tpu.memory_space<vmem>>, vector<1x2x256xf32>
    %596 = vector.shape_cast %595 : vector<1x2x256xf32> to vector<2x256xf32>
    %597 = arith.truncf %584 : vector<2x64xf32> to vector<2x64xbf16>
    %cst_253 = arith.constant dense<0.000000e+00> : vector<2x256xf32>
    %598 = tpu.matmul %597, %483, %cst_253 {dimension_numbers = #tpu.dot_dimension_numbers<[1], [0], [0], [1], [0, 0, 1, 1], [], []>} : vector<2x64xbf16>, vector<64x256xbf16>, vector<2x256xf32> -> vector<2x256xf32>
    %599 = arith.addf %596, %598 : vector<2x256xf32>
    %600 = vector.extract_strided_slice %599 {offsets = [0, 0], sizes = [2, 128], strides = [1, 1]} : vector<2x256xf32> to vector<2x128xf32>
    %601 = arith.negf %600 : vector<2x128xf32>
    %602 = math.exp %601 : vector<2x128xf32>
    %cst_254 = arith.constant 1.000000e+00 : f32
    %603 = vector.broadcast %cst_254 : f32 to vector<2x128xf32>
    %604 = arith.addf %603, %602 : vector<2x128xf32>
    %605 = arith.divf %603, %604 : vector<2x128xf32>
    %606 = vector.extract_strided_slice %599 {offsets = [0, 128], sizes = [2, 64], strides = [1, 1]} : vector<2x256xf32> to vector<2x64xf32>
    %607 = math.tanh %606 : vector<2x64xf32>
    %608 = vector.extract_strided_slice %599 {offsets = [0, 192], sizes = [2, 64], strides = [1, 1]} : vector<2x256xf32> to vector<2x64xf32>
    %609 = arith.negf %608 : vector<2x64xf32>
    %610 = math.exp %609 : vector<2x64xf32>
    %cst_255 = arith.constant 1.000000e+00 : f32
    %611 = vector.broadcast %cst_255 : f32 to vector<2x64xf32>
    %612 = arith.addf %611, %610 : vector<2x64xf32>
    %613 = arith.divf %611, %612 : vector<2x64xf32>
    %614 = vector.extract_strided_slice %605 {offsets = [0, 64], sizes = [2, 64], strides = [1, 1]} : vector<2x128xf32> to vector<2x64xf32>
    %615 = arith.mulf %614, %582 : vector<2x64xf32>
    %616 = vector.extract_strided_slice %605 {offsets = [0, 0], sizes = [2, 64], strides = [1, 1]} : vector<2x128xf32> to vector<2x64xf32>
    %617 = arith.mulf %616, %607 : vector<2x64xf32>
    %618 = arith.addf %615, %617 : vector<2x64xf32>
    %619 = math.tanh %618 : vector<2x64xf32>
    %620 = arith.mulf %613, %619 : vector<2x64xf32>
    %621 = arith.index_cast %c3_i32_250 : i32 to index
    %c0_256 = arith.constant 0 : index
    %c0_257 = arith.constant 0 : index
    %622 = vector.load %arg11[%621, %c0_256, %c0_257] : memref<8x2x64xf32, #tpu.memory_space<vmem>>, vector<1x2x64xf32>
    %623 = vector.shape_cast %622 : vector<1x2x64xf32> to vector<2x64xf32>
    %624 = vector.shape_cast %620 : vector<2x64xf32> to vector<1x2x64xf32>
    tpu.vector_store %arg11[%621, %c0_256, %c0_257], %624 {strides = array<i32>} : memref<8x2x64xf32, #tpu.memory_space<vmem>>, vector<1x2x64xf32>,
    %c7_i32_258 = arith.constant 7 : i32
    %625 = arith.subi %c7_i32_258, %c3_i32_250 : i32
    %626 = arith.index_cast %625 : i32 to index
    %c0_259 = arith.constant 0 : index
    %c0_260 = arith.constant 0 : index
    %627 = vector.load %arg12[%626, %c0_259, %c0_260] : memref<8x2x64xf32, #tpu.memory_space<vmem>>, vector<1x2x64xf32>
    %628 = vector.shape_cast %627 : vector<1x2x64xf32> to vector<2x64xf32>
    %629 = vector.shape_cast %620 : vector<2x64xf32> to vector<1x2x64xf32>
    tpu.vector_store %arg12[%626, %c0_259, %c0_260], %629 {strides = array<i32>} : memref<8x2x64xf32, #tpu.memory_space<vmem>>, vector<1x2x64xf32>,
    %c4_i32_261 = arith.constant 4 : i32
    %630 = arith.index_cast %c4_i32_261 : i32 to index
    %c0_262 = arith.constant 0 : index
    %c0_263 = arith.constant 0 : index
    %631 = vector.load %arg10[%630, %c0_262, %c0_263] : memref<8x2x256xf32, #tpu.memory_space<vmem>>, vector<1x2x256xf32>
    %632 = vector.shape_cast %631 : vector<1x2x256xf32> to vector<2x256xf32>
    %633 = arith.truncf %620 : vector<2x64xf32> to vector<2x64xbf16>
    %cst_264 = arith.constant dense<0.000000e+00> : vector<2x256xf32>
    %634 = tpu.matmul %633, %483, %cst_264 {dimension_numbers = #tpu.dot_dimension_numbers<[1], [0], [0], [1], [0, 0, 1, 1], [], []>} : vector<2x64xbf16>, vector<64x256xbf16>, vector<2x256xf32> -> vector<2x256xf32>
    %635 = arith.addf %632, %634 : vector<2x256xf32>
    %636 = vector.extract_strided_slice %635 {offsets = [0, 0], sizes = [2, 128], strides = [1, 1]} : vector<2x256xf32> to vector<2x128xf32>
    %637 = arith.negf %636 : vector<2x128xf32>
    %638 = math.exp %637 : vector<2x128xf32>
    %cst_265 = arith.constant 1.000000e+00 : f32
    %639 = vector.broadcast %cst_265 : f32 to vector<2x128xf32>
    %640 = arith.addf %639, %638 : vector<2x128xf32>
    %641 = arith.divf %639, %640 : vector<2x128xf32>
    %642 = vector.extract_strided_slice %635 {offsets = [0, 128], sizes = [2, 64], strides = [1, 1]} : vector<2x256xf32> to vector<2x64xf32>
    %643 = math.tanh %642 : vector<2x64xf32>
    %644 = vector.extract_strided_slice %635 {offsets = [0, 192], sizes = [2, 64], strides = [1, 1]} : vector<2x256xf32> to vector<2x64xf32>
    %645 = arith.negf %644 : vector<2x64xf32>
    %646 = math.exp %645 : vector<2x64xf32>
    %cst_266 = arith.constant 1.000000e+00 : f32
    %647 = vector.broadcast %cst_266 : f32 to vector<2x64xf32>
    %648 = arith.addf %647, %646 : vector<2x64xf32>
    %649 = arith.divf %647, %648 : vector<2x64xf32>
    %650 = vector.extract_strided_slice %641 {offsets = [0, 64], sizes = [2, 64], strides = [1, 1]} : vector<2x128xf32> to vector<2x64xf32>
    %651 = arith.mulf %650, %618 : vector<2x64xf32>
    %652 = vector.extract_strided_slice %641 {offsets = [0, 0], sizes = [2, 64], strides = [1, 1]} : vector<2x128xf32> to vector<2x64xf32>
    %653 = arith.mulf %652, %643 : vector<2x64xf32>
    %654 = arith.addf %651, %653 : vector<2x64xf32>
    %655 = math.tanh %654 : vector<2x64xf32>
    %656 = arith.mulf %649, %655 : vector<2x64xf32>
    %657 = arith.index_cast %c4_i32_261 : i32 to index
    %c0_267 = arith.constant 0 : index
    %c0_268 = arith.constant 0 : index
    %658 = vector.load %arg11[%657, %c0_267, %c0_268] : memref<8x2x64xf32, #tpu.memory_space<vmem>>, vector<1x2x64xf32>
    %659 = vector.shape_cast %658 : vector<1x2x64xf32> to vector<2x64xf32>
    %660 = vector.shape_cast %656 : vector<2x64xf32> to vector<1x2x64xf32>
    tpu.vector_store %arg11[%657, %c0_267, %c0_268], %660 {strides = array<i32>} : memref<8x2x64xf32, #tpu.memory_space<vmem>>, vector<1x2x64xf32>,
    %c7_i32_269 = arith.constant 7 : i32
    %661 = arith.subi %c7_i32_269, %c4_i32_261 : i32
    %662 = arith.index_cast %661 : i32 to index
    %c0_270 = arith.constant 0 : index
    %c0_271 = arith.constant 0 : index
    %663 = vector.load %arg12[%662, %c0_270, %c0_271] : memref<8x2x64xf32, #tpu.memory_space<vmem>>, vector<1x2x64xf32>
    %664 = vector.shape_cast %663 : vector<1x2x64xf32> to vector<2x64xf32>
    %665 = vector.shape_cast %656 : vector<2x64xf32> to vector<1x2x64xf32>
    tpu.vector_store %arg12[%662, %c0_270, %c0_271], %665 {strides = array<i32>} : memref<8x2x64xf32, #tpu.memory_space<vmem>>, vector<1x2x64xf32>,
    %c5_i32_272 = arith.constant 5 : i32
    %666 = arith.index_cast %c5_i32_272 : i32 to index
    %c0_273 = arith.constant 0 : index
    %c0_274 = arith.constant 0 : index
    %667 = vector.load %arg10[%666, %c0_273, %c0_274] : memref<8x2x256xf32, #tpu.memory_space<vmem>>, vector<1x2x256xf32>
    %668 = vector.shape_cast %667 : vector<1x2x256xf32> to vector<2x256xf32>
    %669 = arith.truncf %656 : vector<2x64xf32> to vector<2x64xbf16>
    %cst_275 = arith.constant dense<0.000000e+00> : vector<2x256xf32>
    %670 = tpu.matmul %669, %483, %cst_275 {dimension_numbers = #tpu.dot_dimension_numbers<[1], [0], [0], [1], [0, 0, 1, 1], [], []>} : vector<2x64xbf16>, vector<64x256xbf16>, vector<2x256xf32> -> vector<2x256xf32>
    %671 = arith.addf %668, %670 : vector<2x256xf32>
    %672 = vector.extract_strided_slice %671 {offsets = [0, 0], sizes = [2, 128], strides = [1, 1]} : vector<2x256xf32> to vector<2x128xf32>
    %673 = arith.negf %672 : vector<2x128xf32>
    %674 = math.exp %673 : vector<2x128xf32>
    %cst_276 = arith.constant 1.000000e+00 : f32
    %675 = vector.broadcast %cst_276 : f32 to vector<2x128xf32>
    %676 = arith.addf %675, %674 : vector<2x128xf32>
    %677 = arith.divf %675, %676 : vector<2x128xf32>
    %678 = vector.extract_strided_slice %671 {offsets = [0, 128], sizes = [2, 64], strides = [1, 1]} : vector<2x256xf32> to vector<2x64xf32>
    %679 = math.tanh %678 : vector<2x64xf32>
    %680 = vector.extract_strided_slice %671 {offsets = [0, 192], sizes = [2, 64], strides = [1, 1]} : vector<2x256xf32> to vector<2x64xf32>
    %681 = arith.negf %680 : vector<2x64xf32>
    %682 = math.exp %681 : vector<2x64xf32>
    %cst_277 = arith.constant 1.000000e+00 : f32
    %683 = vector.broadcast %cst_277 : f32 to vector<2x64xf32>
    %684 = arith.addf %683, %682 : vector<2x64xf32>
    %685 = arith.divf %683, %684 : vector<2x64xf32>
    %686 = vector.extract_strided_slice %677 {offsets = [0, 64], sizes = [2, 64], strides = [1, 1]} : vector<2x128xf32> to vector<2x64xf32>
    %687 = arith.mulf %686, %654 : vector<2x64xf32>
    %688 = vector.extract_strided_slice %677 {offsets = [0, 0], sizes = [2, 64], strides = [1, 1]} : vector<2x128xf32> to vector<2x64xf32>
    %689 = arith.mulf %688, %679 : vector<2x64xf32>
    %690 = arith.addf %687, %689 : vector<2x64xf32>
    %691 = math.tanh %690 : vector<2x64xf32>
    %692 = arith.mulf %685, %691 : vector<2x64xf32>
    %693 = arith.index_cast %c5_i32_272 : i32 to index
    %c0_278 = arith.constant 0 : index
    %c0_279 = arith.constant 0 : index
    %694 = vector.load %arg11[%693, %c0_278, %c0_279] : memref<8x2x64xf32, #tpu.memory_space<vmem>>, vector<1x2x64xf32>
    %695 = vector.shape_cast %694 : vector<1x2x64xf32> to vector<2x64xf32>
    %696 = vector.shape_cast %692 : vector<2x64xf32> to vector<1x2x64xf32>
    tpu.vector_store %arg11[%693, %c0_278, %c0_279], %696 {strides = array<i32>} : memref<8x2x64xf32, #tpu.memory_space<vmem>>, vector<1x2x64xf32>,
    %c7_i32_280 = arith.constant 7 : i32
    %697 = arith.subi %c7_i32_280, %c5_i32_272 : i32
    %698 = arith.index_cast %697 : i32 to index
    %c0_281 = arith.constant 0 : index
    %c0_282 = arith.constant 0 : index
    %699 = vector.load %arg12[%698, %c0_281, %c0_282] : memref<8x2x64xf32, #tpu.memory_space<vmem>>, vector<1x2x64xf32>
    %700 = vector.shape_cast %699 : vector<1x2x64xf32> to vector<2x64xf32>
    %701 = vector.shape_cast %692 : vector<2x64xf32> to vector<1x2x64xf32>
    tpu.vector_store %arg12[%698, %c0_281, %c0_282], %701 {strides = array<i32>} : memref<8x2x64xf32, #tpu.memory_space<vmem>>, vector<1x2x64xf32>,
    %c6_i32_283 = arith.constant 6 : i32
    %702 = arith.index_cast %c6_i32_283 : i32 to index
    %c0_284 = arith.constant 0 : index
    %c0_285 = arith.constant 0 : index
    %703 = vector.load %arg10[%702, %c0_284, %c0_285] : memref<8x2x256xf32, #tpu.memory_space<vmem>>, vector<1x2x256xf32>
    %704 = vector.shape_cast %703 : vector<1x2x256xf32> to vector<2x256xf32>
    %705 = arith.truncf %692 : vector<2x64xf32> to vector<2x64xbf16>
    %cst_286 = arith.constant dense<0.000000e+00> : vector<2x256xf32>
    %706 = tpu.matmul %705, %483, %cst_286 {dimension_numbers = #tpu.dot_dimension_numbers<[1], [0], [0], [1], [0, 0, 1, 1], [], []>} : vector<2x64xbf16>, vector<64x256xbf16>, vector<2x256xf32> -> vector<2x256xf32>
    %707 = arith.addf %704, %706 : vector<2x256xf32>
    %708 = vector.extract_strided_slice %707 {offsets = [0, 0], sizes = [2, 128], strides = [1, 1]} : vector<2x256xf32> to vector<2x128xf32>
    %709 = arith.negf %708 : vector<2x128xf32>
    %710 = math.exp %709 : vector<2x128xf32>
    %cst_287 = arith.constant 1.000000e+00 : f32
    %711 = vector.broadcast %cst_287 : f32 to vector<2x128xf32>
    %712 = arith.addf %711, %710 : vector<2x128xf32>
    %713 = arith.divf %711, %712 : vector<2x128xf32>
    %714 = vector.extract_strided_slice %707 {offsets = [0, 128], sizes = [2, 64], strides = [1, 1]} : vector<2x256xf32> to vector<2x64xf32>
    %715 = math.tanh %714 : vector<2x64xf32>
    %716 = vector.extract_strided_slice %707 {offsets = [0, 192], sizes = [2, 64], strides = [1, 1]} : vector<2x256xf32> to vector<2x64xf32>
    %717 = arith.negf %716 : vector<2x64xf32>
    %718 = math.exp %717 : vector<2x64xf32>
    %cst_288 = arith.constant 1.000000e+00 : f32
    %719 = vector.broadcast %cst_288 : f32 to vector<2x64xf32>
    %720 = arith.addf %719, %718 : vector<2x64xf32>
    %721 = arith.divf %719, %720 : vector<2x64xf32>
    %722 = vector.extract_strided_slice %713 {offsets = [0, 64], sizes = [2, 64], strides = [1, 1]} : vector<2x128xf32> to vector<2x64xf32>
    %723 = arith.mulf %722, %690 : vector<2x64xf32>
    %724 = vector.extract_strided_slice %713 {offsets = [0, 0], sizes = [2, 64], strides = [1, 1]} : vector<2x128xf32> to vector<2x64xf32>
    %725 = arith.mulf %724, %715 : vector<2x64xf32>
    %726 = arith.addf %723, %725 : vector<2x64xf32>
    %727 = math.tanh %726 : vector<2x64xf32>
    %728 = arith.mulf %721, %727 : vector<2x64xf32>
    %729 = arith.index_cast %c6_i32_283 : i32 to index
    %c0_289 = arith.constant 0 : index
    %c0_290 = arith.constant 0 : index
    %730 = vector.load %arg11[%729, %c0_289, %c0_290] : memref<8x2x64xf32, #tpu.memory_space<vmem>>, vector<1x2x64xf32>
    %731 = vector.shape_cast %730 : vector<1x2x64xf32> to vector<2x64xf32>
    %732 = vector.shape_cast %728 : vector<2x64xf32> to vector<1x2x64xf32>
    tpu.vector_store %arg11[%729, %c0_289, %c0_290], %732 {strides = array<i32>} : memref<8x2x64xf32, #tpu.memory_space<vmem>>, vector<1x2x64xf32>,
    %c7_i32_291 = arith.constant 7 : i32
    %733 = arith.subi %c7_i32_291, %c6_i32_283 : i32
    %734 = arith.index_cast %733 : i32 to index
    %c0_292 = arith.constant 0 : index
    %c0_293 = arith.constant 0 : index
    %735 = vector.load %arg12[%734, %c0_292, %c0_293] : memref<8x2x64xf32, #tpu.memory_space<vmem>>, vector<1x2x64xf32>
    %736 = vector.shape_cast %735 : vector<1x2x64xf32> to vector<2x64xf32>
    %737 = vector.shape_cast %728 : vector<2x64xf32> to vector<1x2x64xf32>
    tpu.vector_store %arg12[%734, %c0_292, %c0_293], %737 {strides = array<i32>} : memref<8x2x64xf32, #tpu.memory_space<vmem>>, vector<1x2x64xf32>,
    %c7_i32_294 = arith.constant 7 : i32
    %738 = arith.index_cast %c7_i32_294 : i32 to index
    %c0_295 = arith.constant 0 : index
    %c0_296 = arith.constant 0 : index
    %739 = vector.load %arg10[%738, %c0_295, %c0_296] : memref<8x2x256xf32, #tpu.memory_space<vmem>>, vector<1x2x256xf32>
    %740 = vector.shape_cast %739 : vector<1x2x256xf32> to vector<2x256xf32>
    %741 = arith.truncf %728 : vector<2x64xf32> to vector<2x64xbf16>
    %cst_297 = arith.constant dense<0.000000e+00> : vector<2x256xf32>
    %742 = tpu.matmul %741, %483, %cst_297 {dimension_numbers = #tpu.dot_dimension_numbers<[1], [0], [0], [1], [0, 0, 1, 1], [], []>} : vector<2x64xbf16>, vector<64x256xbf16>, vector<2x256xf32> -> vector<2x256xf32>
    %743 = arith.addf %740, %742 : vector<2x256xf32>
    %744 = vector.extract_strided_slice %743 {offsets = [0, 0], sizes = [2, 128], strides = [1, 1]} : vector<2x256xf32> to vector<2x128xf32>
    %745 = arith.negf %744 : vector<2x128xf32>
    %746 = math.exp %745 : vector<2x128xf32>
    %cst_298 = arith.constant 1.000000e+00 : f32
    %747 = vector.broadcast %cst_298 : f32 to vector<2x128xf32>
    %748 = arith.addf %747, %746 : vector<2x128xf32>
    %749 = arith.divf %747, %748 : vector<2x128xf32>
    %750 = vector.extract_strided_slice %743 {offsets = [0, 128], sizes = [2, 64], strides = [1, 1]} : vector<2x256xf32> to vector<2x64xf32>
    %751 = math.tanh %750 : vector<2x64xf32>
    %752 = vector.extract_strided_slice %743 {offsets = [0, 192], sizes = [2, 64], strides = [1, 1]} : vector<2x256xf32> to vector<2x64xf32>
    %753 = arith.negf %752 : vector<2x64xf32>
    %754 = math.exp %753 : vector<2x64xf32>
    %cst_299 = arith.constant 1.000000e+00 : f32
    %755 = vector.broadcast %cst_299 : f32 to vector<2x64xf32>
    %756 = arith.addf %755, %754 : vector<2x64xf32>
    %757 = arith.divf %755, %756 : vector<2x64xf32>
    %758 = vector.extract_strided_slice %749 {offsets = [0, 64], sizes = [2, 64], strides = [1, 1]} : vector<2x128xf32> to vector<2x64xf32>
    %759 = arith.mulf %758, %726 : vector<2x64xf32>
    %760 = vector.extract_strided_slice %749 {offsets = [0, 0], sizes = [2, 64], strides = [1, 1]} : vector<2x128xf32> to vector<2x64xf32>
    %761 = arith.mulf %760, %751 : vector<2x64xf32>
    %762 = arith.addf %759, %761 : vector<2x64xf32>
    %763 = math.tanh %762 : vector<2x64xf32>
    %764 = arith.mulf %757, %763 : vector<2x64xf32>
    %765 = arith.index_cast %c7_i32_294 : i32 to index
    %c0_300 = arith.constant 0 : index
    %c0_301 = arith.constant 0 : index
    %766 = vector.load %arg11[%765, %c0_300, %c0_301] : memref<8x2x64xf32, #tpu.memory_space<vmem>>, vector<1x2x64xf32>
    %767 = vector.shape_cast %766 : vector<1x2x64xf32> to vector<2x64xf32>
    %768 = vector.shape_cast %764 : vector<2x64xf32> to vector<1x2x64xf32>
    tpu.vector_store %arg11[%765, %c0_300, %c0_301], %768 {strides = array<i32>} : memref<8x2x64xf32, #tpu.memory_space<vmem>>, vector<1x2x64xf32>,
    %c7_i32_302 = arith.constant 7 : i32
    %769 = arith.subi %c7_i32_302, %c7_i32_294 : i32
    %770 = arith.index_cast %769 : i32 to index
    %c0_303 = arith.constant 0 : index
    %c0_304 = arith.constant 0 : index
    %771 = vector.load %arg12[%770, %c0_303, %c0_304] : memref<8x2x64xf32, #tpu.memory_space<vmem>>, vector<1x2x64xf32>
    %772 = vector.shape_cast %771 : vector<1x2x64xf32> to vector<2x64xf32>
    %773 = vector.shape_cast %764 : vector<2x64xf32> to vector<1x2x64xf32>
    tpu.vector_store %arg12[%770, %c0_303, %c0_304], %773 {strides = array<i32>} : memref<8x2x64xf32, #tpu.memory_space<vmem>>, vector<1x2x64xf32>,
    %c8_i32_305 = arith.constant 8 : i32
    %c0_306 = arith.constant 0 : index
    %c0_307 = arith.constant 0 : index
    %c0_308 = arith.constant 0 : index
    %774 = vector.load %arg11[%c0_306, %c0_307, %c0_308] : memref<8x2x64xf32, #tpu.memory_space<vmem>>, vector<1x2x64xf32>
    %775 = vector.shape_cast %774 : vector<1x2x64xf32> to vector<2x64xf32>
    %c0_309 = arith.constant 0 : index
    %c0_310 = arith.constant 0 : index
    %c0_311 = arith.constant 0 : index
    %776 = vector.load %arg12[%c0_309, %c0_310, %c0_311] : memref<8x2x64xf32, #tpu.memory_space<vmem>>, vector<1x2x64xf32>
    %777 = vector.shape_cast %776 : vector<1x2x64xf32> to vector<2x64xf32>
    %778 = arith.select %29, %775, %777 : vector<2x64xi1>, vector<2x64xf32>
    %c0_312 = arith.constant 0 : index
    %c0_313 = arith.constant 0 : index
    %779 = vector.load %arg13[%c0_312, %c0_313] : memref<16x64xf32, #tpu.memory_space<vmem>>, vector<2x64xf32>
    tpu.vector_store %arg13[%c0_312, %c0_313], %778 {strides = array<i32>} : memref<16x64xf32, #tpu.memory_space<vmem>>, vector<2x64xf32>,
    %c1_314 = arith.constant 1 : index
    %c0_315 = arith.constant 0 : index
    %c0_316 = arith.constant 0 : index
    %780 = vector.load %arg11[%c1_314, %c0_315, %c0_316] : memref<8x2x64xf32, #tpu.memory_space<vmem>>, vector<1x2x64xf32>
    %781 = vector.shape_cast %780 : vector<1x2x64xf32> to vector<2x64xf32>
    %c1_317 = arith.constant 1 : index
    %c0_318 = arith.constant 0 : index
    %c0_319 = arith.constant 0 : index
    %782 = vector.load %arg12[%c1_317, %c0_318, %c0_319] : memref<8x2x64xf32, #tpu.memory_space<vmem>>, vector<1x2x64xf32>
    %783 = vector.shape_cast %782 : vector<1x2x64xf32> to vector<2x64xf32>
    %784 = arith.select %29, %781, %783 : vector<2x64xi1>, vector<2x64xf32>
    %c2_320 = arith.constant 2 : index
    %c0_321 = arith.constant 0 : index
    %785 = vector.load %arg13[%c2_320, %c0_321] : memref<16x64xf32, #tpu.memory_space<vmem>>, vector<2x64xf32>
    tpu.vector_store %arg13[%c2_320, %c0_321], %784 {strides = array<i32>} : memref<16x64xf32, #tpu.memory_space<vmem>>, vector<2x64xf32>,
    %c2_322 = arith.constant 2 : index
    %c0_323 = arith.constant 0 : index
    %c0_324 = arith.constant 0 : index
    %786 = vector.load %arg11[%c2_322, %c0_323, %c0_324] : memref<8x2x64xf32, #tpu.memory_space<vmem>>, vector<1x2x64xf32>
    %787 = vector.shape_cast %786 : vector<1x2x64xf32> to vector<2x64xf32>
    %c2_325 = arith.constant 2 : index
    %c0_326 = arith.constant 0 : index
    %c0_327 = arith.constant 0 : index
    %788 = vector.load %arg12[%c2_325, %c0_326, %c0_327] : memref<8x2x64xf32, #tpu.memory_space<vmem>>, vector<1x2x64xf32>
    %789 = vector.shape_cast %788 : vector<1x2x64xf32> to vector<2x64xf32>
    %790 = arith.select %29, %787, %789 : vector<2x64xi1>, vector<2x64xf32>
    %c4_328 = arith.constant 4 : index
    %c0_329 = arith.constant 0 : index
    %791 = vector.load %arg13[%c4_328, %c0_329] : memref<16x64xf32, #tpu.memory_space<vmem>>, vector<2x64xf32>
    tpu.vector_store %arg13[%c4_328, %c0_329], %790 {strides = array<i32>} : memref<16x64xf32, #tpu.memory_space<vmem>>, vector<2x64xf32>,
    %c3_330 = arith.constant 3 : index
    %c0_331 = arith.constant 0 : index
    %c0_332 = arith.constant 0 : index
    %792 = vector.load %arg11[%c3_330, %c0_331, %c0_332] : memref<8x2x64xf32, #tpu.memory_space<vmem>>, vector<1x2x64xf32>
    %793 = vector.shape_cast %792 : vector<1x2x64xf32> to vector<2x64xf32>
    %c3_333 = arith.constant 3 : index
    %c0_334 = arith.constant 0 : index
    %c0_335 = arith.constant 0 : index
    %794 = vector.load %arg12[%c3_333, %c0_334, %c0_335] : memref<8x2x64xf32, #tpu.memory_space<vmem>>, vector<1x2x64xf32>
    %795 = vector.shape_cast %794 : vector<1x2x64xf32> to vector<2x64xf32>
    %796 = arith.select %29, %793, %795 : vector<2x64xi1>, vector<2x64xf32>
    %c6_336 = arith.constant 6 : index
    %c0_337 = arith.constant 0 : index
    %797 = vector.load %arg13[%c6_336, %c0_337] : memref<16x64xf32, #tpu.memory_space<vmem>>, vector<2x64xf32>
    tpu.vector_store %arg13[%c6_336, %c0_337], %796 {strides = array<i32>} : memref<16x64xf32, #tpu.memory_space<vmem>>, vector<2x64xf32>,
    %c4_338 = arith.constant 4 : index
    %c0_339 = arith.constant 0 : index
    %c0_340 = arith.constant 0 : index
    %798 = vector.load %arg11[%c4_338, %c0_339, %c0_340] : memref<8x2x64xf32, #tpu.memory_space<vmem>>, vector<1x2x64xf32>
    %799 = vector.shape_cast %798 : vector<1x2x64xf32> to vector<2x64xf32>
    %c4_341 = arith.constant 4 : index
    %c0_342 = arith.constant 0 : index
    %c0_343 = arith.constant 0 : index
    %800 = vector.load %arg12[%c4_341, %c0_342, %c0_343] : memref<8x2x64xf32, #tpu.memory_space<vmem>>, vector<1x2x64xf32>
    %801 = vector.shape_cast %800 : vector<1x2x64xf32> to vector<2x64xf32>
    %802 = arith.select %29, %799, %801 : vector<2x64xi1>, vector<2x64xf32>
    %c8_344 = arith.constant 8 : index
    %c0_345 = arith.constant 0 : index
    %803 = vector.load %arg13[%c8_344, %c0_345] : memref<16x64xf32, #tpu.memory_space<vmem>>, vector<2x64xf32>
    tpu.vector_store %arg13[%c8_344, %c0_345], %802 {strides = array<i32>} : memref<16x64xf32, #tpu.memory_space<vmem>>, vector<2x64xf32>,
    %c5_346 = arith.constant 5 : index
    %c0_347 = arith.constant 0 : index
    %c0_348 = arith.constant 0 : index
    %804 = vector.load %arg11[%c5_346, %c0_347, %c0_348] : memref<8x2x64xf32, #tpu.memory_space<vmem>>, vector<1x2x64xf32>
    %805 = vector.shape_cast %804 : vector<1x2x64xf32> to vector<2x64xf32>
    %c5_349 = arith.constant 5 : index
    %c0_350 = arith.constant 0 : index
    %c0_351 = arith.constant 0 : index
    %806 = vector.load %arg12[%c5_349, %c0_350, %c0_351] : memref<8x2x64xf32, #tpu.memory_space<vmem>>, vector<1x2x64xf32>
    %807 = vector.shape_cast %806 : vector<1x2x64xf32> to vector<2x64xf32>
    %808 = arith.select %29, %805, %807 : vector<2x64xi1>, vector<2x64xf32>
    %c10_352 = arith.constant 10 : index
    %c0_353 = arith.constant 0 : index
    %809 = vector.load %arg13[%c10_352, %c0_353] : memref<16x64xf32, #tpu.memory_space<vmem>>, vector<2x64xf32>
    tpu.vector_store %arg13[%c10_352, %c0_353], %808 {strides = array<i32>} : memref<16x64xf32, #tpu.memory_space<vmem>>, vector<2x64xf32>,
    %c6_354 = arith.constant 6 : index
    %c0_355 = arith.constant 0 : index
    %c0_356 = arith.constant 0 : index
    %810 = vector.load %arg11[%c6_354, %c0_355, %c0_356] : memref<8x2x64xf32, #tpu.memory_space<vmem>>, vector<1x2x64xf32>
    %811 = vector.shape_cast %810 : vector<1x2x64xf32> to vector<2x64xf32>
    %c6_357 = arith.constant 6 : index
    %c0_358 = arith.constant 0 : index
    %c0_359 = arith.constant 0 : index
    %812 = vector.load %arg12[%c6_357, %c0_358, %c0_359] : memref<8x2x64xf32, #tpu.memory_space<vmem>>, vector<1x2x64xf32>
    %813 = vector.shape_cast %812 : vector<1x2x64xf32> to vector<2x64xf32>
    %814 = arith.select %29, %811, %813 : vector<2x64xi1>, vector<2x64xf32>
    %c12_360 = arith.constant 12 : index
    %c0_361 = arith.constant 0 : index
    %815 = vector.load %arg13[%c12_360, %c0_361] : memref<16x64xf32, #tpu.memory_space<vmem>>, vector<2x64xf32>
    tpu.vector_store %arg13[%c12_360, %c0_361], %814 {strides = array<i32>} : memref<16x64xf32, #tpu.memory_space<vmem>>, vector<2x64xf32>,
    %c7_362 = arith.constant 7 : index
    %c0_363 = arith.constant 0 : index
    %c0_364 = arith.constant 0 : index
    %816 = vector.load %arg11[%c7_362, %c0_363, %c0_364] : memref<8x2x64xf32, #tpu.memory_space<vmem>>, vector<1x2x64xf32>
    %817 = vector.shape_cast %816 : vector<1x2x64xf32> to vector<2x64xf32>
    %c7_365 = arith.constant 7 : index
    %c0_366 = arith.constant 0 : index
    %c0_367 = arith.constant 0 : index
    %818 = vector.load %arg12[%c7_365, %c0_366, %c0_367] : memref<8x2x64xf32, #tpu.memory_space<vmem>>, vector<1x2x64xf32>
    %819 = vector.shape_cast %818 : vector<1x2x64xf32> to vector<2x64xf32>
    %820 = arith.select %29, %817, %819 : vector<2x64xi1>, vector<2x64xf32>
    %c14_368 = arith.constant 14 : index
    %c0_369 = arith.constant 0 : index
    %821 = vector.load %arg13[%c14_368, %c0_369] : memref<16x64xf32, #tpu.memory_space<vmem>>, vector<2x64xf32>
    tpu.vector_store %arg13[%c14_368, %c0_369], %820 {strides = array<i32>} : memref<16x64xf32, #tpu.memory_space<vmem>>, vector<2x64xf32>,
    %c0_370 = arith.constant 0 : index
    %c0_371 = arith.constant 0 : index
    %822 = vector.load %arg13[%c0_370, %c0_371] : memref<16x64xf32, #tpu.memory_space<vmem>>, vector<16x64xf32>
    %823 = arith.truncf %822 : vector<16x64xf32> to vector<16x64xbf16>
    %c0_372 = arith.constant 0 : index
    %c0_373 = arith.constant 0 : index
    %824 = vector.load %arg7[%c0_372, %c0_373] : memref<64x128xbf16, #tpu.memory_space<vmem>>, vector<64x128xbf16>
    %cst_374 = arith.constant dense<0.000000e+00> : vector<16x128xf32>
    %825 = tpu.matmul %823, %824, %cst_374 {dimension_numbers = #tpu.dot_dimension_numbers<[1], [0], [0], [1], [0, 0, 1, 1], [], []>} : vector<16x64xbf16>, vector<64x128xbf16>, vector<16x128xf32> -> vector<16x128xf32>
    %c0_375 = arith.constant 0 : index
    %c0_376 = arith.constant 0 : index
    %826 = vector.load %arg8[%c0_375, %c0_376] : memref<1x128xf32, #tpu.memory_space<vmem>>, vector<1x128xf32>
    %827 = vector.broadcast %826 : vector<1x128xf32> to vector<16x128xf32>
    %828 = arith.addf %825, %827 : vector<16x128xf32>
    %c0_377 = arith.constant 0 : index
    %c0_378 = arith.constant 0 : index
    %829 = vector.load %arg9[%c0_377, %c0_378] : memref<16x128xf32, #tpu.memory_space<vmem>>, vector<16x128xf32>
    tpu.vector_store %arg9[%c0_377, %c0_378], %828 {strides = array<i32>} : memref<16x128xf32, #tpu.memory_space<vmem>>, vector<16x128xf32>,
    return
  }
}

</mosaic_0001>

<bundles_post_ra>
// kernel: bilstm_forward.1
= control target key start
LH: loop header
LB: loop body
LE: loop exit
PB: predicated region body
PF: predicated region fallthrough
CT: control target
= control target key end

     0   :  { %14 = vsyncpa [#allocation7], 0  ;;  %s3450_s0 = inlined_call_operand.vmem [shape: f32[16,16], index: 0, kind: input, shape index: {}]   ;;  %s3451_s1 = inlined_call_operand.hbm [shape: bf16[16,32], index: 1, kind: input, shape index: {}]   ;;  %s3452_s2 = inlined_call_operand.vmem [shape: f32[1,32], index: 2, kind: input, shape index: {}]   ;;  %s3453_s3 = inlined_call_operand.hbm [shape: bf16[32,256], index: 3, kind: input, shape index: {}]   ;;  %s3454_s4 = inlined_call_operand.vmem [shape: bf16[1,64,256], index: 4, kind: input, shape index: {}]   ;;  %s3455_s5 = inlined_call_operand.vmem [shape: bf16[2,64,256], index: 5, kind: input, shape index: {}]   ;;  %s3456_s6 = inlined_call_operand.vmem [shape: f32[2,1,256], index: 6, kind: input, shape index: {}]   ;;  %s3457_s7 = inlined_call_operand.vmem [shape: bf16[64,128], index: 7, kind: input, shape index: {}]   ;;  %s3458_s8 = inlined_call_operand.vmem [shape: f32[1,128], index: 8, kind: input, shape index: {}]   ;;  %s3459_s9 = inlined_call_operand.hbm [shape: f32[16,128], index: 9, kind: output, shape index: {}]  }
   0x1   :  { %15 = vsyncpa [#allocation10], 0 }
   0x2   :  { %16 = vsyncpa [#allocation8], 0  ;;  %s2817_s30 = smov [#allocation6]   ;;  %s2745_s13 = scalar_lea.hbm %s3451_s1, 128 }
   0x3   :  { %s24_s10 = sshll.u32 %s2817_s30, 4  ;;  %p2746_p0 = scmp.ne.s32.totalorder %s3451_s1, %s2745_s13  ;;  %s25_s10 = int_to_ptr.vmem [resolvable:$true] %s24_s10 }
   0x4   :  { %p2749_p1 = scmp.lt.u32.totalorder %s2745_s13, %s3451_s1 }
   0x6   :  { %p2751_p2 = pnand %p2749_p1, %p2746_p0 }
   0x8   :  { %2754 = shalt.err (!%p2751_p2)
}
   0x9   :  { %s2755_s18 = scalar_lea.vmem %s25_s10, 128  ;;  %p2760_p4 = scmp.lt.s32.totalorder %s25_s10, %s25_s10 }
   0xa   :  { %p2756_p3 = scmp.ne.s32.totalorder %s25_s10, %s2755_s18  ;;  %p2761_p5 = scmp.lt.s32.totalorder %s2755_s18, %s2755_s18 }
   0xc   :  { %p2762_p6 = por %p2761_p5, %p2760_p4 }
   0xe   :  { %p2763_p7 = pnand %p2762_p6, %p2756_p3 }
  0x10   :  { %2766 = shalt.err (!%p2763_p7)
}
  0x11   :  { %s2818_s19 = smov 64   ;;  %s2819_s20 = smov 4  }
  0x12   :  { %30 = dma.hbm_to_vmem [thread:$0]  %s3451_s1, 128, %s25_s10, [#allocation7], %s2818_s19, %s2818_s19, %s2819_s20  }
  0x13   :  { %s2820_s23 = smov [#allocation9]   ;;  %s2767_s27 = scalar_lea.hbm %s3453_s3, 512 }
  0x14   :  { %s38_s24 = sshll.u32 %s2820_s23, 4  ;;  %p2768_p8 = scmp.ne.s32.totalorder %s3453_s3, %s2767_s27  ;;  %s39_s24 = int_to_ptr.vmem [resolvable:$true] %s38_s24 }
  0x15   :  { %p2771_p9 = scmp.lt.u32.totalorder %s2767_s27, %s3453_s3 }
  0x17   :  { %p2773_p10 = pnand %p2771_p9, %p2768_p8 }
  0x19   :  { %2776 = shalt.err (!%p2773_p10)
}
  0x1a   :  { %s2777_s12 = scalar_lea.vmem %s39_s24, 512  ;;  %p2782_p12 = scmp.lt.s32.totalorder %s39_s24, %s39_s24 }
  0x1b   :  { %p2778_p11 = scmp.ne.s32.totalorder %s39_s24, %s2777_s12  ;;  %p2783_p13 = scmp.lt.s32.totalorder %s2777_s12, %s2777_s12 }
  0x1d   :  { %p2784_p0 = por %p2783_p13, %p2782_p12 }
  0x1f   :  { %p2785_p1 = pnand %p2784_p0, %p2778_p11 }
  0x21   :  { %2788 = shalt.err (!%p2785_p1)
}
  0x22   :  { %s2821_s1 = smov 128   ;;  %s2822_s10 = smov 8  }
  0x23   :  { %44 = dma.hbm_to_vmem [thread:$0]  %s3453_s3, 512, %s39_s24, [#allocation10], %s2821_s1, %s2821_s1, %s2822_s10  }
  0x24   :  { %2811 = dma.done.wait [#allocation7], 128  }
  0x25   :  { %2812 = vsyncadd [#allocation7], 4294967168 }
  0x26   :  { %2813 = dma.done.wait [#allocation10], 512  }
  0x27   :  { %2814 = vsyncadd [#allocation10], 4294966784  ;;  %v2823_v0 = vmov 0.0   ;;  %vm2824_vm0 = vmmov 0   ;;  %v2502_v1 = vld [vmem:[#allocation6] sm:$0xff]   ;;  %v62_v2 = vld [vmem:[%s3450_s0] sm:$0xff]  ;;  %v127_v33 = vlaneseq }
  0x28   :  { %2473 = vmatprep.subr.bf16.mxu0 %v2823_v0  ;;  %2475 = vmatprep.mubr.msk.bf16.mxu0 %vm2824_vm0, %v2823_v0  ;;  %v63_v3 = vld [vmem:[%s3450_s0 + $0x8] sm:$0xff]  ;;  %vm80_vm1 = vcmask 130048   ;;  %v2503_v5 = vld [vmem:[#allocation9 + $0x4] ss:$8 sps:$4 sm:$0xff]   ;;  %v2505_v6 = vld [vmem:[#allocation9] ss:$8 sps:$4 sm:$0xff]  }
  0x29   :  { %2474 = vmatpush3.bf16.msra.mxu0 %v2502_v1  ;;  %v64_v4 = vpack.c.bf16 %v63_v3, %v62_v2  ;;  %v2919_v7 = vld [vmem:[%s3455_s5 + $0x4] ss:$8 sps:$4 sm:$0xff]   ;;  %v2924_v8 = vld [vmem:[%s3455_s5] ss:$8 sps:$4 sm:$0xff]   ;;  %198 = vmatprep.subr.bf16.mxu1 %v2503_v5  ;;  %v2930_v10 = vld [vmem:[%s3455_s5 + $0x14] ss:$8 sps:$4 sm:$0xff]  }
  0x2a   :  { %v2509_v9 = vld [vmem:[#allocation9 + $0x14] ss:$8 sps:$4 sm:$0xff]   ;;  %421 = vmatprep.subr.bf16.mxu0 %v2919_v7  ;;  %199 = vmatpush1.bf16.msra.mxu1 %v2505_v6  ;;  %v2511_v11 = vld [vmem:[#allocation9 + $0x10] ss:$8 sps:$4 sm:$0xff]   ;;  %v2825_v13 = vmov 0   ;;  %vm194_vm2 = vcmask 261120  }
  0x2b   :  { %v2936_v12 = vld [vmem:[%s3455_s5 + $0x10] ss:$8 sps:$4 sm:$0xff]   ;;  %200 = vmatprep.subr.bf16.mxu1 %v2509_v9  ;;  %230 = vmatprep.mubr.bf16.mxu1 %v2825_v13  ;;  %v2946_v14 = vld [vmem:[%s3455_s5 + $0x24] ss:$8 sps:$4 sm:$0xff]   ;;  %v2951_v15 = vld [vmem:[%s3455_s5 + $0x20] ss:$8 sps:$4 sm:$0xff]  }
  0x2c   :  { %2476 = vmatmul.mubr.msk.bf16.vlgmr.msra.gmra.mrb[0].mxu0 %vm80_vm1, %v64_v4  ;;  %v2956_v16 = vld [vmem:[%s3455_s5 + $0x34] ss:$8 sps:$4 sm:$0xff]   ;;  %v2963_v17 = vld [vmem:[%s3455_s5 + $0x30] ss:$8 sps:$4 sm:$0xff]   ;;  %v2364_v18 = vld [vmem:[%s3452_s2] ss:$0 sm:$0xff] }
  0x2d   :  { %422 = vmatpush1.bf16.msra.mxu0 %v2924_v8  ;;  %453 = vmatprep.mubr.bf16.mxu0 %v2825_v13  ;;  %v2996_v34 = vshrl.u32 %v127_v33, 7  ;;  %v2998_v35 = vand.u32 127, %v127_v33  ;;  %v162_v37 = vld [vmem:[%s3456_s6] sm:$0x3]  ;;  %v2826_v40 = vmov 1983009808  }
  0x2e   :  { %423 = vmatprep.subr.bf16.mxu0 %v2930_v10  ;;  %201 = vmatpush1.bf16.msra.mxu1 %v2511_v11  ;;  %v271_v41 = vunpack.c.l.s4 %v2826_v40  ;;  %vm507_vm5 = vcmask 517120   ;;  %vm417_vm6 = vcmask 523264   ;;  %s2827_s13 = smov [#allocation11]  }
  0x2f   :  { %516 = vmatprep.subr.bf16.mxu1 %v2919_v7  ;;  %v166_v36 = vsub.s32 0, %v2996_v34  ;;  %v170_v38 = vsub.s32 1, %v2996_v34  ;;  %v129_v39 = vadd.s32 128, %v2998_v35  ;;  %v134_v43 = vand.u32 63, %v2998_v35  ;;  %s2351_s14 = sshll.u32 %s2827_s13, 4  ;;  %s2352_s14 = int_to_ptr.vmem [resolvable:$true] %s2351_s14 }
  0x30   :  { %v272_v47 = vunpack.c.0.s8 %v271_v41  ;;  %vm156_vm7 = vcmp.lt.s32.totalorder %v2998_v35, 32  ;;  %s2789_s15 = scalar_lea.vmem %s2352_s14, 256  ;;  %p2794_p3 = scmp.lt.s32.totalorder %s2352_s14, %s2352_s14 }
  0x31   :  { %424 = vmatpush1.bf16.msra.mxu0 %v2936_v12  ;;  %v167_v42 = vrot.slane %v162_v37, %v166_v36  ;;  %v171_v44 = vrot.slane %v162_v37, %v170_v38  ;;  %v141_v45 = vand.u32 63, %v129_v39  ;;  %vm3011_vm3 = vcmp.lt.s32.totalorder %v134_v43, 32  ;;  %p2790_p2 = scmp.ne.s32.totalorder %s2352_s14, %s2789_s15  ;;  %p2795_p4 = scmp.lt.s32.totalorder %s2789_s15, %s2789_s15 }
  0x32   :  { %425 = vmatprep.subr.bf16.mxu0 %v2946_v14  ;;  %v3020_v58 = vsub.s32 %v272_v47, %v2996_v34 }
  0x33   :  { %vm3015_vm4 = vcmp.lt.s32.totalorder %v141_v45, 32  ;;  %p2796_p5 = por %p2795_p4, %p2794_p3 }
  0x35   :  { %426 = vmatpush1.bf16.msra.mxu0 %v2951_v15  ;;  %p2797_p6 = pnand %p2796_p5, %p2790_p2 }
  0x36   :  { %427 = vmatprep.subr.bf16.mxu0 %v2956_v16 }
  0x39   :  { %428 = vmatpush1.bf16.msra.mxu0 %v2963_v17 }
  0x3a   :  { %611 = vmatprep.subr.bf16.mxu0 %v2919_v7 }
  0x3c   :  { %454 = vmatmul.mubr.bf16.vlgmr.msra.gmra.mrb[4].mxu0 %v2825_v13 }
  0x3d   :  { %612 = vmatpush1.bf16.msra.mxu0 %v2924_v8  ;;  %643 = vmatprep.mubr.bf16.mxu0 %v2825_v13 }
  0x3e   :  { %613 = vmatprep.subr.bf16.mxu0 %v2930_v10 }
  0x41   :  { %614 = vmatpush1.bf16.msra.mxu0 %v2936_v12 }
  0x42   :  { %615 = vmatprep.subr.bf16.mxu0 %v2946_v14 }
  0x45   :  { %616 = vmatpush1.bf16.msra.mxu0 %v2951_v15 }
  0x46   :  { %617 = vmatprep.subr.bf16.mxu0 %v2956_v16 }
  0x49   :  { %618 = vmatpush1.bf16.msra.mxu0 %v2963_v17 }
  0x4a   :  { %801 = vmatprep.subr.bf16.mxu0 %v2919_v7 }
  0xff   :  { %v118_v19 = vpop.f32.mrb[0].mxu0 }
 0x100   :  { %v119_v20 = vadd.f32 %v2364_v18, %v118_v19  ;;  %v2477_v21 = vpop.f32.mrb[1].mxu0 }
 0x101   :  { %v121_v22 = vpop.f32.mrb[2].mxu0 }
 0x102   :  { %v122_v23 = vadd.f32 %v2364_v18, %v121_v22  ;;  %v2478_v24 = vpop.f32.mrb[3].mxu0  ;;  %2549 = vtanh.f32 %v119_v20 }
 0x104   :  { %2551 = vtanh.f32 %v122_v23 }
 0x10c   :  { %v2550_v25 = vpop.eup %2549 }
 0x10e   :  { %v2552_v26 = vpop.eup %2551 }
 0x10f   :  { %v157_v27 = vpack.c.bf16 %v2552_v26, %v2550_v25  ;;  %v2990_v28 = vpop.f32.mrb[4].mxu0 }
 0x110   :  { %v2992_v29 = vpop.f32.mrb[5].mxu0 }
 0x111   :  { %2371 = vmatmul.mubr.msk.bf16.vlgmr.msra.gmra.mrb[0].mxu1 %vm194_vm2, %v157_v27  ;;  %v459_v30 = vpop.f32.mrb[6].mxu0  ;;  %v464_v32 = vcombine.low %v2990_v28, %v2992_v29 }
 0x112   :  { %517 = vmatpush1.bf16.msra.mxu1 %v2924_v8  ;;  %548 = vmatprep.mubr.bf16.mxu1 %v2825_v13  ;;  %v460_v31 = vpop.f32.mrb[7].mxu0 }
 0x113   :  { %518 = vmatprep.subr.bf16.mxu1 %v2930_v10  ;;  %v471_v43 = vrot.slane %v464_v32, %v3020_v58 }
 0x116   :  { %519 = vmatpush1.bf16.msra.mxu1 %v2936_v12 }
 0x117   :  { %520 = vmatprep.subr.bf16.mxu1 %v2946_v14 }
 0x11a   :  { %521 = vmatpush1.bf16.msra.mxu1 %v2951_v15 }
 0x11b   :  { %522 = vmatprep.subr.bf16.mxu1 %v2956_v16 }
 0x11e   :  { %523 = vmatpush1.bf16.msra.mxu1 %v2963_v17 }
 0x11f   :  { %706 = vmatprep.subr.bf16.mxu1 %v2919_v7 }
 0x1e4   :  { %v232_v46 = vpop.f32.mrb[0].mxu1 }
 0x1e5   :  { %v233_v48 = vadd.f32 %v232_v46, %v167_v42  ;;  %v234_v49 = vpop.f32.mrb[1].mxu1 }
 0x1e6   :  { %v235_v51 = vadd.f32 %v234_v49, %v171_v44  ;;  %v236_v52 = vpop.f32.mrb[2].mxu1 }
 0x1e7   :  { %v306_v54 = vrot.slane %v233_v48, 6  ;;  %v325_v55 = vrot.slane %v233_v48, 2  ;;  %v237_v56 = vadd.f32 %v236_v52, %v167_v42  ;;  %v238_v57 = vpop.f32.mrb[3].mxu1 }
 0x1e8   :  { %v307_v59 = vrot.slane %v235_v51, 6  ;;  %v326_v60 = vrot.slane %v235_v51, 2  ;;  %v239_v61 = vadd.f32 %v238_v57, %v171_v44 }
 0x1e9   :  { %v243_v62 = vrot.slane %v237_v56, 6  ;;  %v261_v63 = vrot.slane %v237_v56, 2  ;;  %v310_v1 = vsel %vm3011_vm3, %v237_v56, %v306_v54  ;;  %v329_v2 = vsel %vm3011_vm3, %v237_v56, %v325_v55 }
 0x1ea   :  { %v244_v3 = vrot.slane %v239_v61, 6  ;;  %v262_v4 = vrot.slane %v239_v61, 2  ;;  %v311_v5 = vsel %vm3015_vm4, %v239_v61, %v307_v59  ;;  %v330_v6 = vsel %vm3015_vm4, %v239_v61, %v326_v60 }
 0x1eb   :  { %v247_v9 = vsel %vm3011_vm3, %v233_v48, %v243_v62  ;;  %v265_v11 = vsel %vm3011_vm3, %v233_v48, %v261_v63  ;;  %v314_v18 = vcombine.low %v310_v1, %v311_v5  ;;  %v333_v19 = vcombine.low %v329_v2, %v330_v6 }
 0x1ec   :  { %v248_v20 = vsel %vm3015_vm4, %v235_v51, %v244_v3  ;;  %v266_v21 = vsel %vm3015_vm4, %v235_v51, %v262_v4  ;;  %v345_v22 = vcombine.high %v310_v1, %v311_v5  ;;  %v356_v23 = vcombine.high %v329_v2, %v330_v6 }
 0x1ed   :  { %v251_v24 = vcombine.low %v247_v9, %v248_v20  ;;  %v269_v25 = vcombine.low %v265_v11, %v266_v21  ;;  %v281_v26 = vcombine.high %v247_v9, %v248_v20  ;;  %v292_v27 = vcombine.high %v265_v11, %v266_v21  ;;  %2374 = vst.sshfl [vmem:[#allocation2 + $0x10] sm:$0x33 pattern:$0x76325410] %v314_v18 }
 0x1ee   :  { %v340_v30 = vrot.slane %v333_v19, %v3020_v58  ;;  %2375 = vst.sshfl [vmem:[#allocation2 + $0x18] sm:$0x33 pattern:$0x76325410] %v345_v22  ;;  %v363_v31 = vrot.slane %v356_v23, %v3020_v58 }
 0x1ef   :  { %2372 = vst.sshfl [vmem:[#allocation2] sm:$0x33 pattern:$0x76325410] %v251_v24  ;;  %v276_v33 = vrot.slane %v269_v25, %v3020_v58  ;;  %v299_v37 = vrot.slane %v292_v27, %v3020_v58 }
 0x1f0   :  { %2373 = vst.sshfl [vmem:[#allocation2 + $0x8] sm:$0x33 pattern:$0x76325410] %v281_v26  ;;  %v341_v39 = vcombine.high %v340_v30, %v340_v30  ;;  %v364_v40 = vcombine.high %v363_v31, %v363_v31 }
 0x1f1   :  { %v277_v41 = vcombine.high %v276_v33, %v276_v33  ;;  %v300_v42 = vcombine.high %v299_v37, %v299_v37 }
 0x1f2   :  { %344 = vst [vmem:[#allocation2 + $0x14] sm:$0xf] %v341_v39  ;;  %367 = vst [vmem:[#allocation2 + $0x1c] sm:$0xf] %v364_v40 }
 0x1f3   :  { %280 = vst [vmem:[#allocation2 + $0x4] sm:$0xf] %v277_v41  ;;  %303 = vst [vmem:[#allocation2 + $0xc] sm:$0xf] %v300_v42 }
 0x1f6   :  { %v376_v44 = vld [vmem:[#allocation2] sm:$0xf] }
 0x1f7   :  { %v473_v45 = vadd.f32 %v471_v43, %v376_v44 }
 0x1f9   :  { %v2384_v46 = vmul.f32 -1.442695, %v473_v45  ;;  %v481_v47 = vrot.slane %v473_v45, 2 }
 0x1fa   :  { %v511_v18 = vld [vmem:[#allocation2 + $0x4] sm:$0xf] }
 0x1fb   :  { %2553 = vpow2.f32 %v2384_v46 }
 0x1fc   :  { %2555 = vtanh.f32 %v481_v47 }
 0x205   :  { %v2554_v48 = vpop.eup %2553 }
 0x206   :  { %v477_v49 = vadd.f32 1.0, %v2554_v48  ;;  %v2556_v51 = vpop.eup %2555 }
 0x208   :  { %2557 = vrcp.f32 %v477_v49 }
 0x212   :  { %v2558_v52 = vpop.eup %2557 }
 0x213   :  { %v495_v54 = vmul.f32 %v2558_v52, %v2556_v51  ;;  %v494_v55 = vmul.f32 0.0, %v2558_v52 }
 0x215   :  { %497 = vrot.lane.b32.xlu0 %v495_v54, %s2818_s19 }
 0x219   :  { %484 = vrot.lane.b32.xlu0 %v473_v45, %s2818_s19 }
 0x287   :  { %v498_v56 = vpop.permute.xlu0 %497 }
 0x288   :  { %v500_v28 = vadd.f32 %v498_v56, %v494_v55  ;;  %v606_v55 = vld [vmem:[#allocation2 + $0x8] sm:$0xf] }
 0x28a   :  { %2559 = vtanh.f32 %v500_v28 }
 0x28b   :  { %v485_v32 = vpop.permute.xlu0 %484 }
 0x28c   :  { %v486_v57 = vrot.slane %v485_v32, 2 }
 0x28e   :  { %v2385_v59 = vmul.f32 -1.442695, %v486_v57 }
 0x290   :  { %2561 = vpow2.f32 %v2385_v59 }
 0x294   :  { %v2560_v29 = vpop.eup %2559 }
 0x295   :  { %503 = vrot.lane.b32.xlu1 %v2560_v29, %s2818_s19 }
 0x29a   :  { %v2562_v60 = vpop.eup %2561 }
 0x29b   :  { %v491_v61 = vadd.f32 1.0, %v2562_v60 }
 0x29d   :  { %2563 = vrcp.f32 %v491_v61 }
 0x2a7   :  { %v2564_v62 = vpop.eup %2563 }
 0x307   :  { %v504_v63 = vpop.permute.xlu1 %503 }
 0x308   :  { %v506_v1 = vmul.f32 %v2564_v62, %v504_v63 }
 0x30a   :  { %508 = vst.msk [vmem:[#allocation3] sm:$0x3] %vm507_vm5, %v506_v1  ;;  %510 = vst.msk [vmem:[#allocation4 + $0xe] sm:$0x3] %vm507_vm5, %v506_v1  ;;  %v512_v2 = vpack.c.bf16 %v506_v1, %v506_v1 }
 0x30c   :  { %2386 = vmatmul.mubr.msk.bf16.vlgmr.msra.gmra.mrb[4].mxu1 %vm417_vm6, %v512_v2 }
 0x30d   :  { %707 = vmatpush1.bf16.msra.mxu1 %v2924_v8  ;;  %738 = vmatprep.mubr.bf16.mxu1 %v2825_v13 }
 0x30e   :  { %708 = vmatprep.subr.bf16.mxu1 %v2930_v10 }
 0x311   :  { %709 = vmatpush1.bf16.msra.mxu1 %v2936_v12 }
 0x312   :  { %710 = vmatprep.subr.bf16.mxu1 %v2946_v14 }
 0x315   :  { %711 = vmatpush1.bf16.msra.mxu1 %v2951_v15 }
 0x316   :  { %712 = vmatprep.subr.bf16.mxu1 %v2956_v16 }
 0x319   :  { %713 = vmatpush1.bf16.msra.mxu1 %v2963_v17 }
 0x31a   :  { %896 = vmatprep.subr.bf16.mxu1 %v2919_v7 }
 0x3df   :  { %v550_v3 = vpop.f32.mrb[4].mxu1 }
 0x3e0   :  { %v552_v4 = vpop.f32.mrb[5].mxu1 }
 0x3e1   :  { %v559_v5 = vcombine.low %v550_v3, %v552_v4  ;;  %v554_v6 = vpop.f32.mrb[6].mxu1 }
 0x3e2   :  { %v555_v9 = vpop.f32.mrb[7].mxu1 }
 0x3e3   :  { %v566_v11 = vrot.slane %v559_v5, %v3020_v58 }
 0x3e5   :  { %v568_v19 = vadd.f32 %v566_v11, %v511_v18 }
 0x3e7   :  { %579 = vrot.lane.b32.xlu0 %v568_v19, %s2818_s19  ;;  %v2387_v20 = vmul.f32 -1.442695, %v568_v19  ;;  %v576_v21 = vrot.slane %v568_v19, 2 }
 0x3e9   :  { %2565 = vpow2.f32 %v2387_v20 }
 0x3ea   :  { %2567 = vtanh.f32 %v576_v21 }
 0x3f3   :  { %v2566_v22 = vpop.eup %2565 }
 0x3f4   :  { %v572_v23 = vadd.f32 1.0, %v2566_v22  ;;  %v2568_v24 = vpop.eup %2567 }
 0x3f6   :  { %2569 = vrcp.f32 %v572_v23 }
 0x400   :  { %v2570_v25 = vpop.eup %2569 }
 0x401   :  { %v590_v26 = vmul.f32 %v2570_v25, %v2568_v24  ;;  %v589_v27 = vmul.f32 %v2570_v25, %v500_v28 }
 0x403   :  { %592 = vrot.lane.b32.xlu1 %v590_v26, %s2818_s19 }
 0x459   :  { %v580_v37 = vpop.permute.xlu0 %579 }
 0x45a   :  { %v581_v39 = vrot.slane %v580_v37, 2 }
 0x45c   :  { %v2388_v40 = vmul.f32 -1.442695, %v581_v39 }
 0x475   :  { %v593_v30 = vpop.permute.xlu1 %592 }
 0x476   :  { %v595_v31 = vadd.f32 %v593_v30, %v589_v27  ;;  %v701_v27 = vld [vmem:[#allocation2 + $0xc] sm:$0xf] }
 0x478   :  { %2571 = vtanh.f32 %v595_v31 }
 0x479   :  { %2573 = vpow2.f32 %v2388_v40 }
 0x482   :  { %v2572_v33 = vpop.eup %2571 }
 0x483   :  { %598 = vrot.lane.b32.xlu1 %v2572_v33, %s2818_s19  ;;  %v2574_v41 = vpop.eup %2573 }
 0x484   :  { %v586_v42 = vadd.f32 1.0, %v2574_v41 }
 0x486   :  { %2575 = vrcp.f32 %v586_v42 }
 0x490   :  { %v2576_v43 = vpop.eup %2575 }
 0x4f5   :  { %v599_v44 = vpop.permute.xlu1 %598 }
 0x4f6   :  { %v601_v45 = vmul.f32 %v2576_v43, %v599_v44 }
 0x4f8   :  { %603 = vst.msk [vmem:[#allocation3 + $0x2] sm:$0x3] %vm507_vm5, %v601_v45  ;;  %605 = vst.msk [vmem:[#allocation4 + $0xc] sm:$0x3] %vm507_vm5, %v601_v45  ;;  %v607_v46 = vpack.c.bf16 %v601_v45, %v601_v45 }
 0x4fa   :  { %2389 = vmatmul.mubr.msk.bf16.vlgmr.msra.gmra.mrb[8].mxu0 %vm417_vm6, %v607_v46 }
 0x4fb   :  { %802 = vmatpush1.bf16.msra.mxu0 %v2924_v8  ;;  %833 = vmatprep.mubr.bf16.mxu0 %v2825_v13 }
 0x4fc   :  { %803 = vmatprep.subr.bf16.mxu0 %v2930_v10 }
 0x4ff   :  { %804 = vmatpush1.bf16.msra.mxu0 %v2936_v12 }
 0x500   :  { %805 = vmatprep.subr.bf16.mxu0 %v2946_v14 }
 0x503   :  { %806 = vmatpush1.bf16.msra.mxu0 %v2951_v15 }
 0x504   :  { %807 = vmatprep.subr.bf16.mxu0 %v2956_v16 }
 0x507   :  { %808 = vmatpush1.bf16.msra.mxu0 %v2963_v17 }
 0x508   :  { %991 = vmatprep.subr.bf16.mxu0 %v2919_v7 }
 0x5cd   :  { %v645_v47 = vpop.f32.mrb[8].mxu0 }
 0x5ce   :  { %v647_v48 = vpop.f32.mrb[9].mxu0 }
 0x5cf   :  { %v654_v49 = vcombine.low %v645_v47, %v647_v48  ;;  %v649_v51 = vpop.f32.mrb[10].mxu0 }
 0x5d0   :  { %v650_v52 = vpop.f32.mrb[11].mxu0 }
 0x5d1   :  { %v661_v54 = vrot.slane %v654_v49, %v3020_v58 }
 0x5d3   :  { %v663_v56 = vadd.f32 %v661_v54, %v606_v55 }
 0x5d5   :  { %674 = vrot.lane.b32.xlu1 %v663_v56, %s2818_s19  ;;  %v2390_v28 = vmul.f32 -1.442695, %v663_v56  ;;  %v671_v29 = vrot.slane %v663_v56, 2 }
 0x5d7   :  { %2577 = vpow2.f32 %v2390_v28 }
 0x5d8   :  { %2579 = vtanh.f32 %v671_v29 }
 0x5e1   :  { %v2578_v32 = vpop.eup %2577 }
 0x5e2   :  { %v667_v57 = vadd.f32 1.0, %v2578_v32  ;;  %v2580_v59 = vpop.eup %2579 }
 0x5e4   :  { %2581 = vrcp.f32 %v667_v57 }
 0x5ee   :  { %v2582_v60 = vpop.eup %2581 }
 0x5ef   :  { %v685_v61 = vmul.f32 %v2582_v60, %v2580_v59  ;;  %v684_v62 = vmul.f32 %v2582_v60, %v595_v31 }
 0x5f1   :  { %687 = vrot.lane.b32.xlu0 %v685_v61, %s2818_s19  ;;  %v796_v61 = vld [vmem:[#allocation2 + $0x10] sm:$0xf] }
 0x647   :  { %v675_v3 = vpop.permute.xlu1 %674 }
 0x648   :  { %v676_v4 = vrot.slane %v675_v3, 2 }
 0x64a   :  { %v2391_v5 = vmul.f32 -1.442695, %v676_v4 }
 0x663   :  { %v688_v63 = vpop.permute.xlu0 %687 }
 0x664   :  { %v690_v1 = vadd.f32 %v688_v63, %v684_v62 }
 0x666   :  { %2583 = vtanh.f32 %v690_v1 }
 0x667   :  { %2585 = vpow2.f32 %v2391_v5 }
 0x670   :  { %v2584_v2 = vpop.eup %2583 }
 0x671   :  { %693 = vrot.lane.b32.xlu0 %v2584_v2, %s2818_s19  ;;  %v2586_v6 = vpop.eup %2585 }
 0x672   :  { %v681_v9 = vadd.f32 1.0, %v2586_v6 }
 0x674   :  { %2587 = vrcp.f32 %v681_v9 }
 0x67e   :  { %v2588_v11 = vpop.eup %2587 }
 0x6e3   :  { %v694_v18 = vpop.permute.xlu0 %693 }
 0x6e4   :  { %v696_v19 = vmul.f32 %v2588_v11, %v694_v18 }
 0x6e6   :  { %698 = vst.msk [vmem:[#allocation3 + $0x4] sm:$0x3] %vm507_vm5, %v696_v19  ;;  %700 = vst.msk [vmem:[#allocation4 + $0xa] sm:$0x3] %vm507_vm5, %v696_v19  ;;  %v702_v20 = vpack.c.bf16 %v696_v19, %v696_v19 }
 0x6e8   :  { %2392 = vmatmul.mubr.msk.bf16.vlgmr.msra.gmra.mrb[8].mxu1 %vm417_vm6, %v702_v20 }
 0x6e9   :  { %897 = vmatpush1.bf16.msra.mxu1 %v2924_v8  ;;  %928 = vmatprep.mubr.bf16.mxu1 %v2825_v13 }
 0x6ea   :  { %898 = vmatprep.subr.bf16.mxu1 %v2930_v10 }
 0x6ed   :  { %899 = vmatpush1.bf16.msra.mxu1 %v2936_v12 }
 0x6ee   :  { %900 = vmatprep.subr.bf16.mxu1 %v2946_v14 }
 0x6f1   :  { %901 = vmatpush1.bf16.msra.mxu1 %v2951_v15 }
 0x6f2   :  { %902 = vmatprep.subr.bf16.mxu1 %v2956_v16 }
 0x6f5   :  { %903 = vmatpush1.bf16.msra.mxu1 %v2963_v17 }
 0x6f6   :  { %1086 = vmatprep.subr.bf16.mxu1 %v2919_v7 }
 0x7bb   :  { %v740_v21 = vpop.f32.mrb[8].mxu1 }
 0x7bc   :  { %v742_v22 = vpop.f32.mrb[9].mxu1 }
 0x7bd   :  { %v749_v23 = vcombine.low %v740_v21, %v742_v22  ;;  %v744_v24 = vpop.f32.mrb[10].mxu1 }
 0x7be   :  { %v745_v25 = vpop.f32.mrb[11].mxu1 }
 0x7bf   :  { %v756_v26 = vrot.slane %v749_v23, %v3020_v58 }
 0x7c1   :  { %v758_v30 = vadd.f32 %v756_v26, %v701_v27 }
 0x7c3   :  { %769 = vrot.lane.b32.xlu0 %v758_v30, %s2818_s19  ;;  %v2393_v31 = vmul.f32 -1.442695, %v758_v30  ;;  %v766_v33 = vrot.slane %v758_v30, 2 }
 0x7c5   :  { %2589 = vpow2.f32 %v2393_v31 }
 0x7c6   :  { %2591 = vtanh.f32 %v766_v33 }
 0x7cf   :  { %v2590_v37 = vpop.eup %2589 }
 0x7d0   :  { %v762_v39 = vadd.f32 1.0, %v2590_v37  ;;  %v2592_v40 = vpop.eup %2591 }
 0x7d2   :  { %2593 = vrcp.f32 %v762_v39 }
 0x7dc   :  { %v2594_v7 = vpop.eup %2593 }
 0x7dd   :  { %v780_v41 = vmul.f32 %v2594_v7, %v2592_v40  ;;  %v779_v42 = vmul.f32 %v2594_v7, %v690_v1 }
 0x7df   :  { %782 = vrot.lane.b32.xlu1 %v780_v41, %s2818_s19 }
 0x835   :  { %v770_v46 = vpop.permute.xlu0 %769 }
 0x836   :  { %v771_v47 = vrot.slane %v770_v46, 2 }
 0x838   :  { %v2394_v48 = vmul.f32 -1.442695, %v771_v47 }
 0x851   :  { %v783_v43 = vpop.permute.xlu1 %782 }
 0x852   :  { %v785_v44 = vadd.f32 %v783_v43, %v779_v42 }
 0x854   :  { %2595 = vtanh.f32 %v785_v44 }
 0x855   :  { %2597 = vpow2.f32 %v2394_v48 }
 0x85e   :  { %v2596_v45 = vpop.eup %2595 }
 0x85f   :  { %788 = vrot.lane.b32.xlu1 %v2596_v45, %s2818_s19  ;;  %v2598_v49 = vpop.eup %2597 }
 0x860   :  { %v776_v51 = vadd.f32 1.0, %v2598_v49 }
 0x862   :  { %2599 = vrcp.f32 %v776_v51 }
 0x86c   :  { %v2600_v52 = vpop.eup %2599 }
 0x8d1   :  { %v789_v54 = vpop.permute.xlu1 %788 }
 0x8d2   :  { %v791_v55 = vmul.f32 %v2600_v52, %v789_v54 }
 0x8d4   :  { %793 = vst.msk [vmem:[#allocation3 + $0x6] sm:$0x3] %vm507_vm5, %v791_v55  ;;  %795 = vst.msk [vmem:[#allocation4 + $0x8] sm:$0x3] %vm507_vm5, %v791_v55  ;;  %v797_v56 = vpack.c.bf16 %v791_v55, %v791_v55 }
 0x8d6   :  { %2395 = vmatmul.mubr.msk.bf16.vlgmr.msra.gmra.mrb[12].mxu0 %vm417_vm6, %v797_v56 }
 0x8d7   :  { %992 = vmatpush1.bf16.msra.mxu0 %v2924_v8  ;;  %1023 = vmatprep.mubr.bf16.mxu0 %v2825_v13 }
 0x8d8   :  { %993 = vmatprep.subr.bf16.mxu0 %v2930_v10 }
 0x8db   :  { %994 = vmatpush1.bf16.msra.mxu0 %v2936_v12  ;;  %v1187_v31 = vld [vmem:[#allocation3 + $0x6] sm:$0x3]  ;;  %v1192_v33 = vld [vmem:[#allocation4 + $0x8] sm:$0x3] }
 0x8dc   :  { %995 = vmatprep.subr.bf16.mxu0 %v2946_v14 }
 0x8df   :  { %996 = vmatpush1.bf16.msra.mxu0 %v2951_v15 }
 0x8e0   :  { %997 = vmatprep.subr.bf16.mxu0 %v2956_v16 }
 0x8e3   :  { %998 = vmatpush1.bf16.msra.mxu0 %v2963_v17 }
 0x9a9   :  { %v835_v28 = vpop.f32.mrb[12].mxu0 }
 0x9aa   :  { %v837_v29 = vpop.f32.mrb[13].mxu0 }
 0x9ab   :  { %v844_v32 = vcombine.low %v835_v28, %v837_v29  ;;  %v839_v57 = vpop.f32.mrb[14].mxu0 }
 0x9ac   :  { %v840_v59 = vpop.f32.mrb[15].mxu0 }
 0x9ad   :  { %v851_v60 = vrot.slane %v844_v32, %v3020_v58 }
 0x9af   :  { %v853_v62 = vadd.f32 %v851_v60, %v796_v61 }
 0x9b1   :  { %864 = vrot.lane.b32.xlu1 %v853_v62, %s2818_s19  ;;  %v2396_v63 = vmul.f32 -1.442695, %v853_v62  ;;  %v861_v1 = vrot.slane %v853_v62, 2  ;;  %v1183_v62 = vld [vmem:[#allocation3 + $0x4] sm:$0x3] }
 0x9b3   :  { %2601 = vpow2.f32 %v2396_v63  ;;  %v1196_v63 = vld [vmem:[#allocation4 + $0xa] sm:$0x3] }
 0x9b4   :  { %2603 = vtanh.f32 %v861_v1 }
 0x9bd   :  { %v2602_v2 = vpop.eup %2601 }
 0x9be   :  { %v857_v3 = vadd.f32 1.0, %v2602_v2  ;;  %v2604_v4 = vpop.eup %2603 }
 0x9c0   :  { %2605 = vrcp.f32 %v857_v3 }
 0x9ca   :  { %v2606_v5 = vpop.eup %2605 }
 0x9cb   :  { %v875_v6 = vmul.f32 %v2606_v5, %v2604_v4  ;;  %v874_v9 = vmul.f32 %v2606_v5, %v785_v44  ;;  %v891_v44 = vld [vmem:[#allocation2 + $0x14] sm:$0xf] }
 0x9cd   :  { %877 = vrot.lane.b32.xlu0 %v875_v6, %s2818_s19 }
 0xa23   :  { %v865_v20 = vpop.permute.xlu1 %864 }
 0xa24   :  { %v866_v21 = vrot.slane %v865_v20, 2  ;;  %v986_v20 = vld [vmem:[#allocation2 + $0x18] sm:$0xf] }
 0xa26   :  { %v2397_v22 = vmul.f32 -1.442695, %v866_v21 }
 0xa3f   :  { %v878_v11 = vpop.permute.xlu0 %877 }
 0xa40   :  { %v880_v18 = vadd.f32 %v878_v11, %v874_v9 }
 0xa42   :  { %2607 = vtanh.f32 %v880_v18 }
 0xa43   :  { %2609 = vpow2.f32 %v2397_v22 }
 0xa4c   :  { %v2608_v19 = vpop.eup %2607 }
 0xa4d   :  { %883 = vrot.lane.b32.xlu0 %v2608_v19, %s2818_s19  ;;  %v2610_v23 = vpop.eup %2609 }
 0xa4e   :  { %v871_v24 = vadd.f32 1.0, %v2610_v23 }
 0xa50   :  { %2611 = vrcp.f32 %v871_v24 }
 0xa5a   :  { %v2612_v25 = vpop.eup %2611 }
 0xabf   :  { %v884_v26 = vpop.permute.xlu0 %883 }
 0xac0   :  { %v886_v27 = vmul.f32 %v2612_v25, %v884_v26 }
 0xac2   :  { %888 = vst.msk [vmem:[#allocation3 + $0x8] sm:$0x3] %vm507_vm5, %v886_v27  ;;  %890 = vst.msk [vmem:[#allocation4 + $0x6] sm:$0x3] %vm507_vm5, %v886_v27  ;;  %v892_v30 = vpack.c.bf16 %v886_v27, %v886_v27 }
 0xac4   :  { %2398 = vmatmul.mubr.msk.bf16.vlgmr.msra.gmra.mrb[12].mxu1 %vm417_vm6, %v892_v30 }
 0xac5   :  { %1087 = vmatpush1.bf16.msra.mxu1 %v2924_v8  ;;  %1118 = vmatprep.mubr.bf16.mxu1 %v2825_v13 }
 0xac6   :  { %1088 = vmatprep.subr.bf16.mxu1 %v2930_v10 }
 0xac9   :  { %v1188_v37 = vld [vmem:[#allocation4 + $0x6] sm:$0x3]  ;;  %v1191_v39 = vld [vmem:[#allocation3 + $0x8] sm:$0x3]  ;;  %1089 = vmatpush1.bf16.msra.mxu1 %v2936_v12 }
 0xaca   :  { %v1189_v40 = vsel %vm156_vm7, %v1187_v31, %v1188_v37  ;;  %v1193_v7 = vsel %vm156_vm7, %v1191_v39, %v1192_v33  ;;  %1090 = vmatprep.subr.bf16.mxu1 %v2946_v14 }
 0xacb   :  { %1190 = vst.msk [vmem:[#allocation5 + $0x6] sm:$0x3] %vm507_vm5, %v1189_v40  ;;  %1194 = vst.msk [vmem:[#allocation5 + $0x8] sm:$0x3] %vm507_vm5, %v1193_v7 }
 0xacd   :  { %1091 = vmatpush1.bf16.msra.mxu1 %v2951_v15 }
 0xace   :  { %1092 = vmatprep.subr.bf16.mxu1 %v2956_v16 }
 0xad1   :  { %1093 = vmatpush1.bf16.msra.mxu1 %v2963_v17 }
 0xb97   :  { %v930_v8 = vpop.f32.mrb[12].mxu1 }
 0xb98   :  { %v932_v10 = vpop.f32.mrb[13].mxu1 }
 0xb99   :  { %v939_v12 = vcombine.low %v930_v8, %v932_v10  ;;  %v934_v41 = vpop.f32.mrb[14].mxu1 }
 0xb9a   :  { %v935_v42 = vpop.f32.mrb[15].mxu1 }
 0xb9b   :  { %v946_v43 = vrot.slane %v939_v12, %v3020_v58 }
 0xb9d   :  { %v948_v45 = vadd.f32 %v946_v43, %v891_v44 }
 0xb9f   :  { %959 = vrot.lane.b32.xlu0 %v948_v45, %s2818_s19  ;;  %v2399_v14 = vmul.f32 -1.442695, %v948_v45  ;;  %v956_v46 = vrot.slane %v948_v45, 2  ;;  %v1179_v45 = vld [vmem:[#allocation3 + $0x2] sm:$0x3] }
 0xba1   :  { %2613 = vpow2.f32 %v2399_v14  ;;  %v1200_v14 = vld [vmem:[#allocation4 + $0xc] sm:$0x3] }
 0xba2   :  { %2615 = vtanh.f32 %v956_v46 }
 0xbab   :  { %v2614_v47 = vpop.eup %2613 }
 0xbac   :  { %v952_v15 = vadd.f32 1.0, %v2614_v47  ;;  %v2616_v16 = vpop.eup %2615 }
 0xbae   :  { %2617 = vrcp.f32 %v952_v15 }
 0xbb8   :  { %v2618_v17 = vpop.eup %2617 }
 0xbb9   :  { %v970_v48 = vmul.f32 %v2618_v17, %v2616_v16  ;;  %v969_v49 = vmul.f32 %v2618_v17, %v880_v18 }
 0xbbb   :  { %972 = vrot.lane.b32.xlu1 %v970_v48, %s2818_s19 }
 0xc11   :  { %v960_v55 = vpop.permute.xlu0 %959 }
 0xc12   :  { %v961_v56 = vrot.slane %v960_v55, 2  ;;  %v1081_v55 = vld [vmem:[#allocation2 + $0x1c] sm:$0xf] }
 0xc14   :  { %v2400_v28 = vmul.f32 -1.442695, %v961_v56 }
 0xc2d   :  { %v973_v51 = vpop.permute.xlu1 %972 }
 0xc2e   :  { %v975_v52 = vadd.f32 %v973_v51, %v969_v49 }
 0xc30   :  { %2619 = vtanh.f32 %v975_v52 }
 0xc31   :  { %2621 = vpow2.f32 %v2400_v28 }
 0xc3a   :  { %v2620_v54 = vpop.eup %2619 }
 0xc3b   :  { %978 = vrot.lane.b32.xlu1 %v2620_v54, %s2818_s19  ;;  %v2622_v29 = vpop.eup %2621 }
 0xc3c   :  { %v966_v32 = vadd.f32 1.0, %v2622_v29 }
 0xc3e   :  { %2623 = vrcp.f32 %v966_v32 }
 0xc48   :  { %v2624_v57 = vpop.eup %2623 }
 0xcad   :  { %v979_v59 = vpop.permute.xlu1 %978 }
 0xcae   :  { %v981_v60 = vmul.f32 %v2624_v57, %v979_v59 }
 0xcb0   :  { %983 = vst.msk [vmem:[#allocation3 + $0xa] sm:$0x3] %vm507_vm5, %v981_v60  ;;  %985 = vst.msk [vmem:[#allocation4 + $0x4] sm:$0x3] %vm507_vm5, %v981_v60  ;;  %v987_v61 = vpack.c.bf16 %v981_v60, %v981_v60 }
 0xcb2   :  { %2401 = vmatmul.mubr.msk.bf16.vlgmr.msra.gmra.mrb[16].mxu0 %vm417_vm6, %v987_v61 }
 0xcb3   :  { %1306 = vmatprep.mubr.bf16.mxu0 %v2825_v13 }
 0xcb7   :  { %v1184_v1 = vld [vmem:[#allocation4 + $0x4] sm:$0x3]  ;;  %v1195_v2 = vld [vmem:[#allocation3 + $0xa] sm:$0x3] }
 0xcb8   :  { %v1185_v3 = vsel %vm156_vm7, %v1183_v62, %v1184_v1  ;;  %v1197_v4 = vsel %vm156_vm7, %v1195_v2, %v1196_v63  ;;  %v2523_v2 = vld [vmem:[%s3454_s4 + $0x4] ss:$8 sps:$4 sm:$0xff]  }
 0xcb9   :  { %1186 = vst.msk [vmem:[#allocation5 + $0x4] sm:$0x3] %vm507_vm5, %v1185_v3  ;;  %1198 = vst.msk [vmem:[#allocation5 + $0xa] sm:$0x3] %vm507_vm5, %v1197_v4  ;;  %v2521_v3 = vld [vmem:[%s3454_s4] ss:$8 sps:$4 sm:$0xff]   ;;  %1274 = vmatprep.subr.bf16.mxu0 %v2523_v2 }
 0xcba   :  { %1275 = vmatpush1.bf16.msra.mxu0 %v2521_v3  ;;  %v2526_v4 = vld [vmem:[%s3454_s4 + $0x14] ss:$8 sps:$4 sm:$0xff]  }
 0xcbb   :  { %1276 = vmatprep.subr.bf16.mxu0 %v2526_v4 }
 0xd85   :  { %v1025_v5 = vpop.f32.mrb[16].mxu0 }
 0xd86   :  { %v1027_v6 = vpop.f32.mrb[17].mxu0 }
 0xd87   :  { %v1034_v9 = vcombine.low %v1025_v5, %v1027_v6  ;;  %v1029_v11 = vpop.f32.mrb[18].mxu0  ;;  %v2524_v5 = vld [vmem:[%s3454_s4 + $0x10] ss:$8 sps:$4 sm:$0xff]   ;;  %v2529_v6 = vld [vmem:[%s3454_s4 + $0x24] ss:$8 sps:$4 sm:$0xff]  }
 0xd88   :  { %v1030_v18 = vpop.f32.mrb[19].mxu0  ;;  %1277 = vmatpush1.bf16.msra.mxu0 %v2524_v5 }
 0xd89   :  { %v1041_v19 = vrot.slane %v1034_v9, %v3020_v58  ;;  %v3179_v9 = vld [vmem:[%s3455_s5 + $0x44] ss:$8 sps:$4 sm:$0xff]   ;;  %v2527_v18 = vld [vmem:[%s3454_s4 + $0x20] ss:$8 sps:$4 sm:$0xff]   ;;  %1278 = vmatprep.subr.bf16.mxu0 %v2529_v6 }
 0xd8a   :  { %1487 = vmatprep.subr.bf16.mxu1 %v3179_v9 }
 0xd8b   :  { %v1043_v21 = vadd.f32 %v1041_v19, %v986_v20  ;;  %v3187_v19 = vld [vmem:[%s3455_s5 + $0x40] ss:$8 sps:$4 sm:$0xff]   ;;  %v2535_v20 = vld [vmem:[%s3454_s4 + $0x34] ss:$8 sps:$4 sm:$0xff]  }
 0xd8c   :  { %1279 = vmatpush1.bf16.msra.mxu0 %v2527_v18 }
 0xd8d   :  { %1054 = vrot.lane.b32.xlu1 %v1043_v21, %s2818_s19  ;;  %v2402_v22 = vmul.f32 -1.442695, %v1043_v21  ;;  %v1051_v23 = vrot.slane %v1043_v21, 2  ;;  %v3196_v21 = vld [vmem:[%s3455_s5 + $0x54] ss:$8 sps:$4 sm:$0xff]   ;;  %1280 = vmatprep.subr.bf16.mxu0 %v2535_v20 }
 0xd8f   :  { %2625 = vpow2.f32 %v2402_v22  ;;  %v3203_v22 = vld [vmem:[%s3455_s5 + $0x50] ss:$8 sps:$4 sm:$0xff]  }
 0xd90   :  { %2627 = vtanh.f32 %v1051_v23  ;;  %v2533_v23 = vld [vmem:[%s3454_s4 + $0x30] ss:$8 sps:$4 sm:$0xff]  }
 0xd91   :  { %1281 = vmatpush1.bf16.msra.mxu0 %v2533_v23 }
 0xd92   :  { %1580 = vmatprep.subr.bf16.mxu0 %v3179_v9 }
 0xd99   :  { %v2626_v24 = vpop.eup %2625 }
 0xd9a   :  { %v1047_v25 = vadd.f32 1.0, %v2626_v24  ;;  %v2628_v26 = vpop.eup %2627  ;;  %v3213_v24 = vld [vmem:[%s3455_s5 + $0x64] ss:$8 sps:$4 sm:$0xff]  }
 0xd9c   :  { %2629 = vrcp.f32 %v1047_v25  ;;  %v3218_v25 = vld [vmem:[%s3455_s5 + $0x60] ss:$8 sps:$4 sm:$0xff]  }
 0xda6   :  { %v2630_v27 = vpop.eup %2629 }
 0xda7   :  { %v1065_v30 = vmul.f32 %v2630_v27, %v2628_v26  ;;  %v1064_v31 = vmul.f32 %v2630_v27, %v975_v52  ;;  %v3223_v26 = vld [vmem:[%s3455_s5 + $0x74] ss:$8 sps:$4 sm:$0xff]   ;;  %v3231_v27 = vld [vmem:[%s3455_s5 + $0x70] ss:$8 sps:$4 sm:$0xff]  }
 0xda9   :  { %1067 = vrot.lane.b32.xlu0 %v1065_v30, %s2818_s19 }
 0xdff   :  { %v1055_v40 = vpop.permute.xlu1 %1054 }
 0xe00   :  { %v1056_v7 = vrot.slane %v1055_v40, 2 }
 0xe02   :  { %v2403_v8 = vmul.f32 -1.442695, %v1056_v7 }
 0xe1b   :  { %v1068_v33 = vpop.permute.xlu0 %1067 }
 0xe1c   :  { %v1070_v37 = vadd.f32 %v1068_v33, %v1064_v31 }
 0xe1e   :  { %2631 = vtanh.f32 %v1070_v37 }
 0xe1f   :  { %2633 = vpow2.f32 %v2403_v8 }
 0xe28   :  { %v2632_v39 = vpop.eup %2631 }
 0xe29   :  { %1073 = vrot.lane.b32.xlu0 %v2632_v39, %s2818_s19  ;;  %v2634_v10 = vpop.eup %2633 }
 0xe2a   :  { %v1061_v12 = vadd.f32 1.0, %v2634_v10  ;;  %v1175_v10 = vld [vmem:[#allocation3] sm:$0x3] }
 0xe2c   :  { %2635 = vrcp.f32 %v1061_v12  ;;  %v1204_v12 = vld [vmem:[#allocation4 + $0xe] sm:$0x3] }
 0xe36   :  { %v2636_v41 = vpop.eup %2635 }
 0xe9b   :  { %v1074_v42 = vpop.permute.xlu0 %1073 }
 0xe9c   :  { %v1076_v43 = vmul.f32 %v2636_v41, %v1074_v42 }
 0xe9e   :  { %1078 = vst.msk [vmem:[#allocation3 + $0xc] sm:$0x3] %vm507_vm5, %v1076_v43  ;;  %1080 = vst.msk [vmem:[#allocation4 + $0x2] sm:$0x3] %vm507_vm5, %v1076_v43  ;;  %v1082_v44 = vpack.c.bf16 %v1076_v43, %v1076_v43 }
 0xea0   :  { %2404 = vmatmul.mubr.msk.bf16.vlgmr.msra.gmra.mrb[16].mxu1 %vm417_vm6, %v1082_v44 }
 0xea1   :  { %1519 = vmatprep.mubr.bf16.mxu1 %v2825_v13  ;;  %1488 = vmatpush1.bf16.msra.mxu1 %v3187_v19 }
 0xea2   :  { %1489 = vmatprep.subr.bf16.mxu1 %v3196_v21 }
 0xea5   :  { %v1180_v46 = vld [vmem:[#allocation4 + $0x2] sm:$0x3]  ;;  %v1199_v47 = vld [vmem:[#allocation3 + $0xc] sm:$0x3]  ;;  %1490 = vmatpush1.bf16.msra.mxu1 %v3203_v22 }
 0xea6   :  { %v1181_v15 = vsel %vm156_vm7, %v1179_v45, %v1180_v46  ;;  %v1201_v16 = vsel %vm156_vm7, %v1199_v47, %v1200_v14  ;;  %1491 = vmatprep.subr.bf16.mxu1 %v3213_v24 }
 0xea7   :  { %1182 = vst.msk [vmem:[#allocation5 + $0x2] sm:$0x3] %vm507_vm5, %v1181_v15  ;;  %1202 = vst.msk [vmem:[#allocation5 + $0xc] sm:$0x3] %vm507_vm5, %v1201_v16 }
 0xea9   :  { %1492 = vmatpush1.bf16.msra.mxu1 %v3218_v25 }
 0xeaa   :  { %1493 = vmatprep.subr.bf16.mxu1 %v3223_v26 }
 0xead   :  { %1494 = vmatpush1.bf16.msra.mxu1 %v3231_v27 }
 0xeae   :  { %1673 = vmatprep.subr.bf16.mxu1 %v3179_v9 }
 0xeb0   :  { %1520 = vmatmul.mubr.bf16.vlgmr.msra.gmra.mrb[20].mxu1 %v2825_v13 }
 0xeb1   :  { %1674 = vmatpush1.bf16.msra.mxu1 %v3187_v19  ;;  %1705 = vmatprep.mubr.bf16.mxu1 %v2825_v13 }
 0xeb2   :  { %1675 = vmatprep.subr.bf16.mxu1 %v3196_v21 }
 0xeb5   :  { %1676 = vmatpush1.bf16.msra.mxu1 %v3203_v22 }
 0xeb6   :  { %1677 = vmatprep.subr.bf16.mxu1 %v3213_v24 }
 0xeb9   :  { %1678 = vmatpush1.bf16.msra.mxu1 %v3218_v25 }
 0xeba   :  { %1679 = vmatprep.subr.bf16.mxu1 %v3223_v26 }
 0xebd   :  { %1680 = vmatpush1.bf16.msra.mxu1 %v3231_v27 }
 0xebe   :  { %1859 = vmatprep.subr.bf16.mxu1 %v3179_v9 }
 0xf73   :  { %v1120_v17 = vpop.f32.mrb[16].mxu1 }
 0xf74   :  { %v1122_v48 = vpop.f32.mrb[17].mxu1 }
 0xf75   :  { %v1129_v49 = vcombine.low %v1120_v17, %v1122_v48  ;;  %v1124_v51 = vpop.f32.mrb[18].mxu1 }
 0xf76   :  { %v1125_v52 = vpop.f32.mrb[19].mxu1 }
 0xf77   :  { %v1136_v54 = vrot.slane %v1129_v49, %v3020_v58  ;;  %v2407_v49 = vld [vmem:[%s3456_s6 + $0x2] sm:$0x3] }
 0xf78   :  { %v1224_v51 = vrot.slane %v2407_v49, %v166_v36  ;;  %v1228_v52 = vrot.slane %v2407_v49, %v170_v38 }
 0xf79   :  { %v1138_v56 = vadd.f32 %v1136_v54, %v1081_v55 }
 0xf7b   :  { %1149 = vrot.lane.b32.xlu0 %v1138_v56, %s2818_s19  ;;  %v2405_v28 = vmul.f32 -1.442695, %v1138_v56  ;;  %v1146_v29 = vrot.slane %v1138_v56, 2 }
 0xf7d   :  { %2637 = vpow2.f32 %v2405_v28 }
 0xf7e   :  { %2639 = vtanh.f32 %v1146_v29 }
 0xf83   :  { %v1521_v47 = vpop.f32.mrb[20].mxu1 }
 0xf84   :  { %v1523_v15 = vpop.f32.mrb[21].mxu1 }
 0xf85   :  { %v1525_v16 = vpop.f32.mrb[22].mxu1  ;;  %v1530_v17 = vcombine.low %v1521_v47, %v1523_v15 }
 0xf86   :  { %v1526_v48 = vpop.f32.mrb[23].mxu1 }
 0xf87   :  { %v2638_v32 = vpop.eup %2637 }
 0xf88   :  { %v1142_v57 = vadd.f32 1.0, %v2638_v32  ;;  %v2640_v59 = vpop.eup %2639 }
 0xf8a   :  { %2641 = vrcp.f32 %v1142_v57 }
 0xf94   :  { %v2642_v60 = vpop.eup %2641 }
 0xf95   :  { %v1160_v61 = vmul.f32 %v2642_v60, %v2640_v59  ;;  %v1159_v62 = vmul.f32 %v2642_v60, %v1070_v37 }
 0xf97   :  { %1162 = vrot.lane.b32.xlu1 %v1160_v61, %s2818_s19 }
 0xfed   :  { %v1150_v30 = vpop.permute.xlu0 %1149 }
 0xfee   :  { %v1151_v31 = vrot.slane %v1150_v30, 2 }
 0xff0   :  { %v2406_v33 = vmul.f32 -1.442695, %v1151_v31 }
0x1009   :  { %v1163_v63 = vpop.permute.xlu1 %1162 }
0x100a   :  { %v1165_v1 = vadd.f32 %v1163_v63, %v1159_v62 }
0x100c   :  { %2643 = vtanh.f32 %v1165_v1 }
0x100d   :  { %2645 = vpow2.f32 %v2406_v33 }
0x1016   :  { %v2644_v11 = vpop.eup %2643 }
0x1017   :  { %1168 = vrot.lane.b32.xlu1 %v2644_v11, %s2818_s19  ;;  %v2646_v37 = vpop.eup %2645 }
0x1018   :  { %v1156_v39 = vadd.f32 1.0, %v2646_v37 }
0x101a   :  { %2647 = vrcp.f32 %v1156_v39 }
0x1024   :  { %v2648_v40 = vpop.eup %2647 }
0x1089   :  { %v1169_v7 = vpop.permute.xlu1 %1168 }
0x108a   :  { %v1171_v8 = vmul.f32 %v2648_v40, %v1169_v7 }
0x108c   :  { %1173 = vst.msk [vmem:[#allocation3 + $0xe] sm:$0x3] %vm507_vm5, %v1171_v8  ;;  %1174 = vst.msk [vmem:[#allocation4] sm:$0x3] %vm507_vm5, %v1171_v8 }
0x1093   :  { %v1176_v41 = vld [vmem:[#allocation4] sm:$0x3]  ;;  %v1203_v42 = vld [vmem:[#allocation3 + $0xe] sm:$0x3] }
0x1094   :  { %v1177_v43 = vsel %vm156_vm7, %v1175_v10, %v1176_v41  ;;  %v1205_v44 = vsel %vm156_vm7, %v1203_v42, %v1204_v12 }
0x1095   :  { %1178 = vst.msk [vmem:[#allocation5] sm:$0x3] %vm507_vm5, %v1177_v43  ;;  %1206 = vst.msk [vmem:[#allocation5 + $0xe] sm:$0x3] %vm507_vm5, %v1205_v44  ;;  %v1537_v44 = vrot.slane %v1530_v17, %v3020_v58 }
0x109c   :  { %v1207_v45 = vld [vmem:[#allocation5] sm:$0xff]  ;;  %v1208_v14 = vld [vmem:[#allocation5 + $0x8] sm:$0xff] }
0x109d   :  { %v1209_v46 = vpack.c.bf16 %v1208_v14, %v1207_v45 }
0x109f   :  { %2416 = vmatmul.mubr.msk.bf16.vlgmr.msra.gmra.mrb[20].mxu0 %vm417_vm6, %v1209_v46 }
0x10a0   :  { %1581 = vmatpush1.bf16.msra.mxu0 %v3187_v19  ;;  %1612 = vmatprep.mubr.bf16.mxu0 %v2825_v13 }
0x10a1   :  { %1582 = vmatprep.subr.bf16.mxu0 %v3196_v21 }
0x10a4   :  { %1583 = vmatpush1.bf16.msra.mxu0 %v3203_v22 }
0x10a5   :  { %1584 = vmatprep.subr.bf16.mxu0 %v3213_v24 }
0x10a8   :  { %1585 = vmatpush1.bf16.msra.mxu0 %v3218_v25 }
0x10a9   :  { %1586 = vmatprep.subr.bf16.mxu0 %v3223_v26 }
0x10ac   :  { %1587 = vmatpush1.bf16.msra.mxu0 %v3231_v27 }
0x10ad   :  { %1766 = vmatprep.subr.bf16.mxu0 %v3179_v9 }
0x1172   :  { %v1308_v54 = vpop.f32.mrb[20].mxu0 }
0x1173   :  { %v1309_v55 = vadd.f32 %v1308_v54, %v1224_v51  ;;  %v1310_v56 = vpop.f32.mrb[21].mxu0 }
0x1174   :  { %v1311_v28 = vadd.f32 %v1310_v56, %v1228_v52  ;;  %v1312_v29 = vpop.f32.mrb[22].mxu0 }
0x1175   :  { %v1379_v32 = vrot.slane %v1309_v55, 6  ;;  %v1397_v57 = vrot.slane %v1309_v55, 2  ;;  %v1313_v59 = vadd.f32 %v1312_v29, %v1224_v51  ;;  %v1314_v60 = vpop.f32.mrb[23].mxu0 }
0x1176   :  { %v1380_v61 = vrot.slane %v1311_v28, 6  ;;  %v1398_v62 = vrot.slane %v1311_v28, 2  ;;  %v1315_v63 = vadd.f32 %v1314_v60, %v1228_v52 }
0x1177   :  { %v1319_v1 = vrot.slane %v1313_v59, 6  ;;  %v1337_v2 = vrot.slane %v1313_v59, 2  ;;  %v1383_v36 = vsel %vm3011_vm3, %v1313_v59, %v1379_v32  ;;  %v1401_v34 = vsel %vm3011_vm3, %v1313_v59, %v1397_v57 }
0x1178   :  { %v1320_v38 = vrot.slane %v1315_v63, 6  ;;  %v1338_v3 = vrot.slane %v1315_v63, 2  ;;  %v1384_v4 = vsel %vm3015_vm4, %v1315_v63, %v1380_v61  ;;  %v1402_v5 = vsel %vm3015_vm4, %v1315_v63, %v1398_v62 }
0x1179   :  { %v1323_v6 = vsel %vm3011_vm3, %v1309_v55, %v1319_v1  ;;  %v1341_v11 = vsel %vm3011_vm3, %v1309_v55, %v1337_v2  ;;  %v1387_v18 = vcombine.low %v1383_v36, %v1384_v4  ;;  %v1405_v20 = vcombine.low %v1401_v34, %v1402_v5 }
0x117a   :  { %v1324_v23 = vsel %vm3015_vm4, %v1311_v28, %v1320_v38  ;;  %v1342_v30 = vsel %vm3015_vm4, %v1311_v28, %v1338_v3  ;;  %v1416_v31 = vcombine.high %v1383_v36, %v1384_v4  ;;  %v1426_v33 = vcombine.high %v1401_v34, %v1402_v5 }
0x117b   :  { %v1327_v37 = vcombine.low %v1323_v6, %v1324_v23  ;;  %v1345_v39 = vcombine.low %v1341_v11, %v1342_v30  ;;  %v1356_v40 = vcombine.high %v1323_v6, %v1324_v23  ;;  %v1366_v7 = vcombine.high %v1341_v11, %v1342_v30  ;;  %2419 = vst.sshfl [vmem:[#allocation2 + $0x10] sm:$0x33 pattern:$0x76325410] %v1387_v18 }
0x117c   :  { %v1412_v8 = vrot.slane %v1405_v20, %v3020_v58  ;;  %2420 = vst.sshfl [vmem:[#allocation2 + $0x18] sm:$0x33 pattern:$0x76325410] %v1416_v31  ;;  %v1433_v50 = vrot.slane %v1426_v33, %v3020_v58 }
0x117d   :  { %2417 = vst.sshfl [vmem:[#allocation2] sm:$0x33 pattern:$0x76325410] %v1327_v37  ;;  %v1352_v10 = vrot.slane %v1345_v39, %v3020_v58  ;;  %v1373_v12 = vrot.slane %v1366_v7, %v3020_v58 }
0x117e   :  { %2418 = vst.sshfl [vmem:[#allocation2 + $0x8] sm:$0x33 pattern:$0x76325410] %v1356_v40  ;;  %v1413_v53 = vcombine.high %v1412_v8, %v1412_v8  ;;  %v1434_v41 = vcombine.high %v1433_v50, %v1433_v50 }
0x117f   :  { %v1353_v42 = vcombine.high %v1352_v10, %v1352_v10  ;;  %v1374_v43 = vcombine.high %v1373_v12, %v1373_v12 }
0x1180   :  { %1415 = vst [vmem:[#allocation2 + $0x14] sm:$0xf] %v1413_v53  ;;  %1436 = vst [vmem:[#allocation2 + $0x1c] sm:$0xf] %v1434_v41 }
0x1181   :  { %1355 = vst [vmem:[#allocation2 + $0x4] sm:$0xf] %v1353_v42  ;;  %1376 = vst [vmem:[#allocation2 + $0xc] sm:$0xf] %v1374_v43 }
0x1184   :  { %v1446_v45 = vld [vmem:[#allocation2] sm:$0xf] }
0x1185   :  { %v1539_v14 = vadd.f32 %v1537_v44, %v1446_v45 }
0x1187   :  { %1550 = vrot.lane.b32.xlu1 %v1539_v14, %s2818_s19  ;;  %v2437_v46 = vmul.f32 -1.442695, %v1539_v14  ;;  %v1547_v47 = vrot.slane %v1539_v14, 2 }
0x1188   :  { %v1575_v3 = vld [vmem:[#allocation2 + $0x4] sm:$0xf] }
0x1189   :  { %2649 = vpow2.f32 %v2437_v46 }
0x118a   :  { %2651 = vtanh.f32 %v1547_v47 }
0x1193   :  { %v2650_v15 = vpop.eup %2649 }
0x1194   :  { %v1543_v16 = vadd.f32 1.0, %v2650_v15  ;;  %v2652_v48 = vpop.eup %2651  ;;  %v1668_v15 = vld [vmem:[#allocation2 + $0x8] sm:$0xf] }
0x1196   :  { %2653 = vrcp.f32 %v1543_v16 }
0x11a0   :  { %v2654_v49 = vpop.eup %2653 }
0x11a1   :  { %v1561_v51 = vmul.f32 %v2654_v49, %v2652_v48  ;;  %v1560_v52 = vmul.f32 0.0, %v2654_v49 }
0x11a3   :  { %1563 = vrot.lane.b32.xlu0 %v1561_v51, %s2818_s19 }
0x11f9   :  { %v1551_v56 = vpop.permute.xlu1 %1550 }
0x11fa   :  { %v1552_v28 = vrot.slane %v1551_v56, 2 }
0x11fc   :  { %v2438_v29 = vmul.f32 -1.442695, %v1552_v28 }
0x1215   :  { %v1564_v54 = vpop.permute.xlu0 %1563 }
0x1216   :  { %v1566_v55 = vadd.f32 %v1564_v54, %v1560_v52 }
0x1218   :  { %2655 = vtanh.f32 %v1566_v55 }
0x1219   :  { %2657 = vpow2.f32 %v2438_v29 }
0x1222   :  { %v2656_v17 = vpop.eup %2655 }
0x1223   :  { %1569 = vrot.lane.b32.xlu0 %v2656_v17, %s2818_s19  ;;  %v2658_v32 = vpop.eup %2657 }
0x1224   :  { %v1557_v57 = vadd.f32 1.0, %v2658_v32 }
0x1226   :  { %2659 = vrcp.f32 %v1557_v57 }
0x1230   :  { %v2660_v59 = vpop.eup %2659 }
0x1295   :  { %v1570_v60 = vpop.permute.xlu0 %1569 }
0x1296   :  { %v1572_v61 = vmul.f32 %v2660_v59, %v1570_v60 }
0x1298   :  { %1573 = vst.msk [vmem:[#allocation3] sm:$0x3] %vm507_vm5, %v1572_v61  ;;  %1574 = vst.msk [vmem:[#allocation4 + $0xe] sm:$0x3] %vm507_vm5, %v1572_v61  ;;  %v1576_v62 = vpack.c.bf16 %v1572_v61, %v1572_v61 }
0x129a   :  { %2439 = vmatmul.mubr.msk.bf16.vlgmr.msra.gmra.mrb[24].mxu0 %vm417_vm6, %v1576_v62 }
0x129b   :  { %1767 = vmatpush1.bf16.msra.mxu0 %v3187_v19  ;;  %1798 = vmatprep.mubr.bf16.mxu0 %v2825_v13 }
0x129c   :  { %1768 = vmatprep.subr.bf16.mxu0 %v3196_v21 }
0x129f   :  { %1769 = vmatpush1.bf16.msra.mxu0 %v3203_v22 }
0x12a0   :  { %1770 = vmatprep.subr.bf16.mxu0 %v3213_v24 }
0x12a3   :  { %1771 = vmatpush1.bf16.msra.mxu0 %v3218_v25 }
0x12a4   :  { %1772 = vmatprep.subr.bf16.mxu0 %v3223_v26 }
0x12a7   :  { %1773 = vmatpush1.bf16.msra.mxu0 %v3231_v27 }
0x12a8   :  { %1952 = vmatprep.subr.bf16.mxu0 %v3179_v9 }
0x136d   :  { %v1614_v63 = vpop.f32.mrb[24].mxu0 }
0x136e   :  { %v1616_v1 = vpop.f32.mrb[25].mxu0 }
0x136f   :  { %v1623_v2 = vcombine.low %v1614_v63, %v1616_v1  ;;  %v1618_v36 = vpop.f32.mrb[26].mxu0 }
0x1370   :  { %v1619_v34 = vpop.f32.mrb[27].mxu0 }
0x1371   :  { %v1630_v38 = vrot.slane %v1623_v2, %v3020_v58 }
0x1373   :  { %v1632_v4 = vadd.f32 %v1630_v38, %v1575_v3 }
0x1375   :  { %1643 = vrot.lane.b32.xlu0 %v1632_v4, %s2818_s19  ;;  %v2440_v5 = vmul.f32 -1.442695, %v1632_v4  ;;  %v1640_v6 = vrot.slane %v1632_v4, 2 }
0x1377   :  { %2661 = vpow2.f32 %v2440_v5 }
0x1378   :  { %2663 = vtanh.f32 %v1640_v6 }
0x1381   :  { %v2662_v11 = vpop.eup %2661 }
0x1382   :  { %v1636_v18 = vadd.f32 1.0, %v2662_v11  ;;  %v2664_v20 = vpop.eup %2663  ;;  %v1761_v11 = vld [vmem:[#allocation2 + $0xc] sm:$0xf] }
0x1384   :  { %2665 = vrcp.f32 %v1636_v18 }
0x138e   :  { %v2666_v23 = vpop.eup %2665 }
0x138f   :  { %v1654_v30 = vmul.f32 %v2666_v23, %v2664_v20  ;;  %v1653_v31 = vmul.f32 %v2666_v23, %v1566_v55 }
0x1391   :  { %1656 = vrot.lane.b32.xlu1 %v1654_v30, %s2818_s19 }
0x13e7   :  { %v1644_v40 = vpop.permute.xlu0 %1643 }
0x13e8   :  { %v1645_v7 = vrot.slane %v1644_v40, 2 }
0x13ea   :  { %v2441_v8 = vmul.f32 -1.442695, %v1645_v7 }
0x1403   :  { %v1657_v33 = vpop.permute.xlu1 %1656 }
0x1404   :  { %v1659_v37 = vadd.f32 %v1657_v33, %v1653_v31 }
0x1406   :  { %2667 = vtanh.f32 %v1659_v37 }
0x1407   :  { %2669 = vpow2.f32 %v2441_v8 }
0x1410   :  { %v2668_v39 = vpop.eup %2667 }
0x1411   :  { %1662 = vrot.lane.b32.xlu1 %v2668_v39, %s2818_s19  ;;  %v2670_v50 = vpop.eup %2669 }
0x1412   :  { %v1650_v10 = vadd.f32 1.0, %v2670_v50 }
0x1414   :  { %2671 = vrcp.f32 %v1650_v10 }
0x141e   :  { %v2672_v12 = vpop.eup %2671 }
0x1483   :  { %v1663_v53 = vpop.permute.xlu1 %1662 }
0x1484   :  { %v1665_v41 = vmul.f32 %v2672_v12, %v1663_v53 }
0x1486   :  { %1666 = vst.msk [vmem:[#allocation3 + $0x2] sm:$0x3] %vm507_vm5, %v1665_v41  ;;  %1667 = vst.msk [vmem:[#allocation4 + $0xc] sm:$0x3] %vm507_vm5, %v1665_v41  ;;  %v1669_v42 = vpack.c.bf16 %v1665_v41, %v1665_v41 }
0x1488   :  { %2442 = vmatmul.mubr.msk.bf16.vlgmr.msra.gmra.mrb[24].mxu1 %vm417_vm6, %v1669_v42 }
0x1489   :  { %1860 = vmatpush1.bf16.msra.mxu1 %v3187_v19  ;;  %1891 = vmatprep.mubr.bf16.mxu1 %v2825_v13 }
0x148a   :  { %1861 = vmatprep.subr.bf16.mxu1 %v3196_v21 }
0x148d   :  { %1862 = vmatpush1.bf16.msra.mxu1 %v3203_v22 }
0x148e   :  { %1863 = vmatprep.subr.bf16.mxu1 %v3213_v24 }
0x1491   :  { %1864 = vmatpush1.bf16.msra.mxu1 %v3218_v25 }
0x1492   :  { %1865 = vmatprep.subr.bf16.mxu1 %v3223_v26 }
0x1495   :  { %1866 = vmatpush1.bf16.msra.mxu1 %v3231_v27 }
0x1496   :  { %2045 = vmatprep.subr.bf16.mxu1 %v3179_v9 }
0x155b   :  { %v1707_v43 = vpop.f32.mrb[24].mxu1 }
0x155c   :  { %v1709_v44 = vpop.f32.mrb[25].mxu1 }
0x155d   :  { %v1716_v45 = vcombine.low %v1707_v43, %v1709_v44  ;;  %v1711_v14 = vpop.f32.mrb[26].mxu1 }
0x155e   :  { %v1712_v46 = vpop.f32.mrb[27].mxu1 }
0x155f   :  { %v1723_v47 = vrot.slane %v1716_v45, %v3020_v58 }
0x1561   :  { %v1725_v16 = vadd.f32 %v1723_v47, %v1668_v15 }
0x1563   :  { %1736 = vrot.lane.b32.xlu1 %v1725_v16, %s2818_s19  ;;  %v2443_v48 = vmul.f32 -1.442695, %v1725_v16  ;;  %v1733_v49 = vrot.slane %v1725_v16, 2 }
0x1565   :  { %2673 = vpow2.f32 %v2443_v48 }
0x1566   :  { %2675 = vtanh.f32 %v1733_v49  ;;  %v1854_v49 = vld [vmem:[#allocation2 + $0x10] sm:$0xf] }
0x156f   :  { %v2674_v51 = vpop.eup %2673 }
0x1570   :  { %v1729_v52 = vadd.f32 1.0, %v2674_v51  ;;  %v2676_v54 = vpop.eup %2675 }
0x1572   :  { %2677 = vrcp.f32 %v1729_v52 }
0x157c   :  { %v2678_v55 = vpop.eup %2677 }
0x157d   :  { %v1747_v17 = vmul.f32 %v2678_v55, %v2676_v54  ;;  %v1746_v56 = vmul.f32 %v2678_v55, %v1659_v37 }
0x157f   :  { %1749 = vrot.lane.b32.xlu0 %v1747_v17, %s2818_s19 }
0x15d5   :  { %v1737_v57 = vpop.permute.xlu1 %1736 }
0x15d6   :  { %v1738_v59 = vrot.slane %v1737_v57, 2 }
0x15d8   :  { %v2444_v60 = vmul.f32 -1.442695, %v1738_v59 }
0x15f1   :  { %v1750_v28 = vpop.permute.xlu0 %1749 }
0x15f2   :  { %v1752_v29 = vadd.f32 %v1750_v28, %v1746_v56 }
0x15f4   :  { %2679 = vtanh.f32 %v1752_v29 }
0x15f5   :  { %2681 = vpow2.f32 %v2444_v60 }
0x15fe   :  { %v2680_v32 = vpop.eup %2679 }
0x15ff   :  { %1755 = vrot.lane.b32.xlu0 %v2680_v32, %s2818_s19  ;;  %v2682_v61 = vpop.eup %2681 }
0x1600   :  { %v1743_v62 = vadd.f32 1.0, %v2682_v61 }
0x1602   :  { %2683 = vrcp.f32 %v1743_v62 }
0x160c   :  { %v2684_v63 = vpop.eup %2683 }
0x1671   :  { %v1756_v1 = vpop.permute.xlu0 %1755 }
0x1672   :  { %v1758_v2 = vmul.f32 %v2684_v63, %v1756_v1 }
0x1674   :  { %1759 = vst.msk [vmem:[#allocation3 + $0x4] sm:$0x3] %vm507_vm5, %v1758_v2  ;;  %1760 = vst.msk [vmem:[#allocation4 + $0xa] sm:$0x3] %vm507_vm5, %v1758_v2  ;;  %v1762_v36 = vpack.c.bf16 %v1758_v2, %v1758_v2 }
0x1676   :  { %2445 = vmatmul.mubr.msk.bf16.vlgmr.msra.gmra.mrb[28].mxu0 %vm417_vm6, %v1762_v36 }
0x1677   :  { %1953 = vmatpush1.bf16.msra.mxu0 %v3187_v19  ;;  %1984 = vmatprep.mubr.bf16.mxu0 %v2825_v13 }
0x1678   :  { %1954 = vmatprep.subr.bf16.mxu0 %v3196_v21 }
0x167b   :  { %1955 = vmatpush1.bf16.msra.mxu0 %v3203_v22 }
0x167c   :  { %1956 = vmatprep.subr.bf16.mxu0 %v3213_v24 }
0x167f   :  { %1957 = vmatpush1.bf16.msra.mxu0 %v3218_v25 }
0x1680   :  { %1958 = vmatprep.subr.bf16.mxu0 %v3223_v26 }
0x1683   :  { %1959 = vmatpush1.bf16.msra.mxu0 %v3231_v27 }
0x1684   :  { %2138 = vmatprep.subr.bf16.mxu0 %v3179_v9 }
0x1749   :  { %v1800_v34 = vpop.f32.mrb[28].mxu0 }
0x174a   :  { %v1802_v38 = vpop.f32.mrb[29].mxu0 }
0x174b   :  { %v1809_v3 = vcombine.low %v1800_v34, %v1802_v38  ;;  %v1804_v4 = vpop.f32.mrb[30].mxu0 }
0x174c   :  { %v1805_v5 = vpop.f32.mrb[31].mxu0 }
0x174d   :  { %v1816_v6 = vrot.slane %v1809_v3, %v3020_v58 }
0x174f   :  { %v1818_v18 = vadd.f32 %v1816_v6, %v1761_v11 }
0x1751   :  { %1829 = vrot.lane.b32.xlu0 %v1818_v18, %s2818_s19  ;;  %v2446_v20 = vmul.f32 -1.442695, %v1818_v18  ;;  %v1826_v23 = vrot.slane %v1818_v18, 2 }
0x1753   :  { %2685 = vpow2.f32 %v2446_v20 }
0x1754   :  { %2687 = vtanh.f32 %v1826_v23 }
0x175d   :  { %v2686_v30 = vpop.eup %2685 }
0x175e   :  { %v1822_v31 = vadd.f32 1.0, %v2686_v30  ;;  %v2688_v33 = vpop.eup %2687 }
0x1760   :  { %2689 = vrcp.f32 %v1822_v31  ;;  %v1947_v31 = vld [vmem:[#allocation2 + $0x14] sm:$0xf] }
0x176a   :  { %v2690_v9 = vpop.eup %2689 }
0x176b   :  { %v1840_v37 = vmul.f32 %v2690_v9, %v2688_v33  ;;  %v1839_v39 = vmul.f32 %v2690_v9, %v1752_v29 }
0x176d   :  { %1842 = vrot.lane.b32.xlu1 %v1840_v37, %s2818_s19 }
0x17c3   :  { %v1830_v50 = vpop.permute.xlu0 %1829 }
0x17c4   :  { %v1831_v10 = vrot.slane %v1830_v50, 2 }
0x17c6   :  { %v2447_v12 = vmul.f32 -1.442695, %v1831_v10 }
0x17df   :  { %v1843_v40 = vpop.permute.xlu1 %1842 }
0x17e0   :  { %v1845_v7 = vadd.f32 %v1843_v40, %v1839_v39 }
0x17e2   :  { %2691 = vtanh.f32 %v1845_v7 }
0x17e3   :  { %2693 = vpow2.f32 %v2447_v12 }
0x17ec   :  { %v2692_v8 = vpop.eup %2691 }
0x17ed   :  { %1848 = vrot.lane.b32.xlu1 %v2692_v8, %s2818_s19  ;;  %v2694_v53 = vpop.eup %2693 }
0x17ee   :  { %v1836_v41 = vadd.f32 1.0, %v2694_v53 }
0x17f0   :  { %2695 = vrcp.f32 %v1836_v41 }
0x17fa   :  { %v2696_v42 = vpop.eup %2695 }
0x185f   :  { %v1849_v43 = vpop.permute.xlu1 %1848 }
0x1860   :  { %v1851_v44 = vmul.f32 %v2696_v42, %v1849_v43 }
0x1862   :  { %1852 = vst.msk [vmem:[#allocation3 + $0x6] sm:$0x3] %vm507_vm5, %v1851_v44  ;;  %1853 = vst.msk [vmem:[#allocation4 + $0x8] sm:$0x3] %vm507_vm5, %v1851_v44  ;;  %v1855_v45 = vpack.c.bf16 %v1851_v44, %v1851_v44 }
0x1864   :  { %2448 = vmatmul.mubr.msk.bf16.vlgmr.msra.gmra.mrb[28].mxu1 %vm417_vm6, %v1855_v45 }
0x1865   :  { %2046 = vmatpush1.bf16.msra.mxu1 %v3187_v19  ;;  %2077 = vmatprep.mubr.bf16.mxu1 %v2825_v13 }
0x1866   :  { %2047 = vmatprep.subr.bf16.mxu1 %v3196_v21 }
0x1869   :  { %2048 = vmatpush1.bf16.msra.mxu1 %v3203_v22  ;;  %v2238_v4 = vld [vmem:[#allocation3 + $0x6] sm:$0x3]  ;;  %v2243_v5 = vld [vmem:[#allocation4 + $0x8] sm:$0x3] }
0x186a   :  { %2049 = vmatprep.subr.bf16.mxu1 %v3213_v24 }
0x186d   :  { %2050 = vmatpush1.bf16.msra.mxu1 %v3218_v25 }
0x186e   :  { %2051 = vmatprep.subr.bf16.mxu1 %v3223_v26 }
0x1871   :  { %2052 = vmatpush1.bf16.msra.mxu1 %v3231_v27 }
0x1872   :  { %2479 = vmatprep.subr.bf16.mxu1 %v2823_v0 }
0x1937   :  { %v1893_v14 = vpop.f32.mrb[28].mxu1 }
0x1938   :  { %v1895_v46 = vpop.f32.mrb[29].mxu1 }
0x1939   :  { %v1902_v47 = vcombine.low %v1893_v14, %v1895_v46  ;;  %v1897_v15 = vpop.f32.mrb[30].mxu1  ;;  %v2234_v46 = vld [vmem:[#allocation3 + $0x4] sm:$0x3] }
0x193a   :  { %v1898_v16 = vpop.f32.mrb[31].mxu1 }
0x193b   :  { %v1909_v48 = vrot.slane %v1902_v47, %v3020_v58  ;;  %v2247_v47 = vld [vmem:[#allocation4 + $0xa] sm:$0x3] }
0x193d   :  { %v1911_v51 = vadd.f32 %v1909_v48, %v1854_v49 }
0x193f   :  { %1922 = vrot.lane.b32.xlu1 %v1911_v51, %s2818_s19  ;;  %v2449_v52 = vmul.f32 -1.442695, %v1911_v51  ;;  %v1919_v54 = vrot.slane %v1911_v51, 2 }
0x1941   :  { %2697 = vpow2.f32 %v2449_v52 }
0x1942   :  { %2699 = vtanh.f32 %v1919_v54 }
0x194b   :  { %v2698_v55 = vpop.eup %2697 }
0x194c   :  { %v1915_v17 = vadd.f32 1.0, %v2698_v55  ;;  %v2700_v56 = vpop.eup %2699 }
0x194e   :  { %2701 = vrcp.f32 %v1915_v17 }
0x1958   :  { %v2702_v28 = vpop.eup %2701 }
0x1959   :  { %v1933_v29 = vmul.f32 %v2702_v28, %v2700_v56  ;;  %v1932_v32 = vmul.f32 %v2702_v28, %v1845_v7  ;;  %v2040_v28 = vld [vmem:[#allocation2 + $0x18] sm:$0xf] }
0x195b   :  { %1935 = vrot.lane.b32.xlu0 %v1933_v29, %s2818_s19 }
0x19b1   :  { %v1923_v61 = vpop.permute.xlu1 %1922 }
0x19b2   :  { %v1924_v62 = vrot.slane %v1923_v61, 2 }
0x19b4   :  { %v2450_v63 = vmul.f32 -1.442695, %v1924_v62 }
0x19cd   :  { %v1936_v57 = vpop.permute.xlu0 %1935 }
0x19ce   :  { %v1938_v59 = vadd.f32 %v1936_v57, %v1932_v32 }
0x19d0   :  { %2703 = vtanh.f32 %v1938_v59 }
0x19d1   :  { %2705 = vpow2.f32 %v2450_v63 }
0x19da   :  { %v2704_v60 = vpop.eup %2703 }
0x19db   :  { %1941 = vrot.lane.b32.xlu0 %v2704_v60, %s2818_s19  ;;  %v2706_v1 = vpop.eup %2705 }
0x19dc   :  { %v1929_v2 = vadd.f32 1.0, %v2706_v1 }
0x19de   :  { %2707 = vrcp.f32 %v1929_v2 }
0x19e8   :  { %v2708_v36 = vpop.eup %2707 }
0x1a4d   :  { %v1942_v34 = vpop.permute.xlu0 %1941 }
0x1a4e   :  { %v1944_v38 = vmul.f32 %v2708_v36, %v1942_v34 }
0x1a50   :  { %1945 = vst.msk [vmem:[#allocation3 + $0x8] sm:$0x3] %vm507_vm5, %v1944_v38  ;;  %1946 = vst.msk [vmem:[#allocation4 + $0x6] sm:$0x3] %vm507_vm5, %v1944_v38  ;;  %v1948_v3 = vpack.c.bf16 %v1944_v38, %v1944_v38 }
0x1a52   :  { %2451 = vmatmul.mubr.msk.bf16.vlgmr.msra.gmra.mrb[32].mxu0 %vm417_vm6, %v1948_v3 }
0x1a53   :  { %2139 = vmatpush1.bf16.msra.mxu0 %v3187_v19  ;;  %2170 = vmatprep.mubr.bf16.mxu0 %v2825_v13 }
0x1a54   :  { %2140 = vmatprep.subr.bf16.mxu0 %v3196_v21 }
0x1a57   :  { %v2239_v6 = vld [vmem:[#allocation4 + $0x6] sm:$0x3]  ;;  %v2242_v11 = vld [vmem:[#allocation3 + $0x8] sm:$0x3]  ;;  %2141 = vmatpush1.bf16.msra.mxu0 %v3203_v22 }
0x1a58   :  { %v2240_v18 = vsel %vm156_vm7, %v2238_v4, %v2239_v6  ;;  %v2244_v20 = vsel %vm156_vm7, %v2242_v11, %v2243_v5  ;;  %2142 = vmatprep.subr.bf16.mxu0 %v3213_v24 }
0x1a59   :  { %2241 = vst.msk [vmem:[#allocation5 + $0x6] sm:$0x3] %vm507_vm5, %v2240_v18  ;;  %2245 = vst.msk [vmem:[#allocation5 + $0x8] sm:$0x3] %vm507_vm5, %v2244_v20 }
0x1a5b   :  { %2143 = vmatpush1.bf16.msra.mxu0 %v3218_v25 }
0x1a5c   :  { %2144 = vmatprep.subr.bf16.mxu0 %v3223_v26 }
0x1a5f   :  { %2145 = vmatpush1.bf16.msra.mxu0 %v3231_v27 }
0x1b25   :  { %v1986_v13 = vpop.f32.mrb[32].mxu0 }
0x1b26   :  { %v1988_v19 = vpop.f32.mrb[33].mxu0 }
0x1b27   :  { %v1995_v21 = vcombine.low %v1986_v13, %v1988_v19  ;;  %v1990_v22 = vpop.f32.mrb[34].mxu0  ;;  %v2230_v19 = vld [vmem:[#allocation3 + $0x2] sm:$0x3] }
0x1b28   :  { %v1991_v23 = vpop.f32.mrb[35].mxu0 }
0x1b29   :  { %v2002_v30 = vrot.slane %v1995_v21, %v3020_v58  ;;  %v2251_v21 = vld [vmem:[#allocation4 + $0xc] sm:$0x3] }
0x1b2b   :  { %v2004_v33 = vadd.f32 %v2002_v30, %v1947_v31 }
0x1b2d   :  { %2015 = vrot.lane.b32.xlu0 %v2004_v33, %s2818_s19  ;;  %v2452_v24 = vmul.f32 -1.442695, %v2004_v33  ;;  %v2012_v9 = vrot.slane %v2004_v33, 2 }
0x1b2f   :  { %2709 = vpow2.f32 %v2452_v24 }
0x1b30   :  { %2711 = vtanh.f32 %v2012_v9 }
0x1b39   :  { %v2710_v37 = vpop.eup %2709 }
0x1b3a   :  { %v2008_v25 = vadd.f32 1.0, %v2710_v37  ;;  %v2712_v26 = vpop.eup %2711 }
0x1b3c   :  { %2713 = vrcp.f32 %v2008_v25 }
0x1b46   :  { %v2714_v27 = vpop.eup %2713 }
0x1b47   :  { %v2026_v39 = vmul.f32 %v2714_v27, %v2712_v26  ;;  %v2025_v40 = vmul.f32 %v2714_v27, %v1938_v59  ;;  %v2133_v27 = vld [vmem:[#allocation2 + $0x1c] sm:$0xf] }
0x1b49   :  { %2028 = vrot.lane.b32.xlu1 %v2026_v39, %s2818_s19 }
0x1b9f   :  { %v2016_v10 = vpop.permute.xlu0 %2015 }
0x1ba0   :  { %v2017_v12 = vrot.slane %v2016_v10, 2 }
0x1ba2   :  { %v2453_v53 = vmul.f32 -1.442695, %v2017_v12 }
0x1bbb   :  { %v2029_v7 = vpop.permute.xlu1 %2028 }
0x1bbc   :  { %v2031_v8 = vadd.f32 %v2029_v7, %v2025_v40 }
0x1bbe   :  { %2715 = vtanh.f32 %v2031_v8 }
0x1bbf   :  { %2717 = vpow2.f32 %v2453_v53 }
0x1bc8   :  { %v2716_v50 = vpop.eup %2715 }
0x1bc9   :  { %2034 = vrot.lane.b32.xlu1 %v2716_v50, %s2818_s19  ;;  %v2718_v41 = vpop.eup %2717 }
0x1bca   :  { %v2022_v42 = vadd.f32 1.0, %v2718_v41 }
0x1bcc   :  { %2719 = vrcp.f32 %v2022_v42 }
0x1bd6   :  { %v2720_v43 = vpop.eup %2719 }
0x1c3b   :  { %v2035_v44 = vpop.permute.xlu1 %2034 }
0x1c3c   :  { %v2037_v45 = vmul.f32 %v2720_v43, %v2035_v44  ;;  %v2546_v44 = vld [vmem:[%s3457_s7 + $0x8] sm:$0xff]  }
0x1c3e   :  { %2038 = vst.msk [vmem:[#allocation3 + $0xa] sm:$0x3] %vm507_vm5, %v2037_v45  ;;  %2039 = vst.msk [vmem:[#allocation4 + $0x4] sm:$0x3] %vm507_vm5, %v2037_v45  ;;  %v2041_v14 = vpack.c.bf16 %v2037_v45, %v2037_v45 }
0x1c40   :  { %2454 = vmatmul.mubr.msk.bf16.vlgmr.msra.gmra.mrb[32].mxu1 %vm417_vm6, %v2041_v14  ;;  %v2547_v14 = vld [vmem:[%s3457_s7 + $0x10] sm:$0xff]  }
0x1c41   :  { %2487 = vmatprep.mubr.msk.bf16.mxu1 %vm2824_vm0, %v2823_v0 }
0x1c45   :  { %v2235_v15 = vld [vmem:[#allocation4 + $0x4] sm:$0x3]  ;;  %v2246_v16 = vld [vmem:[#allocation3 + $0xa] sm:$0x3] }
0x1c46   :  { %v2236_v48 = vsel %vm156_vm7, %v2234_v46, %v2235_v15  ;;  %v2248_v49 = vsel %vm156_vm7, %v2246_v16, %v2247_v47  ;;  %v2548_v46 = vld [vmem:[%s3457_s7 + $0x18] sm:$0xff]  }
0x1c47   :  { %2237 = vst.msk [vmem:[#allocation5 + $0x4] sm:$0x3] %vm507_vm5, %v2236_v48  ;;  %2249 = vst.msk [vmem:[#allocation5 + $0xa] sm:$0x3] %vm507_vm5, %v2248_v49 }
0x1d13   :  { %v2079_v51 = vpop.f32.mrb[32].mxu1 }
0x1d14   :  { %v2081_v52 = vpop.f32.mrb[33].mxu1 }
0x1d15   :  { %v2088_v54 = vcombine.low %v2079_v51, %v2081_v52  ;;  %v2083_v55 = vpop.f32.mrb[34].mxu1 }
0x1d16   :  { %v2084_v17 = vpop.f32.mrb[35].mxu1  ;;  %v2226_v55 = vld [vmem:[#allocation3] sm:$0x3] }
0x1d17   :  { %v2095_v56 = vrot.slane %v2088_v54, %v3020_v58  ;;  %v2255_v17 = vld [vmem:[#allocation4 + $0xe] sm:$0x3] }
0x1d19   :  { %v2097_v29 = vadd.f32 %v2095_v56, %v2040_v28 }
0x1d1b   :  { %2108 = vrot.lane.b32.xlu1 %v2097_v29, %s2818_s19  ;;  %v2455_v32 = vmul.f32 -1.442695, %v2097_v29  ;;  %v2105_v57 = vrot.slane %v2097_v29, 2 }
0x1d1d   :  { %2721 = vpow2.f32 %v2455_v32 }
0x1d1e   :  { %2723 = vtanh.f32 %v2105_v57 }
0x1d27   :  { %v2722_v59 = vpop.eup %2721 }
0x1d28   :  { %v2101_v60 = vadd.f32 1.0, %v2722_v59  ;;  %v2724_v61 = vpop.eup %2723 }
0x1d2a   :  { %2725 = vrcp.f32 %v2101_v60  ;;  %v2460_v60 = vld [vmem:[%s3458_s8] ss:$0 sm:$0xff] }
0x1d34   :  { %v2726_v62 = vpop.eup %2725 }
0x1d35   :  { %v2119_v63 = vmul.f32 %v2726_v62, %v2724_v61  ;;  %v2118_v1 = vmul.f32 %v2726_v62, %v2031_v8 }
0x1d37   :  { %2121 = vrot.lane.b32.xlu0 %v2119_v63, %s2818_s19 }
0x1d8d   :  { %v2109_v38 = vpop.permute.xlu1 %2108 }
0x1d8e   :  { %v2110_v3 = vrot.slane %v2109_v38, 2 }
0x1d90   :  { %v2456_v4 = vmul.f32 -1.442695, %v2110_v3 }
0x1da9   :  { %v2122_v2 = vpop.permute.xlu0 %2121 }
0x1daa   :  { %v2124_v36 = vadd.f32 %v2122_v2, %v2118_v1 }
0x1dac   :  { %2727 = vtanh.f32 %v2124_v36 }
0x1dad   :  { %2729 = vpow2.f32 %v2456_v4 }
0x1db6   :  { %v2728_v34 = vpop.eup %2727 }
0x1db7   :  { %2127 = vrot.lane.b32.xlu0 %v2728_v34, %s2818_s19  ;;  %v2730_v5 = vpop.eup %2729 }
0x1db8   :  { %v2115_v6 = vadd.f32 1.0, %v2730_v5 }
0x1dba   :  { %2731 = vrcp.f32 %v2115_v6 }
0x1dc4   :  { %v2732_v11 = vpop.eup %2731 }
0x1e29   :  { %v2128_v18 = vpop.permute.xlu0 %2127 }
0x1e2a   :  { %v2130_v20 = vmul.f32 %v2732_v11, %v2128_v18 }
0x1e2c   :  { %2131 = vst.msk [vmem:[#allocation3 + $0xc] sm:$0x3] %vm507_vm5, %v2130_v20  ;;  %2132 = vst.msk [vmem:[#allocation4 + $0x2] sm:$0x3] %vm507_vm5, %v2130_v20  ;;  %v2134_v13 = vpack.c.bf16 %v2130_v20, %v2130_v20 }
0x1e2e   :  { %2457 = vmatmul.mubr.msk.bf16.vlgmr.msra.gmra.mrb[36].mxu0 %vm417_vm6, %v2134_v13 }
0x1e33   :  { %v2231_v22 = vld [vmem:[#allocation4 + $0x2] sm:$0x3]  ;;  %v2250_v23 = vld [vmem:[#allocation3 + $0xc] sm:$0x3] }
0x1e34   :  { %v2232_v30 = vsel %vm156_vm7, %v2230_v19, %v2231_v22  ;;  %v2252_v31 = vsel %vm156_vm7, %v2250_v23, %v2251_v21 }
0x1e35   :  { %2233 = vst.msk [vmem:[#allocation5 + $0x2] sm:$0x3] %vm507_vm5, %v2232_v30  ;;  %2253 = vst.msk [vmem:[#allocation5 + $0xc] sm:$0x3] %vm507_vm5, %v2252_v31 }
0x1f01   :  { %v2172_v33 = vpop.f32.mrb[36].mxu0 }
0x1f02   :  { %v2174_v24 = vpop.f32.mrb[37].mxu0 }
0x1f03   :  { %v2181_v9 = vcombine.low %v2172_v33, %v2174_v24  ;;  %v2176_v37 = vpop.f32.mrb[38].mxu0 }
0x1f04   :  { %v2177_v25 = vpop.f32.mrb[39].mxu0 }
0x1f05   :  { %v2188_v26 = vrot.slane %v2181_v9, %v3020_v58  ;;  %v2545_v58 = vld [vmem:[%s3457_s7] sm:$0xff]  }
0x1f06   :  { %2480 = vmatpush3.bf16.msra.mxu1 %v2545_v58 }
0x1f07   :  { %v2190_v39 = vadd.f32 %v2188_v26, %v2133_v27  ;;  %2481 = vmatprep.subr.bf16.mxu1 %v2823_v0 }
0x1f09   :  { %2201 = vrot.lane.b32.xlu0 %v2190_v39, %s2818_s19  ;;  %v2458_v40 = vmul.f32 -1.442695, %v2190_v39  ;;  %v2198_v7 = vrot.slane %v2190_v39, 2 }
0x1f0a   :  { %2482 = vmatpush3.bf16.msra.mxu1 %v2546_v44 }
0x1f0b   :  { %2733 = vpow2.f32 %v2458_v40  ;;  %2483 = vmatprep.subr.bf16.mxu1 %v2823_v0 }
0x1f0c   :  { %2735 = vtanh.f32 %v2198_v7 }
0x1f0e   :  { %2484 = vmatpush3.bf16.msra.mxu1 %v2547_v14 }
0x1f0f   :  { %2485 = vmatprep.subr.bf16.mxu1 %v2823_v0 }
0x1f12   :  { %2486 = vmatpush3.bf16.msra.mxu1 %v2548_v46 }
0x1f15   :  { %v2734_v8 = vpop.eup %2733 }
0x1f16   :  { %v2194_v50 = vadd.f32 1.0, %v2734_v8  ;;  %v2736_v10 = vpop.eup %2735 }
0x1f18   :  { %2737 = vrcp.f32 %v2194_v50 }
0x1f22   :  { %v2738_v12 = vpop.eup %2737 }
0x1f23   :  { %v2212_v53 = vmul.f32 %v2738_v12, %v2736_v10  ;;  %v2211_v41 = vmul.f32 %v2738_v12, %v2124_v36 }
0x1f25   :  { %2214 = vrot.lane.b32.xlu1 %v2212_v53, %s2818_s19 }
0x1f7b   :  { %v2202_v47 = vpop.permute.xlu0 %2201 }
0x1f7c   :  { %v2203_v15 = vrot.slane %v2202_v47, 2 }
0x1f7e   :  { %v2459_v16 = vmul.f32 -1.442695, %v2203_v15 }
0x1f97   :  { %v2215_v42 = vpop.permute.xlu1 %2214 }
0x1f98   :  { %v2217_v43 = vadd.f32 %v2215_v42, %v2211_v41 }
0x1f9a   :  { %2739 = vtanh.f32 %v2217_v43 }
0x1f9b   :  { %2741 = vpow2.f32 %v2459_v16 }
0x1fa4   :  { %v2740_v45 = vpop.eup %2739 }
0x1fa5   :  { %2220 = vrot.lane.b32.xlu1 %v2740_v45, %s2818_s19  ;;  %v2742_v48 = vpop.eup %2741 }
0x1fa6   :  { %v2208_v49 = vadd.f32 1.0, %v2742_v48 }
0x1fa8   :  { %2743 = vrcp.f32 %v2208_v49 }
0x1fb2   :  { %v2744_v51 = vpop.eup %2743 }
0x2017   :  { %v2221_v52 = vpop.permute.xlu1 %2220 }
0x2018   :  { %v2223_v54 = vmul.f32 %v2744_v51, %v2221_v52 }
0x201a   :  { %2224 = vst.msk [vmem:[#allocation3 + $0xe] sm:$0x3] %vm507_vm5, %v2223_v54  ;;  %2225 = vst.msk [vmem:[#allocation4] sm:$0x3] %vm507_vm5, %v2223_v54 }
0x2021   :  { %v2227_v56 = vld [vmem:[#allocation4] sm:$0x3]  ;;  %v2254_v28 = vld [vmem:[#allocation3 + $0xe] sm:$0x3] }
0x2022   :  { %v2228_v0 = vsel %vm156_vm7, %v2226_v55, %v2227_v56  ;;  %v2256_v29 = vsel %vm156_vm7, %v2254_v28, %v2255_v17 }
0x2023   :  { %2229 = vst.msk [vmem:[#allocation5] sm:$0x3] %vm507_vm5, %v2228_v0  ;;  %2257 = vst.msk [vmem:[#allocation5 + $0xe] sm:$0x3] %vm507_vm5, %v2256_v29 }
0x202a   :  { %v2258_v32 = vld [vmem:[#allocation5] sm:$0xff]  ;;  %v2259_v57 = vld [vmem:[#allocation5 + $0x8] sm:$0xff] }
0x202b   :  { %v2260_v59 = vpack.c.bf16 %v2259_v57, %v2258_v32 }
0x202d   :  { %2488 = vmatmul.mubr.msk.bf16.vlgmr.msra.gmra.mrb[36].mxu1 %vm417_vm6, %v2260_v59 }
0x2100   :  { %v2337_v61 = vpop.f32.mrb[36].mxu1 }
0x2101   :  { %v2338_v62 = vadd.f32 %v2460_v60, %v2337_v61  ;;  %v2489_v63 = vpop.f32.mrb[37].mxu1 }
0x2102   :  { %v2340_v35 = vpop.f32.mrb[38].mxu1 }
0x2103   :  { %2344 = vst [vmem:[#allocation11] sm:$0xff] %v2338_v62  ;;  %v2341_v1 = vadd.f32 %v2460_v60, %v2340_v35  ;;  %v2490_v2 = vpop.f32.mrb[39].mxu1 }
0x2105   :  { %2345 = vst [vmem:[#allocation11 + $0x8] sm:$0xff] %v2341_v1 }
0x2106   :  { %2800 = shalt.err (!%p2797_p6)
}
0x2107   :  { %s2801_s16 = scalar_lea.hbm %s3459_s9, 256 }
0x2108   :  { %p2802_p7 = scmp.ne.s32.totalorder %s3459_s9, %s2801_s16  ;;  %p2805_p8 = scmp.lt.u32.totalorder %s2801_s16, %s3459_s9 }
0x210a   :  { %p2807_p9 = pnand %p2805_p8, %p2802_p7 }
0x210c   :  { %2810 = shalt.err (!%p2807_p9)
}
0x210d   :  { %2357 = dma.vmem_to_hbm [thread:$0]  %s2352_s14, 256, %s3459_s9, [#allocation8], %s2821_s1, %s2821_s1, %s2822_s10  }
0x210e   :  { %2815 = dma.done.wait [#allocation8], 256  }
0x210f   :  { %2816 = vsyncadd [#allocation8], 4294967040 }
0x2110   :  { %2361 = vsyncpa [#allocation7], 1 }
0x2111   :  { %2362 = vsyncpa [#allocation10], 1 }
0x2112   :  { %2363 = vsyncpa [#allocation8], 1 }

</bundles_post_ra>
